<compile_context>
chip_gen: v7x
topology: tpu7x:2x2x1
jax: 0.10.0
libtpu: 0.0.40
codegen_flags: <defaults>
</compile_context>

<pallas_src>
import functools

import jax
import jax.numpy as jnp
from jax.experimental import pallas as pl
from jax.experimental.pallas import tpu as pltpu


_BATCH_TILE = 8   # sublane-full f32 batch tile; also the parallel grid unit


# --------------------------------------------------------------------------
# Fused forward kernel
# --------------------------------------------------------------------------

def _fused_bilstm_layer(gx, w_hh, out_scr, T, B, H4, cdt):
    """One bidirectional layer for BOTH branches (4 fused recurrences).

    gx:      (T*B, 16H) loop-layout gate input (x-projection, biases and
             time-invariant terms already folded in).  Row block s holds the
             forward direction at time s and the backward direction at time
             T-1-s.  Columns: [i|f|g|o], each 4H = [E_fwd|NE_fwd|E_bwd|NE_bwd].
    w_hh:    (4H, 16H) block-diagonal recurrent weights (compute dtype).
    out_scr: (T*B, 4H) scratch; row block s receives the fused h of step s.
    """
    h = jnp.zeros((B, H4), jnp.float32)
    c = jnp.zeros((B, H4), jnp.float32)
    for s in range(T):                        # static unroll; T is small (8)
        g = gx[s * B:(s + 1) * B, :] + jnp.dot(
            h.astype(cdt), w_hh, preferred_element_type=jnp.float32)
        i_g = jax.nn.sigmoid(g[:, 0:H4])          # 128-lane aligned slices
        f_g = jax.nn.sigmoid(g[:, H4:2 * H4])
        g_g = jnp.tanh(g[:, 2 * H4:3 * H4])
        o_g = jax.nn.sigmoid(g[:, 3 * H4:4 * H4])
        c = f_g * c + i_g * g_g
        h = o_g * jnp.tanh(c)
        out_scr[s * B:(s + 1) * B, :] = h         # full 128-lane unmasked store


def _rev_time(x, T, B):
    """One-time reversal of the time blocks of a (T*B, X) loop-layout array."""
    return jnp.concatenate(
        [x[(T - 1 - s) * B:(T - s) * B, :] for s in range(T)], axis=0)


def _fused_forward_kernel(pre_ref, x1_ref,
                          pre_w_ref, pre_b_ref,
                          w1_ref, w1p_ref, b1_ref, w1hh_ref,
                          w2a_ref, w2b_ref, b2_ref, w2hh_ref,
                          wha_ref, whb_ref, bh_ref,
                          heads_ref,
                          s1_scr, s2_scr):
    f32 = jnp.float32
    T, B, _ = x1_ref.shape
    H = pre_w_ref.shape[1]
    H4 = 4 * H
    cdt = w1hh_ref.dtype                      # MXU operand dtype (bf16 or f32)

    # ---- pre_sample_fc + ReLU (tiny, f32) ---------------------------------
    pre_feat = jnp.maximum(
        jnp.dot(pre_ref[...], pre_w_ref[...], preferred_element_type=f32)
        + pre_b_ref[...], 0.0)                                    # (B, H)

    # ---- time-invariant gate term, folded into gx before the loop ---------
    g_extra1 = (jnp.dot(pre_feat, w1p_ref[...], preferred_element_type=f32)
                + b1_ref[...])                                    # (B, 16H)

    # ---- layer 1: hoisted merged input projection + fused recurrence ------
    x1 = jnp.concatenate([x1_ref[s] for s in range(T)], axis=0)   # (T*B, 2*(De+Dn))
    gx1 = jnp.dot(x1.astype(cdt), w1_ref[...], preferred_element_type=f32)
    gx1 = gx1 + jnp.concatenate([g_extra1] * T, axis=0)
    _fused_bilstm_layer(gx1, w1hh_ref[...], s1_scr, T, B, H4, cdt)

    # ---- layer 2: input projection from layer-1 loop-layout output --------
    s1 = s1_scr[...]
    s1r = _rev_time(s1, T, B)
    gx2 = (jnp.dot(s1.astype(cdt), w2a_ref[...], preferred_element_type=f32)
           + jnp.dot(s1r.astype(cdt), w2b_ref[...], preferred_element_type=f32)
           + b2_ref[...])
    _fused_bilstm_layer(gx2, w2hh_ref[...], s2_scr, T, B, H4, cdt)

    # ---- fused FC heads (time-aligned): col 0 = f_E, col 1 = f_NE ---------
    s2 = s2_scr[...]
    s2r = _rev_time(s2, T, B)
    heads = (jnp.dot(s2, wha_ref[...], preferred_element_type=f32)
             + jnp.dot(s2r, whb_ref[...], preferred_element_type=f32)
             + bh_ref[...])                                       # (T*B, 2)
    for s in range(T):
        heads_ref[s] = heads[s * B:(s + 1) * B, :]


def _full_spec(shape):
    return pl.BlockSpec(shape, lambda b: (0,) * len(shape))


@functools.partial(jax.jit, static_argnames=("matmul_dtype",))
def forward(packed, pre_sample_features, eefdr_factors, noneefdr_factors,
            matmul_dtype=jnp.bfloat16):
    """Batch-first (B, T, D) inputs -> (output, f_E, f_NE), each (B, T)."""
    B, T, _ = eefdr_factors.shape
    H = packed["pre_w"].shape[1]
    H4 = 4 * H
    BT = _BATCH_TILE
    Bp = ((B + BT - 1) // BT) * BT

    def pad_b(x):
        return x if Bp == B else jnp.pad(
            x, [(0, Bp - B)] + [(0, 0)] * (x.ndim - 1))

    pre_p = pad_b(pre_sample_features)                        # (Bp, PRE)
    ef_t = jnp.transpose(pad_b(eefdr_factors), (1, 0, 2))     # (T, Bp, De)
    nef_t = jnp.transpose(pad_b(noneefdr_factors), (1, 0, 2)) # (T, Bp, Dn)
    # loop-layout factor features: forward-time features feed the forward
    # gate columns, time-reversed features feed the backward gate columns.
    x1 = jnp.concatenate([ef_t, nef_t, ef_t[::-1], nef_t[::-1]], axis=-1)

    cast = lambda w: w.astype(matmul_dtype)
    ops = (pre_p, x1,
           packed["pre_w"], packed["pre_b"],
           cast(packed["w1_fac"]), packed["w1_pre"], packed["b1"],
           cast(packed["w1_hh"]),
           cast(packed["w2_a"]), cast(packed["w2_b"]), packed["b2"],
           cast(packed["w2_hh"]),
           packed["wh_a"], packed["wh_b"], packed["b_head"])

    in_specs = [
        pl.BlockSpec((BT, pre_p.shape[1]), lambda b: (b, 0)),
        pl.BlockSpec((T, BT, x1.shape[-1]), lambda b: (0, b, 0)),
    ] + [_full_spec(o.shape) for o in ops[2:]]

    heads = pl.pallas_call(
        _fused_forward_kernel,
        grid=(Bp // BT,),
        out_shape=jax.ShapeDtypeStruct((T, Bp, 2), jnp.float32),
        in_specs=in_specs,
        out_specs=pl.BlockSpec((T, BT, 2), lambda b: (0, b, 0)),
        scratch_shapes=[pltpu.VMEM((T * BT, H4), jnp.float32),
                        pltpu.VMEM((T * BT, H4), jnp.float32)],
        compiler_params=pltpu.CompilerParams(
            dimension_semantics=("parallel",)),
    )(*ops)

    heads = heads[:, :B, :]                                   # (T, B, 2)
    f_e = jnp.transpose(heads[:, :, 0], (1, 0))               # (B, T)
    f_ne = jnp.transpose(heads[:, :, 1], (1, 0))
    out = f_e + f_ne + packed["c"][0, 0]                      # prior C folded here
    return out, f_e, f_ne


# --------------------------------------------------------------------------
# Parameters: PyTorch-compatible raw weights + packing into the fused layout
# --------------------------------------------------------------------------

def _uniform(key, shape, scale):
    return jax.random.uniform(key, shape, jnp.float32, -scale, scale)


def init_raw_params(seed, pre_size, eefdr_size, noneefdr_size, hidden,
                    output_size=1):
    key = jax.random.PRNGKey(seed)
    key, k1, k2, k3, k4, k5, k6 = jax.random.split(key, 7)
    s_pre = 1.0 / (pre_size ** 0.5)
    s_fc = 1.0 / ((2 * hidden) ** 0.5)
    raw = {
        "pre_w": _uniform(k1, (pre_size, hidden), s_pre),
        "pre_b": _uniform(k2, (1, hidden), s_pre),
        "eefdr_fc_w": _uniform(k3, (2 * hidden, output_size), s_fc),
        "eefdr_fc_b": _uniform(k4, (1, output_size), s_fc),
        "noneefdr_fc_w": _uniform(k5, (2 * hidden, output_size), s_fc),
        "noneefdr_fc_b": _uniform(k6, (1, output_size), s_fc),
        "C": jnp.zeros((1, 1), jnp.float32),          # nn.Parameter(0.0)
    }

    def lstm_stack(key, in0):
        scale = 1.0 / (hidden ** 0.5)
        layers = []
        for layer in range(2):                        # module default num_layers=2
            din = in0 if layer == 0 else 2 * hidden
            dirs = []
            for _ in range(2):                        # forward, backward
                key, a, b_, c_, d_ = jax.random.split(key, 5)
                w_ih = _uniform(a, (din, 4 * hidden), scale)       # (Din, 4H)
                w_hh = _uniform(b_, (hidden, 4 * hidden), scale)   # (H, 4H)
                bias = (_uniform(c_, (1, 4 * hidden), scale)
                        + _uniform(d_, (1, 4 * hidden), scale))    # b_ih + b_hh
                dirs.append((w_ih, w_hh, bias))
            layers.append(tuple(dirs))
        return layers, key

    raw["eefdr_lstm"], key = lstm_stack(key, eefdr_size + hidden)
    raw["noneefdr_lstm"], key = lstm_stack(key, noneefdr_size + hidden)
    return raw


def pack_params(raw):
    """Pack raw per-branch/per-direction weights into the fused layout.

    State columns (h, c, scratch): [E_fwd | NE_fwd | E_bwd | NE_bwd];
      state col(d, r, k) = d*2H + r*H + k.
    Gate columns: [i | f | g | o], each 4H wide with the state ordering;
      gate col(j, d, r, k) = j*4H + d*2H + r*H + k.
    """
    H = raw["pre_w"].shape[1]
    GW = 16 * H
    H2, H4 = 2 * H, 4 * H
    assert raw["eefdr_fc_w"].shape[1] == 1, "fused head packing assumes output_size == 1"
    De = raw["eefdr_lstm"][0][0][0].shape[0] - H
    Dn = raw["noneefdr_lstm"][0][0][0].shape[0] - H

    def place(dst, w, d, r, row0):
        # w: (rows, 4H) raw with gate-major columns [i|f|g|o]
        rows = w.shape[0]
        for j in range(4):
            c0 = j * H4 + d * H2 + r * H
            dst = dst.at[row0:row0 + rows, c0:c0 + H].set(w[:, j * H:(j + 1) * H])
        return dst

    branches = (raw["eefdr_lstm"], raw["noneefdr_lstm"])   # r = 0 (E), 1 (NE)

    # ---- layer 1 ----
    # x1 feature rows: [ef fwd-time | nef fwd-time | ef rev-time | nef rev-time]
    fac_row0 = {(0, 0): 0, (1, 0): De, (0, 1): De + Dn, (1, 1): 2 * De + Dn}
    w1_fac = jnp.zeros((2 * (De + Dn), GW), jnp.float32)
    w1_pre = jnp.zeros((H, GW), jnp.float32)
    b1 = jnp.zeros((1, GW), jnp.float32)
    w1_hh = jnp.zeros((H4, GW), jnp.float32)
    for r, branch in enumerate(branches):
        dfac = De if r == 0 else Dn
        for d in range(2):                                  # 0 = fwd, 1 = bwd
            w_ih, w_hh, bias = branch[0][d]
            w1_fac = place(w1_fac, w_ih[:dfac], d, r, fac_row0[(r, d)])
            w1_pre = place(w1_pre, w_ih[dfac:], d, r, 0)
            b1 = place(b1, bias, d, r, 0)
            w1_hh = place(w1_hh, w_hh, d, r, d * H2 + r * H)

    # ---- layer 2 ----
    # gx2 = S1 @ w2_a + rev_time(S1) @ w2_b, S1 = layer-1 loop-layout output.
    w2_a = jnp.zeros((H4, GW), jnp.float32)
    w2_b = jnp.zeros((H4, GW), jnp.float32)
    b2 = jnp.zeros((1, GW), jnp.float32)
    w2_hh = jnp.zeros((H4, GW), jnp.float32)
    for r, branch in enumerate(branches):
        (wih_f, whh_f, bias_f), (wih_b, whh_b, bias_b) = branch[1]
        # S1 fwd cols (time s)      -> fwd gates; S1 bwd cols (time T-1-s) -> bwd gates
        w2_a = place(w2_a, wih_f[:H], 0, r, r * H)
        w2_a = place(w2_a, wih_b[H:], 1, r, H2 + r * H)
        # rev(S1) fwd cols (T-1-s)  -> bwd gates; rev(S1) bwd cols (time s) -> fwd gates
        w2_b = place(w2_b, wih_b[:H], 1, r, r * H)
        w2_b = place(w2_b, wih_f[H:], 0, r, H2 + r * H)
        b2 = place(b2, bias_f, 0, r, 0)
        b2 = place(b2, bias_b, 1, r, 0)
        w2_hh = place(w2_hh, whh_f, 0, r, r * H)
        w2_hh = place(w2_hh, whh_b, 1, r, H2 + r * H)

    # ---- fused heads: heads = S2 @ wh_a + rev_time(S2) @ wh_b + b_head ----
    w_e, w_n = raw["eefdr_fc_w"], raw["noneefdr_fc_w"]
    wh_a = jnp.zeros((H4, 2), jnp.float32)
    wh_b = jnp.zeros((H4, 2), jnp.float32)
    wh_a = wh_a.at[0:H, 0:1].set(w_e[0:H])           # E_fwd(t)
    wh_a = wh_a.at[H:H2, 1:2].set(w_n[0:H])          # NE_fwd(t)
    wh_b = wh_b.at[H2:3 * H, 0:1].set(w_e[H:H2])     # E_bwd(t)
    wh_b = wh_b.at[3 * H:H4, 1:2].set(w_n[H:H2])     # NE_bwd(t)
    b_head = jnp.concatenate([raw["eefdr_fc_b"], raw["noneefdr_fc_b"]], axis=1)

    return {
        "pre_w": raw["pre_w"], "pre_b": raw["pre_b"],
        "w1_fac": w1_fac, "w1_pre": w1_pre, "b1": b1, "w1_hh": w1_hh,
        "w2_a": w2_a, "w2_b": w2_b, "b2": b2, "w2_hh": w2_hh,
        "wh_a": wh_a, "wh_b": wh_b, "b_head": b_head,
        "c": raw["C"],
    }


# --------------------------------------------------------------------------
# Plain-JAX reference of BiLSTMModelWithPrior.forward (for verification)
# --------------------------------------------------------------------------

def _lstm_dir_ref(x, w_ih, w_hh, b, H):
    B, T, _ = x.shape
    h = jnp.zeros((B, H), jnp.float32)
    c = jnp.zeros((B, H), jnp.float32)
    outs = []
    for t in range(T):
        g = x[:, t, :] @ w_ih + h @ w_hh + b
        i = jax.nn.sigmoid(g[:, 0:H])
        f = jax.nn.sigmoid(g[:, H:2 * H])
        gg = jnp.tanh(g[:, 2 * H:3 * H])
        o = jax.nn.sigmoid(g[:, 3 * H:4 * H])
        c = f * c + i * gg
        h = o * jnp.tanh(c)
        outs.append(h)
    return jnp.stack(outs, axis=1)               # (B, T, H)


def _bilstm_ref(x, layers, H):
    inp = x
    for (p_f, p_b) in layers:
        out_f = _lstm_dir_ref(inp, *p_f, H)
        out_b = _lstm_dir_ref(inp[:, ::-1], *p_b, H)[:, ::-1]
        inp = jnp.concatenate([out_f, out_b], axis=-1)
    return inp


def forward_ref(raw, pre, ef, nef):
    H = raw["pre_w"].shape[1]
    B, T, _ = ef.shape
    pre_feat = jnp.maximum(pre @ raw["pre_w"] + raw["pre_b"], 0.0)
    pre_seq = jnp.broadcast_to(pre_feat[:, None, :], (B, T, H))
    e_out = _bilstm_ref(jnp.concatenate([ef, pre_seq], axis=2),
                        raw["eefdr_lstm"], H)
    n_out = _bilstm_ref(jnp.concatenate([nef, pre_seq], axis=2),
                        raw["noneefdr_lstm"], H)
    f_e = (e_out.reshape(B * T, 2 * H) @ raw["eefdr_fc_w"]
           + raw["eefdr_fc_b"]).reshape(B, T)
    f_ne = (n_out.reshape(B * T, 2 * H) @ raw["noneefdr_fc_w"]
            + raw["noneefdr_fc_b"]).reshape(B, T)
    out = f_e + f_ne + raw["C"][0, 0]
    return out, f_e, f_ne


# --------------------------------------------------------------------------

if __name__ == "__main__":
    B, T = 2, 8
    PRE, EEFDR, NONEEFDR = 5, 13, 10
    HIDDEN, OUT = 32, 1

    raw = init_raw_params(0, PRE, EEFDR, NONEEFDR, HIDDEN, OUT)
    packed = pack_params(raw)

    key = jax.random.PRNGKey(0)
    k1, k2, k3 = jax.random.split(key, 3)
    pre = jax.random.normal(k1, (B, PRE), jnp.float32)
    ef = jax.random.normal(k2, (B, T, EEFDR), jnp.float32)
    nef = jax.random.normal(k3, (B, T, NONEEFDR), jnp.float32)

    # performance path: bf16 MXU operands, f32 accumulation + gate math
    out, f_e, f_ne = forward(packed, pre, ef, nef)
    jax.block_until_ready((out, f_e, f_ne))
    assert out.shape == (B, T) and f_e.shape == (B, T) and f_ne.shape == (B, T)

    # plain-JAX reference of the PyTorch forward
    with jax.default_matmul_precision("float32"):
        out_r, f_e_r, f_ne_r = forward_ref(raw, pre, ef, nef)

    def max_err(a, b):
        return float(jnp.max(jnp.abs(a - b)))

    # structural check: full-precision kernel vs reference (tight)
    out32, f_e32, f_ne32 = forward(packed, pre, ef, nef,
                                   matmul_dtype=jnp.float32)
    err32 = max(max_err(out32, out_r), max_err(f_e32, f_e_r),
                max_err(f_ne32, f_ne_r))
    assert err32 < 2e-2, f"f32 kernel mismatch vs reference: {err32}"

    # bf16-MXU path: operand rounding (~2^-8 relative) amplified through two
    # stacked bidirectional layers over T=8 stays well below 0.1 absolute for
    # these O(1) outputs (accumulation and gate math remain f32).
    err16 = max(max_err(out, out_r), max_err(f_e, f_e_r),
                max_err(f_ne, f_ne_r))
    assert err16 < 1e-1, f"bf16 kernel drifted vs reference: {err16}"

    print("KERNEL_OK")
</pallas_src>

<mosaic_0001>
module attributes {stable_mosaic.version = 11 : i64} {
  func.func @_fused_forward_kernel(%arg0: i32, %arg1: memref<8x5xf32, #tpu.memory_space<vmem>>, %arg2: memref<8x8x46xf32, #tpu.memory_space<vmem>>, %arg3: memref<5x32xf32, #tpu.memory_space<vmem>>, %arg4: memref<1x32xf32, #tpu.memory_space<vmem>>, %arg5: memref<46x512xbf16, #tpu.memory_space<vmem>>, %arg6: memref<32x512xf32, #tpu.memory_space<vmem>>, %arg7: memref<1x512xf32, #tpu.memory_space<vmem>>, %arg8: memref<128x512xbf16, #tpu.memory_space<vmem>>, %arg9: memref<128x512xbf16, #tpu.memory_space<vmem>>, %arg10: memref<128x512xbf16, #tpu.memory_space<vmem>>, %arg11: memref<1x512xf32, #tpu.memory_space<vmem>>, %arg12: memref<128x512xbf16, #tpu.memory_space<vmem>>, %arg13: memref<128x2xf32, #tpu.memory_space<vmem>>, %arg14: memref<128x2xf32, #tpu.memory_space<vmem>>, %arg15: memref<1x2xf32, #tpu.memory_space<vmem>>, %arg16: memref<8x8x2xf32, #tpu.memory_space<vmem>>, %arg17: memref<64x128xf32, #tpu.memory_space<vmem>>, %arg18: memref<64x128xf32, #tpu.memory_space<vmem>>) attributes {dimension_semantics = [#tpu.dimension_semantics<parallel>], iteration_bounds = array<i64: 1>, scalar_prefetch = 0 : i64, scratch_operands = 2 : i64, tpu.core_type = #tpu.core_type<tc>, window_params = [{transform_indices = @transform_0, window_bounds = array<i64: 8, 5>}, {transform_indices = @transform_1, window_bounds = array<i64: 8, 8, 46>}, {pipeline_mode = #tpu.pipeline_mode<synchronous>, transform_indices = @transform_2, window_bounds = array<i64: 5, 32>}, {pipeline_mode = #tpu.pipeline_mode<synchronous>, transform_indices = @transform_3, window_bounds = array<i64: 1, 32>}, {pipeline_mode = #tpu.pipeline_mode<synchronous>, transform_indices = @transform_4, window_bounds = array<i64: 46, 512>}, {pipeline_mode = #tpu.pipeline_mode<synchronous>, transform_indices = @transform_5, window_bounds = array<i64: 32, 512>}, {pipeline_mode = #tpu.pipeline_mode<synchronous>, transform_indices = @transform_6, window_bounds = array<i64: 1, 512>}, {pipeline_mode = #tpu.pipeline_mode<synchronous>, transform_indices = @transform_7, window_bounds = array<i64: 128, 512>}, {pipeline_mode = #tpu.pipeline_mode<synchronous>, transform_indices = @transform_8, window_bounds = array<i64: 128, 512>}, {pipeline_mode = #tpu.pipeline_mode<synchronous>, transform_indices = @transform_9, window_bounds = array<i64: 128, 512>}, {pipeline_mode = #tpu.pipeline_mode<synchronous>, transform_indices = @transform_10, window_bounds = array<i64: 1, 512>}, {pipeline_mode = #tpu.pipeline_mode<synchronous>, transform_indices = @transform_11, window_bounds = array<i64: 128, 512>}, {pipeline_mode = #tpu.pipeline_mode<synchronous>, transform_indices = @transform_12, window_bounds = array<i64: 128, 2>}, {pipeline_mode = #tpu.pipeline_mode<synchronous>, transform_indices = @transform_13, window_bounds = array<i64: 128, 2>}, {pipeline_mode = #tpu.pipeline_mode<synchronous>, transform_indices = @transform_14, window_bounds = array<i64: 1, 2>}, {transform_indices = @transform_15, window_bounds = array<i64: 8, 8, 2>}]} {
    %c0 = arith.constant 0 : index
    %c0_0 = arith.constant 0 : index
    %0 = vector.load %arg1[%c0, %c0_0] : memref<8x5xf32, #tpu.memory_space<vmem>>, vector<8x5xf32>
    %c0_1 = arith.constant 0 : index
    %c0_2 = arith.constant 0 : index
    %1 = vector.load %arg3[%c0_1, %c0_2] : memref<5x32xf32, #tpu.memory_space<vmem>>, vector<5x32xf32>
    %cst = arith.constant dense<0.000000e+00> : vector<8x32xf32>
    %2 = tpu.matmul %0, %1, %cst {dimension_numbers = #tpu.dot_dimension_numbers<[1], [0], [0], [1], [0, 0, 1, 1], [], []>} : vector<8x5xf32>, vector<5x32xf32>, vector<8x32xf32> -> vector<8x32xf32>
    %c0_3 = arith.constant 0 : index
    %c0_4 = arith.constant 0 : index
    %3 = vector.load %arg4[%c0_3, %c0_4] : memref<1x32xf32, #tpu.memory_space<vmem>>, vector<1x32xf32>
    %4 = vector.broadcast %3 : vector<1x32xf32> to vector<8x32xf32>
    %5 = arith.addf %2, %4 : vector<8x32xf32>
    %cst_5 = arith.constant 0.000000e+00 : f32
    %6 = vector.broadcast %cst_5 : f32 to vector<8x32xf32>
    %7 = arith.maximumf %5, %6 : vector<8x32xf32>
    %c0_6 = arith.constant 0 : index
    %c0_7 = arith.constant 0 : index
    %8 = vector.load %arg6[%c0_6, %c0_7] : memref<32x512xf32, #tpu.memory_space<vmem>>, vector<32x512xf32>
    %cst_8 = arith.constant dense<0.000000e+00> : vector<8x512xf32>
    %9 = tpu.matmul %7, %8, %cst_8 {dimension_numbers = #tpu.dot_dimension_numbers<[1], [0], [0], [1], [0, 0, 1, 1], [], []>} : vector<8x32xf32>, vector<32x512xf32>, vector<8x512xf32> -> vector<8x512xf32>
    %c0_9 = arith.constant 0 : index
    %c0_10 = arith.constant 0 : index
    %10 = vector.load %arg7[%c0_9, %c0_10] : memref<1x512xf32, #tpu.memory_space<vmem>>, vector<1x512xf32>
    %11 = vector.broadcast %10 : vector<1x512xf32> to vector<8x512xf32>
    %12 = arith.addf %9, %11 : vector<8x512xf32>
    %c0_11 = arith.constant 0 : index
    %c0_12 = arith.constant 0 : index
    %c0_13 = arith.constant 0 : index
    %13 = vector.load %arg2[%c0_11, %c0_12, %c0_13] : memref<8x8x46xf32, #tpu.memory_space<vmem>>, vector<1x8x46xf32>
    %14 = vector.shape_cast %13 : vector<1x8x46xf32> to vector<8x46xf32>
    %c1 = arith.constant 1 : index
    %c0_14 = arith.constant 0 : index
    %c0_15 = arith.constant 0 : index
    %15 = vector.load %arg2[%c1, %c0_14, %c0_15] : memref<8x8x46xf32, #tpu.memory_space<vmem>>, vector<1x8x46xf32>
    %16 = vector.shape_cast %15 : vector<1x8x46xf32> to vector<8x46xf32>
    %c2 = arith.constant 2 : index
    %c0_16 = arith.constant 0 : index
    %c0_17 = arith.constant 0 : index
    %17 = vector.load %arg2[%c2, %c0_16, %c0_17] : memref<8x8x46xf32, #tpu.memory_space<vmem>>, vector<1x8x46xf32>
    %18 = vector.shape_cast %17 : vector<1x8x46xf32> to vector<8x46xf32>
    %c3 = arith.constant 3 : index
    %c0_18 = arith.constant 0 : index
    %c0_19 = arith.constant 0 : index
    %19 = vector.load %arg2[%c3, %c0_18, %c0_19] : memref<8x8x46xf32, #tpu.memory_space<vmem>>, vector<1x8x46xf32>
    %20 = vector.shape_cast %19 : vector<1x8x46xf32> to vector<8x46xf32>
    %c4 = arith.constant 4 : index
    %c0_20 = arith.constant 0 : index
    %c0_21 = arith.constant 0 : index
    %21 = vector.load %arg2[%c4, %c0_20, %c0_21] : memref<8x8x46xf32, #tpu.memory_space<vmem>>, vector<1x8x46xf32>
    %22 = vector.shape_cast %21 : vector<1x8x46xf32> to vector<8x46xf32>
    %c5 = arith.constant 5 : index
    %c0_22 = arith.constant 0 : index
    %c0_23 = arith.constant 0 : index
    %23 = vector.load %arg2[%c5, %c0_22, %c0_23] : memref<8x8x46xf32, #tpu.memory_space<vmem>>, vector<1x8x46xf32>
    %24 = vector.shape_cast %23 : vector<1x8x46xf32> to vector<8x46xf32>
    %c6 = arith.constant 6 : index
    %c0_24 = arith.constant 0 : index
    %c0_25 = arith.constant 0 : index
    %25 = vector.load %arg2[%c6, %c0_24, %c0_25] : memref<8x8x46xf32, #tpu.memory_space<vmem>>, vector<1x8x46xf32>
    %26 = vector.shape_cast %25 : vector<1x8x46xf32> to vector<8x46xf32>
    %c7 = arith.constant 7 : index
    %c0_26 = arith.constant 0 : index
    %c0_27 = arith.constant 0 : index
    %27 = vector.load %arg2[%c7, %c0_26, %c0_27] : memref<8x8x46xf32, #tpu.memory_space<vmem>>, vector<1x8x46xf32>
    %28 = vector.shape_cast %27 : vector<1x8x46xf32> to vector<8x46xf32>
    %29 = tpu.concatenate %14, %16, %18, %20, %22, %24, %26, %28 in 0 : vector<8x46xf32>, vector<8x46xf32>, vector<8x46xf32>, vector<8x46xf32>, vector<8x46xf32>, vector<8x46xf32>, vector<8x46xf32>, vector<8x46xf32> -> vector<64x46xf32>
    %30 = arith.truncf %29 : vector<64x46xf32> to vector<64x46xbf16>
    %c0_28 = arith.constant 0 : index
    %c0_29 = arith.constant 0 : index
    %31 = vector.load %arg5[%c0_28, %c0_29] : memref<46x512xbf16, #tpu.memory_space<vmem>>, vector<46x512xbf16>
    %cst_30 = arith.constant dense<0.000000e+00> : vector<64x512xf32>
    %32 = tpu.matmul %30, %31, %cst_30 {dimension_numbers = #tpu.dot_dimension_numbers<[1], [0], [0], [1], [0, 0, 1, 1], [], []>} : vector<64x46xbf16>, vector<46x512xbf16>, vector<64x512xf32> -> vector<64x512xf32>
    %33 = tpu.concatenate %12, %12, %12, %12, %12, %12, %12, %12 in 0 : vector<8x512xf32>, vector<8x512xf32>, vector<8x512xf32>, vector<8x512xf32>, vector<8x512xf32>, vector<8x512xf32>, vector<8x512xf32>, vector<8x512xf32> -> vector<64x512xf32>
    %34 = arith.addf %32, %33 : vector<64x512xf32>
    %c0_31 = arith.constant 0 : index
    %c0_32 = arith.constant 0 : index
    %35 = vector.load %arg8[%c0_31, %c0_32] : memref<128x512xbf16, #tpu.memory_space<vmem>>, vector<128x512xbf16>
    %cst_33 = arith.constant 0.000000e+00 : f32
    %36 = vector.broadcast %cst_33 : f32 to vector<8x128xf32>
    %cst_34 = arith.constant 0.000000e+00 : f32
    %37 = vector.broadcast %cst_34 : f32 to vector<8x128xf32>
    %38 = vector.extract_strided_slice %34 {offsets = [0, 0], sizes = [8, 512], strides = [1, 1]} : vector<64x512xf32> to vector<8x512xf32>
    %39 = arith.truncf %36 : vector<8x128xf32> to vector<8x128xbf16>
    %cst_35 = arith.constant dense<0.000000e+00> : vector<8x512xf32>
    %40 = tpu.matmul %39, %35, %cst_35 {dimension_numbers = #tpu.dot_dimension_numbers<[1], [0], [0], [1], [0, 0, 1, 1], [], []>} : vector<8x128xbf16>, vector<128x512xbf16>, vector<8x512xf32> -> vector<8x512xf32>
    %41 = arith.addf %38, %40 : vector<8x512xf32>
    %42 = vector.extract_strided_slice %41 {offsets = [0, 0], sizes = [8, 128], strides = [1, 1]} : vector<8x512xf32> to vector<8x128xf32>
    %43 = arith.negf %42 : vector<8x128xf32>
    %44 = math.exp %43 : vector<8x128xf32>
    %cst_36 = arith.constant 1.000000e+00 : f32
    %45 = vector.broadcast %cst_36 : f32 to vector<8x128xf32>
    %46 = arith.addf %45, %44 : vector<8x128xf32>
    %47 = arith.divf %45, %46 : vector<8x128xf32>
    %48 = vector.extract_strided_slice %41 {offsets = [0, 128], sizes = [8, 128], strides = [1, 1]} : vector<8x512xf32> to vector<8x128xf32>
    %49 = arith.negf %48 : vector<8x128xf32>
    %50 = math.exp %49 : vector<8x128xf32>
    %cst_37 = arith.constant 1.000000e+00 : f32
    %51 = vector.broadcast %cst_37 : f32 to vector<8x128xf32>
    %52 = arith.addf %51, %50 : vector<8x128xf32>
    %53 = arith.divf %51, %52 : vector<8x128xf32>
    %54 = vector.extract_strided_slice %41 {offsets = [0, 256], sizes = [8, 128], strides = [1, 1]} : vector<8x512xf32> to vector<8x128xf32>
    %55 = math.tanh %54 : vector<8x128xf32>
    %56 = vector.extract_strided_slice %41 {offsets = [0, 384], sizes = [8, 128], strides = [1, 1]} : vector<8x512xf32> to vector<8x128xf32>
    %57 = arith.negf %56 : vector<8x128xf32>
    %58 = math.exp %57 : vector<8x128xf32>
    %cst_38 = arith.constant 1.000000e+00 : f32
    %59 = vector.broadcast %cst_38 : f32 to vector<8x128xf32>
    %60 = arith.addf %59, %58 : vector<8x128xf32>
    %61 = arith.divf %59, %60 : vector<8x128xf32>
    %62 = arith.mulf %53, %37 : vector<8x128xf32>
    %63 = arith.mulf %47, %55 : vector<8x128xf32>
    %64 = arith.addf %62, %63 : vector<8x128xf32>
    %65 = math.tanh %64 : vector<8x128xf32>
    %66 = arith.mulf %61, %65 : vector<8x128xf32>
    %c0_39 = arith.constant 0 : index
    %c0_40 = arith.constant 0 : index
    %67 = vector.load %arg17[%c0_39, %c0_40] : memref<64x128xf32, #tpu.memory_space<vmem>>, vector<8x128xf32>
    tpu.vector_store %arg17[%c0_39, %c0_40], %66 {strides = array<i32>} : memref<64x128xf32, #tpu.memory_space<vmem>>, vector<8x128xf32>,
    %68 = vector.extract_strided_slice %34 {offsets = [8, 0], sizes = [8, 512], strides = [1, 1]} : vector<64x512xf32> to vector<8x512xf32>
    %69 = arith.truncf %66 : vector<8x128xf32> to vector<8x128xbf16>
    %cst_41 = arith.constant dense<0.000000e+00> : vector<8x512xf32>
    %70 = tpu.matmul %69, %35, %cst_41 {dimension_numbers = #tpu.dot_dimension_numbers<[1], [0], [0], [1], [0, 0, 1, 1], [], []>} : vector<8x128xbf16>, vector<128x512xbf16>, vector<8x512xf32> -> vector<8x512xf32>
    %71 = arith.addf %68, %70 : vector<8x512xf32>
    %72 = vector.extract_strided_slice %71 {offsets = [0, 0], sizes = [8, 128], strides = [1, 1]} : vector<8x512xf32> to vector<8x128xf32>
    %73 = arith.negf %72 : vector<8x128xf32>
    %74 = math.exp %73 : vector<8x128xf32>
    %cst_42 = arith.constant 1.000000e+00 : f32
    %75 = vector.broadcast %cst_42 : f32 to vector<8x128xf32>
    %76 = arith.addf %75, %74 : vector<8x128xf32>
    %77 = arith.divf %75, %76 : vector<8x128xf32>
    %78 = vector.extract_strided_slice %71 {offsets = [0, 128], sizes = [8, 128], strides = [1, 1]} : vector<8x512xf32> to vector<8x128xf32>
    %79 = arith.negf %78 : vector<8x128xf32>
    %80 = math.exp %79 : vector<8x128xf32>
    %cst_43 = arith.constant 1.000000e+00 : f32
    %81 = vector.broadcast %cst_43 : f32 to vector<8x128xf32>
    %82 = arith.addf %81, %80 : vector<8x128xf32>
    %83 = arith.divf %81, %82 : vector<8x128xf32>
    %84 = vector.extract_strided_slice %71 {offsets = [0, 256], sizes = [8, 128], strides = [1, 1]} : vector<8x512xf32> to vector<8x128xf32>
    %85 = math.tanh %84 : vector<8x128xf32>
    %86 = vector.extract_strided_slice %71 {offsets = [0, 384], sizes = [8, 128], strides = [1, 1]} : vector<8x512xf32> to vector<8x128xf32>
    %87 = arith.negf %86 : vector<8x128xf32>
    %88 = math.exp %87 : vector<8x128xf32>
    %cst_44 = arith.constant 1.000000e+00 : f32
    %89 = vector.broadcast %cst_44 : f32 to vector<8x128xf32>
    %90 = arith.addf %89, %88 : vector<8x128xf32>
    %91 = arith.divf %89, %90 : vector<8x128xf32>
    %92 = arith.mulf %83, %64 : vector<8x128xf32>
    %93 = arith.mulf %77, %85 : vector<8x128xf32>
    %94 = arith.addf %92, %93 : vector<8x128xf32>
    %95 = math.tanh %94 : vector<8x128xf32>
    %96 = arith.mulf %91, %95 : vector<8x128xf32>
    %c8 = arith.constant 8 : index
    %c0_45 = arith.constant 0 : index
    %97 = vector.load %arg17[%c8, %c0_45] : memref<64x128xf32, #tpu.memory_space<vmem>>, vector<8x128xf32>
    tpu.vector_store %arg17[%c8, %c0_45], %96 {strides = array<i32>} : memref<64x128xf32, #tpu.memory_space<vmem>>, vector<8x128xf32>,
    %98 = vector.extract_strided_slice %34 {offsets = [16, 0], sizes = [8, 512], strides = [1, 1]} : vector<64x512xf32> to vector<8x512xf32>
    %99 = arith.truncf %96 : vector<8x128xf32> to vector<8x128xbf16>
    %cst_46 = arith.constant dense<0.000000e+00> : vector<8x512xf32>
    %100 = tpu.matmul %99, %35, %cst_46 {dimension_numbers = #tpu.dot_dimension_numbers<[1], [0], [0], [1], [0, 0, 1, 1], [], []>} : vector<8x128xbf16>, vector<128x512xbf16>, vector<8x512xf32> -> vector<8x512xf32>
    %101 = arith.addf %98, %100 : vector<8x512xf32>
    %102 = vector.extract_strided_slice %101 {offsets = [0, 0], sizes = [8, 128], strides = [1, 1]} : vector<8x512xf32> to vector<8x128xf32>
    %103 = arith.negf %102 : vector<8x128xf32>
    %104 = math.exp %103 : vector<8x128xf32>
    %cst_47 = arith.constant 1.000000e+00 : f32
    %105 = vector.broadcast %cst_47 : f32 to vector<8x128xf32>
    %106 = arith.addf %105, %104 : vector<8x128xf32>
    %107 = arith.divf %105, %106 : vector<8x128xf32>
    %108 = vector.extract_strided_slice %101 {offsets = [0, 128], sizes = [8, 128], strides = [1, 1]} : vector<8x512xf32> to vector<8x128xf32>
    %109 = arith.negf %108 : vector<8x128xf32>
    %110 = math.exp %109 : vector<8x128xf32>
    %cst_48 = arith.constant 1.000000e+00 : f32
    %111 = vector.broadcast %cst_48 : f32 to vector<8x128xf32>
    %112 = arith.addf %111, %110 : vector<8x128xf32>
    %113 = arith.divf %111, %112 : vector<8x128xf32>
    %114 = vector.extract_strided_slice %101 {offsets = [0, 256], sizes = [8, 128], strides = [1, 1]} : vector<8x512xf32> to vector<8x128xf32>
    %115 = math.tanh %114 : vector<8x128xf32>
    %116 = vector.extract_strided_slice %101 {offsets = [0, 384], sizes = [8, 128], strides = [1, 1]} : vector<8x512xf32> to vector<8x128xf32>
    %117 = arith.negf %116 : vector<8x128xf32>
    %118 = math.exp %117 : vector<8x128xf32>
    %cst_49 = arith.constant 1.000000e+00 : f32
    %119 = vector.broadcast %cst_49 : f32 to vector<8x128xf32>
    %120 = arith.addf %119, %118 : vector<8x128xf32>
    %121 = arith.divf %119, %120 : vector<8x128xf32>
    %122 = arith.mulf %113, %94 : vector<8x128xf32>
    %123 = arith.mulf %107, %115 : vector<8x128xf32>
    %124 = arith.addf %122, %123 : vector<8x128xf32>
    %125 = math.tanh %124 : vector<8x128xf32>
    %126 = arith.mulf %121, %125 : vector<8x128xf32>
    %c16 = arith.constant 16 : index
    %c0_50 = arith.constant 0 : index
    %127 = vector.load %arg17[%c16, %c0_50] : memref<64x128xf32, #tpu.memory_space<vmem>>, vector<8x128xf32>
    tpu.vector_store %arg17[%c16, %c0_50], %126 {strides = array<i32>} : memref<64x128xf32, #tpu.memory_space<vmem>>, vector<8x128xf32>,
    %128 = vector.extract_strided_slice %34 {offsets = [24, 0], sizes = [8, 512], strides = [1, 1]} : vector<64x512xf32> to vector<8x512xf32>
    %129 = arith.truncf %126 : vector<8x128xf32> to vector<8x128xbf16>
    %cst_51 = arith.constant dense<0.000000e+00> : vector<8x512xf32>
    %130 = tpu.matmul %129, %35, %cst_51 {dimension_numbers = #tpu.dot_dimension_numbers<[1], [0], [0], [1], [0, 0, 1, 1], [], []>} : vector<8x128xbf16>, vector<128x512xbf16>, vector<8x512xf32> -> vector<8x512xf32>
    %131 = arith.addf %128, %130 : vector<8x512xf32>
    %132 = vector.extract_strided_slice %131 {offsets = [0, 0], sizes = [8, 128], strides = [1, 1]} : vector<8x512xf32> to vector<8x128xf32>
    %133 = arith.negf %132 : vector<8x128xf32>
    %134 = math.exp %133 : vector<8x128xf32>
    %cst_52 = arith.constant 1.000000e+00 : f32
    %135 = vector.broadcast %cst_52 : f32 to vector<8x128xf32>
    %136 = arith.addf %135, %134 : vector<8x128xf32>
    %137 = arith.divf %135, %136 : vector<8x128xf32>
    %138 = vector.extract_strided_slice %131 {offsets = [0, 128], sizes = [8, 128], strides = [1, 1]} : vector<8x512xf32> to vector<8x128xf32>
    %139 = arith.negf %138 : vector<8x128xf32>
    %140 = math.exp %139 : vector<8x128xf32>
    %cst_53 = arith.constant 1.000000e+00 : f32
    %141 = vector.broadcast %cst_53 : f32 to vector<8x128xf32>
    %142 = arith.addf %141, %140 : vector<8x128xf32>
    %143 = arith.divf %141, %142 : vector<8x128xf32>
    %144 = vector.extract_strided_slice %131 {offsets = [0, 256], sizes = [8, 128], strides = [1, 1]} : vector<8x512xf32> to vector<8x128xf32>
    %145 = math.tanh %144 : vector<8x128xf32>
    %146 = vector.extract_strided_slice %131 {offsets = [0, 384], sizes = [8, 128], strides = [1, 1]} : vector<8x512xf32> to vector<8x128xf32>
    %147 = arith.negf %146 : vector<8x128xf32>
    %148 = math.exp %147 : vector<8x128xf32>
    %cst_54 = arith.constant 1.000000e+00 : f32
    %149 = vector.broadcast %cst_54 : f32 to vector<8x128xf32>
    %150 = arith.addf %149, %148 : vector<8x128xf32>
    %151 = arith.divf %149, %150 : vector<8x128xf32>
    %152 = arith.mulf %143, %124 : vector<8x128xf32>
    %153 = arith.mulf %137, %145 : vector<8x128xf32>
    %154 = arith.addf %152, %153 : vector<8x128xf32>
    %155 = math.tanh %154 : vector<8x128xf32>
    %156 = arith.mulf %151, %155 : vector<8x128xf32>
    %c24 = arith.constant 24 : index
    %c0_55 = arith.constant 0 : index
    %157 = vector.load %arg17[%c24, %c0_55] : memref<64x128xf32, #tpu.memory_space<vmem>>, vector<8x128xf32>
    tpu.vector_store %arg17[%c24, %c0_55], %156 {strides = array<i32>} : memref<64x128xf32, #tpu.memory_space<vmem>>, vector<8x128xf32>,
    %158 = vector.extract_strided_slice %34 {offsets = [32, 0], sizes = [8, 512], strides = [1, 1]} : vector<64x512xf32> to vector<8x512xf32>
    %159 = arith.truncf %156 : vector<8x128xf32> to vector<8x128xbf16>
    %cst_56 = arith.constant dense<0.000000e+00> : vector<8x512xf32>
    %160 = tpu.matmul %159, %35, %cst_56 {dimension_numbers = #tpu.dot_dimension_numbers<[1], [0], [0], [1], [0, 0, 1, 1], [], []>} : vector<8x128xbf16>, vector<128x512xbf16>, vector<8x512xf32> -> vector<8x512xf32>
    %161 = arith.addf %158, %160 : vector<8x512xf32>
    %162 = vector.extract_strided_slice %161 {offsets = [0, 0], sizes = [8, 128], strides = [1, 1]} : vector<8x512xf32> to vector<8x128xf32>
    %163 = arith.negf %162 : vector<8x128xf32>
    %164 = math.exp %163 : vector<8x128xf32>
    %cst_57 = arith.constant 1.000000e+00 : f32
    %165 = vector.broadcast %cst_57 : f32 to vector<8x128xf32>
    %166 = arith.addf %165, %164 : vector<8x128xf32>
    %167 = arith.divf %165, %166 : vector<8x128xf32>
    %168 = vector.extract_strided_slice %161 {offsets = [0, 128], sizes = [8, 128], strides = [1, 1]} : vector<8x512xf32> to vector<8x128xf32>
    %169 = arith.negf %168 : vector<8x128xf32>
    %170 = math.exp %169 : vector<8x128xf32>
    %cst_58 = arith.constant 1.000000e+00 : f32
    %171 = vector.broadcast %cst_58 : f32 to vector<8x128xf32>
    %172 = arith.addf %171, %170 : vector<8x128xf32>
    %173 = arith.divf %171, %172 : vector<8x128xf32>
    %174 = vector.extract_strided_slice %161 {offsets = [0, 256], sizes = [8, 128], strides = [1, 1]} : vector<8x512xf32> to vector<8x128xf32>
    %175 = math.tanh %174 : vector<8x128xf32>
    %176 = vector.extract_strided_slice %161 {offsets = [0, 384], sizes = [8, 128], strides = [1, 1]} : vector<8x512xf32> to vector<8x128xf32>
    %177 = arith.negf %176 : vector<8x128xf32>
    %178 = math.exp %177 : vector<8x128xf32>
    %cst_59 = arith.constant 1.000000e+00 : f32
    %179 = vector.broadcast %cst_59 : f32 to vector<8x128xf32>
    %180 = arith.addf %179, %178 : vector<8x128xf32>
    %181 = arith.divf %179, %180 : vector<8x128xf32>
    %182 = arith.mulf %173, %154 : vector<8x128xf32>
    %183 = arith.mulf %167, %175 : vector<8x128xf32>
    %184 = arith.addf %182, %183 : vector<8x128xf32>
    %185 = math.tanh %184 : vector<8x128xf32>
    %186 = arith.mulf %181, %185 : vector<8x128xf32>
    %c32 = arith.constant 32 : index
    %c0_60 = arith.constant 0 : index
    %187 = vector.load %arg17[%c32, %c0_60] : memref<64x128xf32, #tpu.memory_space<vmem>>, vector<8x128xf32>
    tpu.vector_store %arg17[%c32, %c0_60], %186 {strides = array<i32>} : memref<64x128xf32, #tpu.memory_space<vmem>>, vector<8x128xf32>,
    %188 = vector.extract_strided_slice %34 {offsets = [40, 0], sizes = [8, 512], strides = [1, 1]} : vector<64x512xf32> to vector<8x512xf32>
    %189 = arith.truncf %186 : vector<8x128xf32> to vector<8x128xbf16>
    %cst_61 = arith.constant dense<0.000000e+00> : vector<8x512xf32>
    %190 = tpu.matmul %189, %35, %cst_61 {dimension_numbers = #tpu.dot_dimension_numbers<[1], [0], [0], [1], [0, 0, 1, 1], [], []>} : vector<8x128xbf16>, vector<128x512xbf16>, vector<8x512xf32> -> vector<8x512xf32>
    %191 = arith.addf %188, %190 : vector<8x512xf32>
    %192 = vector.extract_strided_slice %191 {offsets = [0, 0], sizes = [8, 128], strides = [1, 1]} : vector<8x512xf32> to vector<8x128xf32>
    %193 = arith.negf %192 : vector<8x128xf32>
    %194 = math.exp %193 : vector<8x128xf32>
    %cst_62 = arith.constant 1.000000e+00 : f32
    %195 = vector.broadcast %cst_62 : f32 to vector<8x128xf32>
    %196 = arith.addf %195, %194 : vector<8x128xf32>
    %197 = arith.divf %195, %196 : vector<8x128xf32>
    %198 = vector.extract_strided_slice %191 {offsets = [0, 128], sizes = [8, 128], strides = [1, 1]} : vector<8x512xf32> to vector<8x128xf32>
    %199 = arith.negf %198 : vector<8x128xf32>
    %200 = math.exp %199 : vector<8x128xf32>
    %cst_63 = arith.constant 1.000000e+00 : f32
    %201 = vector.broadcast %cst_63 : f32 to vector<8x128xf32>
    %202 = arith.addf %201, %200 : vector<8x128xf32>
    %203 = arith.divf %201, %202 : vector<8x128xf32>
    %204 = vector.extract_strided_slice %191 {offsets = [0, 256], sizes = [8, 128], strides = [1, 1]} : vector<8x512xf32> to vector<8x128xf32>
    %205 = math.tanh %204 : vector<8x128xf32>
    %206 = vector.extract_strided_slice %191 {offsets = [0, 384], sizes = [8, 128], strides = [1, 1]} : vector<8x512xf32> to vector<8x128xf32>
    %207 = arith.negf %206 : vector<8x128xf32>
    %208 = math.exp %207 : vector<8x128xf32>
    %cst_64 = arith.constant 1.000000e+00 : f32
    %209 = vector.broadcast %cst_64 : f32 to vector<8x128xf32>
    %210 = arith.addf %209, %208 : vector<8x128xf32>
    %211 = arith.divf %209, %210 : vector<8x128xf32>
    %212 = arith.mulf %203, %184 : vector<8x128xf32>
    %213 = arith.mulf %197, %205 : vector<8x128xf32>
    %214 = arith.addf %212, %213 : vector<8x128xf32>
    %215 = math.tanh %214 : vector<8x128xf32>
    %216 = arith.mulf %211, %215 : vector<8x128xf32>
    %c40 = arith.constant 40 : index
    %c0_65 = arith.constant 0 : index
    %217 = vector.load %arg17[%c40, %c0_65] : memref<64x128xf32, #tpu.memory_space<vmem>>, vector<8x128xf32>
    tpu.vector_store %arg17[%c40, %c0_65], %216 {strides = array<i32>} : memref<64x128xf32, #tpu.memory_space<vmem>>, vector<8x128xf32>,
    %218 = vector.extract_strided_slice %34 {offsets = [48, 0], sizes = [8, 512], strides = [1, 1]} : vector<64x512xf32> to vector<8x512xf32>
    %219 = arith.truncf %216 : vector<8x128xf32> to vector<8x128xbf16>
    %cst_66 = arith.constant dense<0.000000e+00> : vector<8x512xf32>
    %220 = tpu.matmul %219, %35, %cst_66 {dimension_numbers = #tpu.dot_dimension_numbers<[1], [0], [0], [1], [0, 0, 1, 1], [], []>} : vector<8x128xbf16>, vector<128x512xbf16>, vector<8x512xf32> -> vector<8x512xf32>
    %221 = arith.addf %218, %220 : vector<8x512xf32>
    %222 = vector.extract_strided_slice %221 {offsets = [0, 0], sizes = [8, 128], strides = [1, 1]} : vector<8x512xf32> to vector<8x128xf32>
    %223 = arith.negf %222 : vector<8x128xf32>
    %224 = math.exp %223 : vector<8x128xf32>
    %cst_67 = arith.constant 1.000000e+00 : f32
    %225 = vector.broadcast %cst_67 : f32 to vector<8x128xf32>
    %226 = arith.addf %225, %224 : vector<8x128xf32>
    %227 = arith.divf %225, %226 : vector<8x128xf32>
    %228 = vector.extract_strided_slice %221 {offsets = [0, 128], sizes = [8, 128], strides = [1, 1]} : vector<8x512xf32> to vector<8x128xf32>
    %229 = arith.negf %228 : vector<8x128xf32>
    %230 = math.exp %229 : vector<8x128xf32>
    %cst_68 = arith.constant 1.000000e+00 : f32
    %231 = vector.broadcast %cst_68 : f32 to vector<8x128xf32>
    %232 = arith.addf %231, %230 : vector<8x128xf32>
    %233 = arith.divf %231, %232 : vector<8x128xf32>
    %234 = vector.extract_strided_slice %221 {offsets = [0, 256], sizes = [8, 128], strides = [1, 1]} : vector<8x512xf32> to vector<8x128xf32>
    %235 = math.tanh %234 : vector<8x128xf32>
    %236 = vector.extract_strided_slice %221 {offsets = [0, 384], sizes = [8, 128], strides = [1, 1]} : vector<8x512xf32> to vector<8x128xf32>
    %237 = arith.negf %236 : vector<8x128xf32>
    %238 = math.exp %237 : vector<8x128xf32>
    %cst_69 = arith.constant 1.000000e+00 : f32
    %239 = vector.broadcast %cst_69 : f32 to vector<8x128xf32>
    %240 = arith.addf %239, %238 : vector<8x128xf32>
    %241 = arith.divf %239, %240 : vector<8x128xf32>
    %242 = arith.mulf %233, %214 : vector<8x128xf32>
    %243 = arith.mulf %227, %235 : vector<8x128xf32>
    %244 = arith.addf %242, %243 : vector<8x128xf32>
    %245 = math.tanh %244 : vector<8x128xf32>
    %246 = arith.mulf %241, %245 : vector<8x128xf32>
    %c48 = arith.constant 48 : index
    %c0_70 = arith.constant 0 : index
    %247 = vector.load %arg17[%c48, %c0_70] : memref<64x128xf32, #tpu.memory_space<vmem>>, vector<8x128xf32>
    tpu.vector_store %arg17[%c48, %c0_70], %246 {strides = array<i32>} : memref<64x128xf32, #tpu.memory_space<vmem>>, vector<8x128xf32>,
    %248 = vector.extract_strided_slice %34 {offsets = [56, 0], sizes = [8, 512], strides = [1, 1]} : vector<64x512xf32> to vector<8x512xf32>
    %249 = arith.truncf %246 : vector<8x128xf32> to vector<8x128xbf16>
    %cst_71 = arith.constant dense<0.000000e+00> : vector<8x512xf32>
    %250 = tpu.matmul %249, %35, %cst_71 {dimension_numbers = #tpu.dot_dimension_numbers<[1], [0], [0], [1], [0, 0, 1, 1], [], []>} : vector<8x128xbf16>, vector<128x512xbf16>, vector<8x512xf32> -> vector<8x512xf32>
    %251 = arith.addf %248, %250 : vector<8x512xf32>
    %252 = vector.extract_strided_slice %251 {offsets = [0, 0], sizes = [8, 128], strides = [1, 1]} : vector<8x512xf32> to vector<8x128xf32>
    %253 = arith.negf %252 : vector<8x128xf32>
    %254 = math.exp %253 : vector<8x128xf32>
    %cst_72 = arith.constant 1.000000e+00 : f32
    %255 = vector.broadcast %cst_72 : f32 to vector<8x128xf32>
    %256 = arith.addf %255, %254 : vector<8x128xf32>
    %257 = arith.divf %255, %256 : vector<8x128xf32>
    %258 = vector.extract_strided_slice %251 {offsets = [0, 128], sizes = [8, 128], strides = [1, 1]} : vector<8x512xf32> to vector<8x128xf32>
    %259 = arith.negf %258 : vector<8x128xf32>
    %260 = math.exp %259 : vector<8x128xf32>
    %cst_73 = arith.constant 1.000000e+00 : f32
    %261 = vector.broadcast %cst_73 : f32 to vector<8x128xf32>
    %262 = arith.addf %261, %260 : vector<8x128xf32>
    %263 = arith.divf %261, %262 : vector<8x128xf32>
    %264 = vector.extract_strided_slice %251 {offsets = [0, 256], sizes = [8, 128], strides = [1, 1]} : vector<8x512xf32> to vector<8x128xf32>
    %265 = math.tanh %264 : vector<8x128xf32>
    %266 = vector.extract_strided_slice %251 {offsets = [0, 384], sizes = [8, 128], strides = [1, 1]} : vector<8x512xf32> to vector<8x128xf32>
    %267 = arith.negf %266 : vector<8x128xf32>
    %268 = math.exp %267 : vector<8x128xf32>
    %cst_74 = arith.constant 1.000000e+00 : f32
    %269 = vector.broadcast %cst_74 : f32 to vector<8x128xf32>
    %270 = arith.addf %269, %268 : vector<8x128xf32>
    %271 = arith.divf %269, %270 : vector<8x128xf32>
    %272 = arith.mulf %263, %244 : vector<8x128xf32>
    %273 = arith.mulf %257, %265 : vector<8x128xf32>
    %274 = arith.addf %272, %273 : vector<8x128xf32>
    %275 = math.tanh %274 : vector<8x128xf32>
    %276 = arith.mulf %271, %275 : vector<8x128xf32>
    %c56 = arith.constant 56 : index
    %c0_75 = arith.constant 0 : index
    %277 = vector.load %arg17[%c56, %c0_75] : memref<64x128xf32, #tpu.memory_space<vmem>>, vector<8x128xf32>
    tpu.vector_store %arg17[%c56, %c0_75], %276 {strides = array<i32>} : memref<64x128xf32, #tpu.memory_space<vmem>>, vector<8x128xf32>,
    %c0_76 = arith.constant 0 : index
    %c0_77 = arith.constant 0 : index
    %278 = vector.load %arg17[%c0_76, %c0_77] : memref<64x128xf32, #tpu.memory_space<vmem>>, vector<64x128xf32>
    %279 = vector.extract_strided_slice %278 {offsets = [56, 0], sizes = [8, 128], strides = [1, 1]} : vector<64x128xf32> to vector<8x128xf32>
    %280 = vector.extract_strided_slice %278 {offsets = [48, 0], sizes = [8, 128], strides = [1, 1]} : vector<64x128xf32> to vector<8x128xf32>
    %281 = vector.extract_strided_slice %278 {offsets = [40, 0], sizes = [8, 128], strides = [1, 1]} : vector<64x128xf32> to vector<8x128xf32>
    %282 = vector.extract_strided_slice %278 {offsets = [32, 0], sizes = [8, 128], strides = [1, 1]} : vector<64x128xf32> to vector<8x128xf32>
    %283 = vector.extract_strided_slice %278 {offsets = [24, 0], sizes = [8, 128], strides = [1, 1]} : vector<64x128xf32> to vector<8x128xf32>
    %284 = vector.extract_strided_slice %278 {offsets = [16, 0], sizes = [8, 128], strides = [1, 1]} : vector<64x128xf32> to vector<8x128xf32>
    %285 = vector.extract_strided_slice %278 {offsets = [8, 0], sizes = [8, 128], strides = [1, 1]} : vector<64x128xf32> to vector<8x128xf32>
    %286 = vector.extract_strided_slice %278 {offsets = [0, 0], sizes = [8, 128], strides = [1, 1]} : vector<64x128xf32> to vector<8x128xf32>
    %287 = tpu.concatenate %279, %280, %281, %282, %283, %284, %285, %286 in 0 : vector<8x128xf32>, vector<8x128xf32>, vector<8x128xf32>, vector<8x128xf32>, vector<8x128xf32>, vector<8x128xf32>, vector<8x128xf32>, vector<8x128xf32> -> vector<64x128xf32>
    %288 = arith.truncf %278 : vector<64x128xf32> to vector<64x128xbf16>
    %c0_78 = arith.constant 0 : index
    %c0_79 = arith.constant 0 : index
    %289 = vector.load %arg9[%c0_78, %c0_79] : memref<128x512xbf16, #tpu.memory_space<vmem>>, vector<128x512xbf16>
    %cst_80 = arith.constant dense<0.000000e+00> : vector<64x512xf32>
    %290 = tpu.matmul %288, %289, %cst_80 {dimension_numbers = #tpu.dot_dimension_numbers<[1], [0], [0], [1], [0, 0, 1, 1], [], []>} : vector<64x128xbf16>, vector<128x512xbf16>, vector<64x512xf32> -> vector<64x512xf32>
    %291 = arith.truncf %287 : vector<64x128xf32> to vector<64x128xbf16>
    %c0_81 = arith.constant 0 : index
    %c0_82 = arith.constant 0 : index
    %292 = vector.load %arg10[%c0_81, %c0_82] : memref<128x512xbf16, #tpu.memory_space<vmem>>, vector<128x512xbf16>
    %cst_83 = arith.constant dense<0.000000e+00> : vector<64x512xf32>
    %293 = tpu.matmul %291, %292, %cst_83 {dimension_numbers = #tpu.dot_dimension_numbers<[1], [0], [0], [1], [0, 0, 1, 1], [], []>} : vector<64x128xbf16>, vector<128x512xbf16>, vector<64x512xf32> -> vector<64x512xf32>
    %294 = arith.addf %290, %293 : vector<64x512xf32>
    %c0_84 = arith.constant 0 : index
    %c0_85 = arith.constant 0 : index
    %295 = vector.load %arg11[%c0_84, %c0_85] : memref<1x512xf32, #tpu.memory_space<vmem>>, vector<1x512xf32>
    %296 = vector.broadcast %295 : vector<1x512xf32> to vector<64x512xf32>
    %297 = arith.addf %294, %296 : vector<64x512xf32>
    %c0_86 = arith.constant 0 : index
    %c0_87 = arith.constant 0 : index
    %298 = vector.load %arg12[%c0_86, %c0_87] : memref<128x512xbf16, #tpu.memory_space<vmem>>, vector<128x512xbf16>
    %cst_88 = arith.constant 0.000000e+00 : f32
    %299 = vector.broadcast %cst_88 : f32 to vector<8x128xf32>
    %cst_89 = arith.constant 0.000000e+00 : f32
    %300 = vector.broadcast %cst_89 : f32 to vector<8x128xf32>
    %301 = vector.extract_strided_slice %297 {offsets = [0, 0], sizes = [8, 512], strides = [1, 1]} : vector<64x512xf32> to vector<8x512xf32>
    %302 = arith.truncf %299 : vector<8x128xf32> to vector<8x128xbf16>
    %cst_90 = arith.constant dense<0.000000e+00> : vector<8x512xf32>
    %303 = tpu.matmul %302, %298, %cst_90 {dimension_numbers = #tpu.dot_dimension_numbers<[1], [0], [0], [1], [0, 0, 1, 1], [], []>} : vector<8x128xbf16>, vector<128x512xbf16>, vector<8x512xf32> -> vector<8x512xf32>
    %304 = arith.addf %301, %303 : vector<8x512xf32>
    %305 = vector.extract_strided_slice %304 {offsets = [0, 0], sizes = [8, 128], strides = [1, 1]} : vector<8x512xf32> to vector<8x128xf32>
    %306 = arith.negf %305 : vector<8x128xf32>
    %307 = math.exp %306 : vector<8x128xf32>
    %cst_91 = arith.constant 1.000000e+00 : f32
    %308 = vector.broadcast %cst_91 : f32 to vector<8x128xf32>
    %309 = arith.addf %308, %307 : vector<8x128xf32>
    %310 = arith.divf %308, %309 : vector<8x128xf32>
    %311 = vector.extract_strided_slice %304 {offsets = [0, 128], sizes = [8, 128], strides = [1, 1]} : vector<8x512xf32> to vector<8x128xf32>
    %312 = arith.negf %311 : vector<8x128xf32>
    %313 = math.exp %312 : vector<8x128xf32>
    %cst_92 = arith.constant 1.000000e+00 : f32
    %314 = vector.broadcast %cst_92 : f32 to vector<8x128xf32>
    %315 = arith.addf %314, %313 : vector<8x128xf32>
    %316 = arith.divf %314, %315 : vector<8x128xf32>
    %317 = vector.extract_strided_slice %304 {offsets = [0, 256], sizes = [8, 128], strides = [1, 1]} : vector<8x512xf32> to vector<8x128xf32>
    %318 = math.tanh %317 : vector<8x128xf32>
    %319 = vector.extract_strided_slice %304 {offsets = [0, 384], sizes = [8, 128], strides = [1, 1]} : vector<8x512xf32> to vector<8x128xf32>
    %320 = arith.negf %319 : vector<8x128xf32>
    %321 = math.exp %320 : vector<8x128xf32>
    %cst_93 = arith.constant 1.000000e+00 : f32
    %322 = vector.broadcast %cst_93 : f32 to vector<8x128xf32>
    %323 = arith.addf %322, %321 : vector<8x128xf32>
    %324 = arith.divf %322, %323 : vector<8x128xf32>
    %325 = arith.mulf %316, %300 : vector<8x128xf32>
    %326 = arith.mulf %310, %318 : vector<8x128xf32>
    %327 = arith.addf %325, %326 : vector<8x128xf32>
    %328 = math.tanh %327 : vector<8x128xf32>
    %329 = arith.mulf %324, %328 : vector<8x128xf32>
    %c0_94 = arith.constant 0 : index
    %c0_95 = arith.constant 0 : index
    %330 = vector.load %arg18[%c0_94, %c0_95] : memref<64x128xf32, #tpu.memory_space<vmem>>, vector<8x128xf32>
    tpu.vector_store %arg18[%c0_94, %c0_95], %329 {strides = array<i32>} : memref<64x128xf32, #tpu.memory_space<vmem>>, vector<8x128xf32>,
    %331 = vector.extract_strided_slice %297 {offsets = [8, 0], sizes = [8, 512], strides = [1, 1]} : vector<64x512xf32> to vector<8x512xf32>
    %332 = arith.truncf %329 : vector<8x128xf32> to vector<8x128xbf16>
    %cst_96 = arith.constant dense<0.000000e+00> : vector<8x512xf32>
    %333 = tpu.matmul %332, %298, %cst_96 {dimension_numbers = #tpu.dot_dimension_numbers<[1], [0], [0], [1], [0, 0, 1, 1], [], []>} : vector<8x128xbf16>, vector<128x512xbf16>, vector<8x512xf32> -> vector<8x512xf32>
    %334 = arith.addf %331, %333 : vector<8x512xf32>
    %335 = vector.extract_strided_slice %334 {offsets = [0, 0], sizes = [8, 128], strides = [1, 1]} : vector<8x512xf32> to vector<8x128xf32>
    %336 = arith.negf %335 : vector<8x128xf32>
    %337 = math.exp %336 : vector<8x128xf32>
    %cst_97 = arith.constant 1.000000e+00 : f32
    %338 = vector.broadcast %cst_97 : f32 to vector<8x128xf32>
    %339 = arith.addf %338, %337 : vector<8x128xf32>
    %340 = arith.divf %338, %339 : vector<8x128xf32>
    %341 = vector.extract_strided_slice %334 {offsets = [0, 128], sizes = [8, 128], strides = [1, 1]} : vector<8x512xf32> to vector<8x128xf32>
    %342 = arith.negf %341 : vector<8x128xf32>
    %343 = math.exp %342 : vector<8x128xf32>
    %cst_98 = arith.constant 1.000000e+00 : f32
    %344 = vector.broadcast %cst_98 : f32 to vector<8x128xf32>
    %345 = arith.addf %344, %343 : vector<8x128xf32>
    %346 = arith.divf %344, %345 : vector<8x128xf32>
    %347 = vector.extract_strided_slice %334 {offsets = [0, 256], sizes = [8, 128], strides = [1, 1]} : vector<8x512xf32> to vector<8x128xf32>
    %348 = math.tanh %347 : vector<8x128xf32>
    %349 = vector.extract_strided_slice %334 {offsets = [0, 384], sizes = [8, 128], strides = [1, 1]} : vector<8x512xf32> to vector<8x128xf32>
    %350 = arith.negf %349 : vector<8x128xf32>
    %351 = math.exp %350 : vector<8x128xf32>
    %cst_99 = arith.constant 1.000000e+00 : f32
    %352 = vector.broadcast %cst_99 : f32 to vector<8x128xf32>
    %353 = arith.addf %352, %351 : vector<8x128xf32>
    %354 = arith.divf %352, %353 : vector<8x128xf32>
    %355 = arith.mulf %346, %327 : vector<8x128xf32>
    %356 = arith.mulf %340, %348 : vector<8x128xf32>
    %357 = arith.addf %355, %356 : vector<8x128xf32>
    %358 = math.tanh %357 : vector<8x128xf32>
    %359 = arith.mulf %354, %358 : vector<8x128xf32>
    %c8_100 = arith.constant 8 : index
    %c0_101 = arith.constant 0 : index
    %360 = vector.load %arg18[%c8_100, %c0_101] : memref<64x128xf32, #tpu.memory_space<vmem>>, vector<8x128xf32>
    tpu.vector_store %arg18[%c8_100, %c0_101], %359 {strides = array<i32>} : memref<64x128xf32, #tpu.memory_space<vmem>>, vector<8x128xf32>,
    %361 = vector.extract_strided_slice %297 {offsets = [16, 0], sizes = [8, 512], strides = [1, 1]} : vector<64x512xf32> to vector<8x512xf32>
    %362 = arith.truncf %359 : vector<8x128xf32> to vector<8x128xbf16>
    %cst_102 = arith.constant dense<0.000000e+00> : vector<8x512xf32>
    %363 = tpu.matmul %362, %298, %cst_102 {dimension_numbers = #tpu.dot_dimension_numbers<[1], [0], [0], [1], [0, 0, 1, 1], [], []>} : vector<8x128xbf16>, vector<128x512xbf16>, vector<8x512xf32> -> vector<8x512xf32>
    %364 = arith.addf %361, %363 : vector<8x512xf32>
    %365 = vector.extract_strided_slice %364 {offsets = [0, 0], sizes = [8, 128], strides = [1, 1]} : vector<8x512xf32> to vector<8x128xf32>
    %366 = arith.negf %365 : vector<8x128xf32>
    %367 = math.exp %366 : vector<8x128xf32>
    %cst_103 = arith.constant 1.000000e+00 : f32
    %368 = vector.broadcast %cst_103 : f32 to vector<8x128xf32>
    %369 = arith.addf %368, %367 : vector<8x128xf32>
    %370 = arith.divf %368, %369 : vector<8x128xf32>
    %371 = vector.extract_strided_slice %364 {offsets = [0, 128], sizes = [8, 128], strides = [1, 1]} : vector<8x512xf32> to vector<8x128xf32>
    %372 = arith.negf %371 : vector<8x128xf32>
    %373 = math.exp %372 : vector<8x128xf32>
    %cst_104 = arith.constant 1.000000e+00 : f32
    %374 = vector.broadcast %cst_104 : f32 to vector<8x128xf32>
    %375 = arith.addf %374, %373 : vector<8x128xf32>
    %376 = arith.divf %374, %375 : vector<8x128xf32>
    %377 = vector.extract_strided_slice %364 {offsets = [0, 256], sizes = [8, 128], strides = [1, 1]} : vector<8x512xf32> to vector<8x128xf32>
    %378 = math.tanh %377 : vector<8x128xf32>
    %379 = vector.extract_strided_slice %364 {offsets = [0, 384], sizes = [8, 128], strides = [1, 1]} : vector<8x512xf32> to vector<8x128xf32>
    %380 = arith.negf %379 : vector<8x128xf32>
    %381 = math.exp %380 : vector<8x128xf32>
    %cst_105 = arith.constant 1.000000e+00 : f32
    %382 = vector.broadcast %cst_105 : f32 to vector<8x128xf32>
    %383 = arith.addf %382, %381 : vector<8x128xf32>
    %384 = arith.divf %382, %383 : vector<8x128xf32>
    %385 = arith.mulf %376, %357 : vector<8x128xf32>
    %386 = arith.mulf %370, %378 : vector<8x128xf32>
    %387 = arith.addf %385, %386 : vector<8x128xf32>
    %388 = math.tanh %387 : vector<8x128xf32>
    %389 = arith.mulf %384, %388 : vector<8x128xf32>
    %c16_106 = arith.constant 16 : index
    %c0_107 = arith.constant 0 : index
    %390 = vector.load %arg18[%c16_106, %c0_107] : memref<64x128xf32, #tpu.memory_space<vmem>>, vector<8x128xf32>
    tpu.vector_store %arg18[%c16_106, %c0_107], %389 {strides = array<i32>} : memref<64x128xf32, #tpu.memory_space<vmem>>, vector<8x128xf32>,
    %391 = vector.extract_strided_slice %297 {offsets = [24, 0], sizes = [8, 512], strides = [1, 1]} : vector<64x512xf32> to vector<8x512xf32>
    %392 = arith.truncf %389 : vector<8x128xf32> to vector<8x128xbf16>
    %cst_108 = arith.constant dense<0.000000e+00> : vector<8x512xf32>
    %393 = tpu.matmul %392, %298, %cst_108 {dimension_numbers = #tpu.dot_dimension_numbers<[1], [0], [0], [1], [0, 0, 1, 1], [], []>} : vector<8x128xbf16>, vector<128x512xbf16>, vector<8x512xf32> -> vector<8x512xf32>
    %394 = arith.addf %391, %393 : vector<8x512xf32>
    %395 = vector.extract_strided_slice %394 {offsets = [0, 0], sizes = [8, 128], strides = [1, 1]} : vector<8x512xf32> to vector<8x128xf32>
    %396 = arith.negf %395 : vector<8x128xf32>
    %397 = math.exp %396 : vector<8x128xf32>
    %cst_109 = arith.constant 1.000000e+00 : f32
    %398 = vector.broadcast %cst_109 : f32 to vector<8x128xf32>
    %399 = arith.addf %398, %397 : vector<8x128xf32>
    %400 = arith.divf %398, %399 : vector<8x128xf32>
    %401 = vector.extract_strided_slice %394 {offsets = [0, 128], sizes = [8, 128], strides = [1, 1]} : vector<8x512xf32> to vector<8x128xf32>
    %402 = arith.negf %401 : vector<8x128xf32>
    %403 = math.exp %402 : vector<8x128xf32>
    %cst_110 = arith.constant 1.000000e+00 : f32
    %404 = vector.broadcast %cst_110 : f32 to vector<8x128xf32>
    %405 = arith.addf %404, %403 : vector<8x128xf32>
    %406 = arith.divf %404, %405 : vector<8x128xf32>
    %407 = vector.extract_strided_slice %394 {offsets = [0, 256], sizes = [8, 128], strides = [1, 1]} : vector<8x512xf32> to vector<8x128xf32>
    %408 = math.tanh %407 : vector<8x128xf32>
    %409 = vector.extract_strided_slice %394 {offsets = [0, 384], sizes = [8, 128], strides = [1, 1]} : vector<8x512xf32> to vector<8x128xf32>
    %410 = arith.negf %409 : vector<8x128xf32>
    %411 = math.exp %410 : vector<8x128xf32>
    %cst_111 = arith.constant 1.000000e+00 : f32
    %412 = vector.broadcast %cst_111 : f32 to vector<8x128xf32>
    %413 = arith.addf %412, %411 : vector<8x128xf32>
    %414 = arith.divf %412, %413 : vector<8x128xf32>
    %415 = arith.mulf %406, %387 : vector<8x128xf32>
    %416 = arith.mulf %400, %408 : vector<8x128xf32>
    %417 = arith.addf %415, %416 : vector<8x128xf32>
    %418 = math.tanh %417 : vector<8x128xf32>
    %419 = arith.mulf %414, %418 : vector<8x128xf32>
    %c24_112 = arith.constant 24 : index
    %c0_113 = arith.constant 0 : index
    %420 = vector.load %arg18[%c24_112, %c0_113] : memref<64x128xf32, #tpu.memory_space<vmem>>, vector<8x128xf32>
    tpu.vector_store %arg18[%c24_112, %c0_113], %419 {strides = array<i32>} : memref<64x128xf32, #tpu.memory_space<vmem>>, vector<8x128xf32>,
    %421 = vector.extract_strided_slice %297 {offsets = [32, 0], sizes = [8, 512], strides = [1, 1]} : vector<64x512xf32> to vector<8x512xf32>
    %422 = arith.truncf %419 : vector<8x128xf32> to vector<8x128xbf16>
    %cst_114 = arith.constant dense<0.000000e+00> : vector<8x512xf32>
    %423 = tpu.matmul %422, %298, %cst_114 {dimension_numbers = #tpu.dot_dimension_numbers<[1], [0], [0], [1], [0, 0, 1, 1], [], []>} : vector<8x128xbf16>, vector<128x512xbf16>, vector<8x512xf32> -> vector<8x512xf32>
    %424 = arith.addf %421, %423 : vector<8x512xf32>
    %425 = vector.extract_strided_slice %424 {offsets = [0, 0], sizes = [8, 128], strides = [1, 1]} : vector<8x512xf32> to vector<8x128xf32>
    %426 = arith.negf %425 : vector<8x128xf32>
    %427 = math.exp %426 : vector<8x128xf32>
    %cst_115 = arith.constant 1.000000e+00 : f32
    %428 = vector.broadcast %cst_115 : f32 to vector<8x128xf32>
    %429 = arith.addf %428, %427 : vector<8x128xf32>
    %430 = arith.divf %428, %429 : vector<8x128xf32>
    %431 = vector.extract_strided_slice %424 {offsets = [0, 128], sizes = [8, 128], strides = [1, 1]} : vector<8x512xf32> to vector<8x128xf32>
    %432 = arith.negf %431 : vector<8x128xf32>
    %433 = math.exp %432 : vector<8x128xf32>
    %cst_116 = arith.constant 1.000000e+00 : f32
    %434 = vector.broadcast %cst_116 : f32 to vector<8x128xf32>
    %435 = arith.addf %434, %433 : vector<8x128xf32>
    %436 = arith.divf %434, %435 : vector<8x128xf32>
    %437 = vector.extract_strided_slice %424 {offsets = [0, 256], sizes = [8, 128], strides = [1, 1]} : vector<8x512xf32> to vector<8x128xf32>
    %438 = math.tanh %437 : vector<8x128xf32>
    %439 = vector.extract_strided_slice %424 {offsets = [0, 384], sizes = [8, 128], strides = [1, 1]} : vector<8x512xf32> to vector<8x128xf32>
    %440 = arith.negf %439 : vector<8x128xf32>
    %441 = math.exp %440 : vector<8x128xf32>
    %cst_117 = arith.constant 1.000000e+00 : f32
    %442 = vector.broadcast %cst_117 : f32 to vector<8x128xf32>
    %443 = arith.addf %442, %441 : vector<8x128xf32>
    %444 = arith.divf %442, %443 : vector<8x128xf32>
    %445 = arith.mulf %436, %417 : vector<8x128xf32>
    %446 = arith.mulf %430, %438 : vector<8x128xf32>
    %447 = arith.addf %445, %446 : vector<8x128xf32>
    %448 = math.tanh %447 : vector<8x128xf32>
    %449 = arith.mulf %444, %448 : vector<8x128xf32>
    %c32_118 = arith.constant 32 : index
    %c0_119 = arith.constant 0 : index
    %450 = vector.load %arg18[%c32_118, %c0_119] : memref<64x128xf32, #tpu.memory_space<vmem>>, vector<8x128xf32>
    tpu.vector_store %arg18[%c32_118, %c0_119], %449 {strides = array<i32>} : memref<64x128xf32, #tpu.memory_space<vmem>>, vector<8x128xf32>,
    %451 = vector.extract_strided_slice %297 {offsets = [40, 0], sizes = [8, 512], strides = [1, 1]} : vector<64x512xf32> to vector<8x512xf32>
    %452 = arith.truncf %449 : vector<8x128xf32> to vector<8x128xbf16>
    %cst_120 = arith.constant dense<0.000000e+00> : vector<8x512xf32>
    %453 = tpu.matmul %452, %298, %cst_120 {dimension_numbers = #tpu.dot_dimension_numbers<[1], [0], [0], [1], [0, 0, 1, 1], [], []>} : vector<8x128xbf16>, vector<128x512xbf16>, vector<8x512xf32> -> vector<8x512xf32>
    %454 = arith.addf %451, %453 : vector<8x512xf32>
    %455 = vector.extract_strided_slice %454 {offsets = [0, 0], sizes = [8, 128], strides = [1, 1]} : vector<8x512xf32> to vector<8x128xf32>
    %456 = arith.negf %455 : vector<8x128xf32>
    %457 = math.exp %456 : vector<8x128xf32>
    %cst_121 = arith.constant 1.000000e+00 : f32
    %458 = vector.broadcast %cst_121 : f32 to vector<8x128xf32>
    %459 = arith.addf %458, %457 : vector<8x128xf32>
    %460 = arith.divf %458, %459 : vector<8x128xf32>
    %461 = vector.extract_strided_slice %454 {offsets = [0, 128], sizes = [8, 128], strides = [1, 1]} : vector<8x512xf32> to vector<8x128xf32>
    %462 = arith.negf %461 : vector<8x128xf32>
    %463 = math.exp %462 : vector<8x128xf32>
    %cst_122 = arith.constant 1.000000e+00 : f32
    %464 = vector.broadcast %cst_122 : f32 to vector<8x128xf32>
    %465 = arith.addf %464, %463 : vector<8x128xf32>
    %466 = arith.divf %464, %465 : vector<8x128xf32>
    %467 = vector.extract_strided_slice %454 {offsets = [0, 256], sizes = [8, 128], strides = [1, 1]} : vector<8x512xf32> to vector<8x128xf32>
    %468 = math.tanh %467 : vector<8x128xf32>
    %469 = vector.extract_strided_slice %454 {offsets = [0, 384], sizes = [8, 128], strides = [1, 1]} : vector<8x512xf32> to vector<8x128xf32>
    %470 = arith.negf %469 : vector<8x128xf32>
    %471 = math.exp %470 : vector<8x128xf32>
    %cst_123 = arith.constant 1.000000e+00 : f32
    %472 = vector.broadcast %cst_123 : f32 to vector<8x128xf32>
    %473 = arith.addf %472, %471 : vector<8x128xf32>
    %474 = arith.divf %472, %473 : vector<8x128xf32>
    %475 = arith.mulf %466, %447 : vector<8x128xf32>
    %476 = arith.mulf %460, %468 : vector<8x128xf32>
    %477 = arith.addf %475, %476 : vector<8x128xf32>
    %478 = math.tanh %477 : vector<8x128xf32>
    %479 = arith.mulf %474, %478 : vector<8x128xf32>
    %c40_124 = arith.constant 40 : index
    %c0_125 = arith.constant 0 : index
    %480 = vector.load %arg18[%c40_124, %c0_125] : memref<64x128xf32, #tpu.memory_space<vmem>>, vector<8x128xf32>
    tpu.vector_store %arg18[%c40_124, %c0_125], %479 {strides = array<i32>} : memref<64x128xf32, #tpu.memory_space<vmem>>, vector<8x128xf32>,
    %481 = vector.extract_strided_slice %297 {offsets = [48, 0], sizes = [8, 512], strides = [1, 1]} : vector<64x512xf32> to vector<8x512xf32>
    %482 = arith.truncf %479 : vector<8x128xf32> to vector<8x128xbf16>
    %cst_126 = arith.constant dense<0.000000e+00> : vector<8x512xf32>
    %483 = tpu.matmul %482, %298, %cst_126 {dimension_numbers = #tpu.dot_dimension_numbers<[1], [0], [0], [1], [0, 0, 1, 1], [], []>} : vector<8x128xbf16>, vector<128x512xbf16>, vector<8x512xf32> -> vector<8x512xf32>
    %484 = arith.addf %481, %483 : vector<8x512xf32>
    %485 = vector.extract_strided_slice %484 {offsets = [0, 0], sizes = [8, 128], strides = [1, 1]} : vector<8x512xf32> to vector<8x128xf32>
    %486 = arith.negf %485 : vector<8x128xf32>
    %487 = math.exp %486 : vector<8x128xf32>
    %cst_127 = arith.constant 1.000000e+00 : f32
    %488 = vector.broadcast %cst_127 : f32 to vector<8x128xf32>
    %489 = arith.addf %488, %487 : vector<8x128xf32>
    %490 = arith.divf %488, %489 : vector<8x128xf32>
    %491 = vector.extract_strided_slice %484 {offsets = [0, 128], sizes = [8, 128], strides = [1, 1]} : vector<8x512xf32> to vector<8x128xf32>
    %492 = arith.negf %491 : vector<8x128xf32>
    %493 = math.exp %492 : vector<8x128xf32>
    %cst_128 = arith.constant 1.000000e+00 : f32
    %494 = vector.broadcast %cst_128 : f32 to vector<8x128xf32>
    %495 = arith.addf %494, %493 : vector<8x128xf32>
    %496 = arith.divf %494, %495 : vector<8x128xf32>
    %497 = vector.extract_strided_slice %484 {offsets = [0, 256], sizes = [8, 128], strides = [1, 1]} : vector<8x512xf32> to vector<8x128xf32>
    %498 = math.tanh %497 : vector<8x128xf32>
    %499 = vector.extract_strided_slice %484 {offsets = [0, 384], sizes = [8, 128], strides = [1, 1]} : vector<8x512xf32> to vector<8x128xf32>
    %500 = arith.negf %499 : vector<8x128xf32>
    %501 = math.exp %500 : vector<8x128xf32>
    %cst_129 = arith.constant 1.000000e+00 : f32
    %502 = vector.broadcast %cst_129 : f32 to vector<8x128xf32>
    %503 = arith.addf %502, %501 : vector<8x128xf32>
    %504 = arith.divf %502, %503 : vector<8x128xf32>
    %505 = arith.mulf %496, %477 : vector<8x128xf32>
    %506 = arith.mulf %490, %498 : vector<8x128xf32>
    %507 = arith.addf %505, %506 : vector<8x128xf32>
    %508 = math.tanh %507 : vector<8x128xf32>
    %509 = arith.mulf %504, %508 : vector<8x128xf32>
    %c48_130 = arith.constant 48 : index
    %c0_131 = arith.constant 0 : index
    %510 = vector.load %arg18[%c48_130, %c0_131] : memref<64x128xf32, #tpu.memory_space<vmem>>, vector<8x128xf32>
    tpu.vector_store %arg18[%c48_130, %c0_131], %509 {strides = array<i32>} : memref<64x128xf32, #tpu.memory_space<vmem>>, vector<8x128xf32>,
    %511 = vector.extract_strided_slice %297 {offsets = [56, 0], sizes = [8, 512], strides = [1, 1]} : vector<64x512xf32> to vector<8x512xf32>
    %512 = arith.truncf %509 : vector<8x128xf32> to vector<8x128xbf16>
    %cst_132 = arith.constant dense<0.000000e+00> : vector<8x512xf32>
    %513 = tpu.matmul %512, %298, %cst_132 {dimension_numbers = #tpu.dot_dimension_numbers<[1], [0], [0], [1], [0, 0, 1, 1], [], []>} : vector<8x128xbf16>, vector<128x512xbf16>, vector<8x512xf32> -> vector<8x512xf32>
    %514 = arith.addf %511, %513 : vector<8x512xf32>
    %515 = vector.extract_strided_slice %514 {offsets = [0, 0], sizes = [8, 128], strides = [1, 1]} : vector<8x512xf32> to vector<8x128xf32>
    %516 = arith.negf %515 : vector<8x128xf32>
    %517 = math.exp %516 : vector<8x128xf32>
    %cst_133 = arith.constant 1.000000e+00 : f32
    %518 = vector.broadcast %cst_133 : f32 to vector<8x128xf32>
    %519 = arith.addf %518, %517 : vector<8x128xf32>
    %520 = arith.divf %518, %519 : vector<8x128xf32>
    %521 = vector.extract_strided_slice %514 {offsets = [0, 128], sizes = [8, 128], strides = [1, 1]} : vector<8x512xf32> to vector<8x128xf32>
    %522 = arith.negf %521 : vector<8x128xf32>
    %523 = math.exp %522 : vector<8x128xf32>
    %cst_134 = arith.constant 1.000000e+00 : f32
    %524 = vector.broadcast %cst_134 : f32 to vector<8x128xf32>
    %525 = arith.addf %524, %523 : vector<8x128xf32>
    %526 = arith.divf %524, %525 : vector<8x128xf32>
    %527 = vector.extract_strided_slice %514 {offsets = [0, 256], sizes = [8, 128], strides = [1, 1]} : vector<8x512xf32> to vector<8x128xf32>
    %528 = math.tanh %527 : vector<8x128xf32>
    %529 = vector.extract_strided_slice %514 {offsets = [0, 384], sizes = [8, 128], strides = [1, 1]} : vector<8x512xf32> to vector<8x128xf32>
    %530 = arith.negf %529 : vector<8x128xf32>
    %531 = math.exp %530 : vector<8x128xf32>
    %cst_135 = arith.constant 1.000000e+00 : f32
    %532 = vector.broadcast %cst_135 : f32 to vector<8x128xf32>
    %533 = arith.addf %532, %531 : vector<8x128xf32>
    %534 = arith.divf %532, %533 : vector<8x128xf32>
    %535 = arith.mulf %526, %507 : vector<8x128xf32>
    %536 = arith.mulf %520, %528 : vector<8x128xf32>
    %537 = arith.addf %535, %536 : vector<8x128xf32>
    %538 = math.tanh %537 : vector<8x128xf32>
    %539 = arith.mulf %534, %538 : vector<8x128xf32>
    %c56_136 = arith.constant 56 : index
    %c0_137 = arith.constant 0 : index
    %540 = vector.load %arg18[%c56_136, %c0_137] : memref<64x128xf32, #tpu.memory_space<vmem>>, vector<8x128xf32>
    tpu.vector_store %arg18[%c56_136, %c0_137], %539 {strides = array<i32>} : memref<64x128xf32, #tpu.memory_space<vmem>>, vector<8x128xf32>,
    %c0_138 = arith.constant 0 : index
    %c0_139 = arith.constant 0 : index
    %541 = vector.load %arg18[%c0_138, %c0_139] : memref<64x128xf32, #tpu.memory_space<vmem>>, vector<64x128xf32>
    %542 = vector.extract_strided_slice %541 {offsets = [56, 0], sizes = [8, 128], strides = [1, 1]} : vector<64x128xf32> to vector<8x128xf32>
    %543 = vector.extract_strided_slice %541 {offsets = [48, 0], sizes = [8, 128], strides = [1, 1]} : vector<64x128xf32> to vector<8x128xf32>
    %544 = vector.extract_strided_slice %541 {offsets = [40, 0], sizes = [8, 128], strides = [1, 1]} : vector<64x128xf32> to vector<8x128xf32>
    %545 = vector.extract_strided_slice %541 {offsets = [32, 0], sizes = [8, 128], strides = [1, 1]} : vector<64x128xf32> to vector<8x128xf32>
    %546 = vector.extract_strided_slice %541 {offsets = [24, 0], sizes = [8, 128], strides = [1, 1]} : vector<64x128xf32> to vector<8x128xf32>
    %547 = vector.extract_strided_slice %541 {offsets = [16, 0], sizes = [8, 128], strides = [1, 1]} : vector<64x128xf32> to vector<8x128xf32>
    %548 = vector.extract_strided_slice %541 {offsets = [8, 0], sizes = [8, 128], strides = [1, 1]} : vector<64x128xf32> to vector<8x128xf32>
    %549 = vector.extract_strided_slice %541 {offsets = [0, 0], sizes = [8, 128], strides = [1, 1]} : vector<64x128xf32> to vector<8x128xf32>
    %550 = tpu.concatenate %542, %543, %544, %545, %546, %547, %548, %549 in 0 : vector<8x128xf32>, vector<8x128xf32>, vector<8x128xf32>, vector<8x128xf32>, vector<8x128xf32>, vector<8x128xf32>, vector<8x128xf32>, vector<8x128xf32> -> vector<64x128xf32>
    %c0_140 = arith.constant 0 : index
    %c0_141 = arith.constant 0 : index
    %551 = vector.load %arg13[%c0_140, %c0_141] : memref<128x2xf32, #tpu.memory_space<vmem>>, vector<128x2xf32>
    %cst_142 = arith.constant dense<0.000000e+00> : vector<64x2xf32>
    %552 = tpu.matmul %541, %551, %cst_142 {dimension_numbers = #tpu.dot_dimension_numbers<[1], [0], [0], [1], [0, 0, 1, 1], [], []>} : vector<64x128xf32>, vector<128x2xf32>, vector<64x2xf32> -> vector<64x2xf32>
    %c0_143 = arith.constant 0 : index
    %c0_144 = arith.constant 0 : index
    %553 = vector.load %arg14[%c0_143, %c0_144] : memref<128x2xf32, #tpu.memory_space<vmem>>, vector<128x2xf32>
    %cst_145 = arith.constant dense<0.000000e+00> : vector<64x2xf32>
    %554 = tpu.matmul %550, %553, %cst_145 {dimension_numbers = #tpu.dot_dimension_numbers<[1], [0], [0], [1], [0, 0, 1, 1], [], []>} : vector<64x128xf32>, vector<128x2xf32>, vector<64x2xf32> -> vector<64x2xf32>
    %555 = arith.addf %552, %554 : vector<64x2xf32>
    %c0_146 = arith.constant 0 : index
    %c0_147 = arith.constant 0 : index
    %556 = vector.load %arg15[%c0_146, %c0_147] : memref<1x2xf32, #tpu.memory_space<vmem>>, vector<1x2xf32>
    %557 = vector.broadcast %556 : vector<1x2xf32> to vector<64x2xf32>
    %558 = arith.addf %555, %557 : vector<64x2xf32>
    %559 = vector.extract_strided_slice %558 {offsets = [0, 0], sizes = [8, 2], strides = [1, 1]} : vector<64x2xf32> to vector<8x2xf32>
    %c0_148 = arith.constant 0 : index
    %c0_149 = arith.constant 0 : index
    %c0_150 = arith.constant 0 : index
    %560 = vector.load %arg16[%c0_148, %c0_149, %c0_150] : memref<8x8x2xf32, #tpu.memory_space<vmem>>, vector<1x8x2xf32>
    %561 = vector.shape_cast %560 : vector<1x8x2xf32> to vector<8x2xf32>
    %562 = vector.shape_cast %559 : vector<8x2xf32> to vector<1x8x2xf32>
    tpu.vector_store %arg16[%c0_148, %c0_149, %c0_150], %562 {strides = array<i32>} : memref<8x8x2xf32, #tpu.memory_space<vmem>>, vector<1x8x2xf32>,
    %563 = vector.extract_strided_slice %558 {offsets = [8, 0], sizes = [8, 2], strides = [1, 1]} : vector<64x2xf32> to vector<8x2xf32>
    %c1_151 = arith.constant 1 : index
    %c0_152 = arith.constant 0 : index
    %c0_153 = arith.constant 0 : index
    %564 = vector.load %arg16[%c1_151, %c0_152, %c0_153] : memref<8x8x2xf32, #tpu.memory_space<vmem>>, vector<1x8x2xf32>
    %565 = vector.shape_cast %564 : vector<1x8x2xf32> to vector<8x2xf32>
    %566 = vector.shape_cast %563 : vector<8x2xf32> to vector<1x8x2xf32>
    tpu.vector_store %arg16[%c1_151, %c0_152, %c0_153], %566 {strides = array<i32>} : memref<8x8x2xf32, #tpu.memory_space<vmem>>, vector<1x8x2xf32>,
    %567 = vector.extract_strided_slice %558 {offsets = [16, 0], sizes = [8, 2], strides = [1, 1]} : vector<64x2xf32> to vector<8x2xf32>
    %c2_154 = arith.constant 2 : index
    %c0_155 = arith.constant 0 : index
    %c0_156 = arith.constant 0 : index
    %568 = vector.load %arg16[%c2_154, %c0_155, %c0_156] : memref<8x8x2xf32, #tpu.memory_space<vmem>>, vector<1x8x2xf32>
    %569 = vector.shape_cast %568 : vector<1x8x2xf32> to vector<8x2xf32>
    %570 = vector.shape_cast %567 : vector<8x2xf32> to vector<1x8x2xf32>
    tpu.vector_store %arg16[%c2_154, %c0_155, %c0_156], %570 {strides = array<i32>} : memref<8x8x2xf32, #tpu.memory_space<vmem>>, vector<1x8x2xf32>,
    %571 = vector.extract_strided_slice %558 {offsets = [24, 0], sizes = [8, 2], strides = [1, 1]} : vector<64x2xf32> to vector<8x2xf32>
    %c3_157 = arith.constant 3 : index
    %c0_158 = arith.constant 0 : index
    %c0_159 = arith.constant 0 : index
    %572 = vector.load %arg16[%c3_157, %c0_158, %c0_159] : memref<8x8x2xf32, #tpu.memory_space<vmem>>, vector<1x8x2xf32>
    %573 = vector.shape_cast %572 : vector<1x8x2xf32> to vector<8x2xf32>
    %574 = vector.shape_cast %571 : vector<8x2xf32> to vector<1x8x2xf32>
    tpu.vector_store %arg16[%c3_157, %c0_158, %c0_159], %574 {strides = array<i32>} : memref<8x8x2xf32, #tpu.memory_space<vmem>>, vector<1x8x2xf32>,
    %575 = vector.extract_strided_slice %558 {offsets = [32, 0], sizes = [8, 2], strides = [1, 1]} : vector<64x2xf32> to vector<8x2xf32>
    %c4_160 = arith.constant 4 : index
    %c0_161 = arith.constant 0 : index
    %c0_162 = arith.constant 0 : index
    %576 = vector.load %arg16[%c4_160, %c0_161, %c0_162] : memref<8x8x2xf32, #tpu.memory_space<vmem>>, vector<1x8x2xf32>
    %577 = vector.shape_cast %576 : vector<1x8x2xf32> to vector<8x2xf32>
    %578 = vector.shape_cast %575 : vector<8x2xf32> to vector<1x8x2xf32>
    tpu.vector_store %arg16[%c4_160, %c0_161, %c0_162], %578 {strides = array<i32>} : memref<8x8x2xf32, #tpu.memory_space<vmem>>, vector<1x8x2xf32>,
    %579 = vector.extract_strided_slice %558 {offsets = [40, 0], sizes = [8, 2], strides = [1, 1]} : vector<64x2xf32> to vector<8x2xf32>
    %c5_163 = arith.constant 5 : index
    %c0_164 = arith.constant 0 : index
    %c0_165 = arith.constant 0 : index
    %580 = vector.load %arg16[%c5_163, %c0_164, %c0_165] : memref<8x8x2xf32, #tpu.memory_space<vmem>>, vector<1x8x2xf32>
    %581 = vector.shape_cast %580 : vector<1x8x2xf32> to vector<8x2xf32>
    %582 = vector.shape_cast %579 : vector<8x2xf32> to vector<1x8x2xf32>
    tpu.vector_store %arg16[%c5_163, %c0_164, %c0_165], %582 {strides = array<i32>} : memref<8x8x2xf32, #tpu.memory_space<vmem>>, vector<1x8x2xf32>,
    %583 = vector.extract_strided_slice %558 {offsets = [48, 0], sizes = [8, 2], strides = [1, 1]} : vector<64x2xf32> to vector<8x2xf32>
    %c6_166 = arith.constant 6 : index
    %c0_167 = arith.constant 0 : index
    %c0_168 = arith.constant 0 : index
    %584 = vector.load %arg16[%c6_166, %c0_167, %c0_168] : memref<8x8x2xf32, #tpu.memory_space<vmem>>, vector<1x8x2xf32>
    %585 = vector.shape_cast %584 : vector<1x8x2xf32> to vector<8x2xf32>
    %586 = vector.shape_cast %583 : vector<8x2xf32> to vector<1x8x2xf32>
    tpu.vector_store %arg16[%c6_166, %c0_167, %c0_168], %586 {strides = array<i32>} : memref<8x8x2xf32, #tpu.memory_space<vmem>>, vector<1x8x2xf32>,
    %587 = vector.extract_strided_slice %558 {offsets = [56, 0], sizes = [8, 2], strides = [1, 1]} : vector<64x2xf32> to vector<8x2xf32>
    %c7_169 = arith.constant 7 : index
    %c0_170 = arith.constant 0 : index
    %c0_171 = arith.constant 0 : index
    %588 = vector.load %arg16[%c7_169, %c0_170, %c0_171] : memref<8x8x2xf32, #tpu.memory_space<vmem>>, vector<1x8x2xf32>
    %589 = vector.shape_cast %588 : vector<1x8x2xf32> to vector<8x2xf32>
    %590 = vector.shape_cast %587 : vector<8x2xf32> to vector<1x8x2xf32>
    tpu.vector_store %arg16[%c7_169, %c0_170, %c0_171], %590 {strides = array<i32>} : memref<8x8x2xf32, #tpu.memory_space<vmem>>, vector<1x8x2xf32>,
    return
  }
  func.func @transform_0(%arg0: i32) -> (i32, i32) {
    %c0_i32 = arith.constant 0 : i32
    %c0_i32_0 = arith.constant 0 : i32
    return %arg0, %c0_i32 : i32, i32
  }
  func.func @transform_1(%arg0: i32) -> (i32, i32, i32) {
    %c0_i32 = arith.constant 0 : i32
    %c0_i32_0 = arith.constant 0 : i32
    %c0_i32_1 = arith.constant 0 : i32
    return %c0_i32, %arg0, %c0_i32_0 : i32, i32, i32
  }
  func.func @transform_2(%arg0: i32) -> (i32, i32) {
    %c0_i32 = arith.constant 0 : i32
    %c0_i32_0 = arith.constant 0 : i32
    %c0_i32_1 = arith.constant 0 : i32
    return %c0_i32, %c0_i32_0 : i32, i32
  }
  func.func @transform_3(%arg0: i32) -> (i32, i32) {
    %c0_i32 = arith.constant 0 : i32
    %c0_i32_0 = arith.constant 0 : i32
    %c0_i32_1 = arith.constant 0 : i32
    return %c0_i32, %c0_i32_0 : i32, i32
  }
  func.func @transform_4(%arg0: i32) -> (i32, i32) {
    %c0_i32 = arith.constant 0 : i32
    %c0_i32_0 = arith.constant 0 : i32
    %c0_i32_1 = arith.constant 0 : i32
    return %c0_i32, %c0_i32_0 : i32, i32
  }
  func.func @transform_5(%arg0: i32) -> (i32, i32) {
    %c0_i32 = arith.constant 0 : i32
    %c0_i32_0 = arith.constant 0 : i32
    %c0_i32_1 = arith.constant 0 : i32
    return %c0_i32, %c0_i32_0 : i32, i32
  }
  func.func @transform_6(%arg0: i32) -> (i32, i32) {
    %c0_i32 = arith.constant 0 : i32
    %c0_i32_0 = arith.constant 0 : i32
    %c0_i32_1 = arith.constant 0 : i32
    return %c0_i32, %c0_i32_0 : i32, i32
  }
  func.func @transform_7(%arg0: i32) -> (i32, i32) {
    %c0_i32 = arith.constant 0 : i32
    %c0_i32_0 = arith.constant 0 : i32
    %c0_i32_1 = arith.constant 0 : i32
    return %c0_i32, %c0_i32_0 : i32, i32
  }
  func.func @transform_8(%arg0: i32) -> (i32, i32) {
    %c0_i32 = arith.constant 0 : i32
    %c0_i32_0 = arith.constant 0 : i32
    %c0_i32_1 = arith.constant 0 : i32
    return %c0_i32, %c0_i32_0 : i32, i32
  }
  func.func @transform_9(%arg0: i32) -> (i32, i32) {
    %c0_i32 = arith.constant 0 : i32
    %c0_i32_0 = arith.constant 0 : i32
    %c0_i32_1 = arith.constant 0 : i32
    return %c0_i32, %c0_i32_0 : i32, i32
  }
  func.func @transform_10(%arg0: i32) -> (i32, i32) {
    %c0_i32 = arith.constant 0 : i32
    %c0_i32_0 = arith.constant 0 : i32
    %c0_i32_1 = arith.constant 0 : i32
    return %c0_i32, %c0_i32_0 : i32, i32
  }
  func.func @transform_11(%arg0: i32) -> (i32, i32) {
    %c0_i32 = arith.constant 0 : i32
    %c0_i32_0 = arith.constant 0 : i32
    %c0_i32_1 = arith.constant 0 : i32
    return %c0_i32, %c0_i32_0 : i32, i32
  }
  func.func @transform_12(%arg0: i32) -> (i32, i32) {
    %c0_i32 = arith.constant 0 : i32
    %c0_i32_0 = arith.constant 0 : i32
    %c0_i32_1 = arith.constant 0 : i32
    return %c0_i32, %c0_i32_0 : i32, i32
  }
  func.func @transform_13(%arg0: i32) -> (i32, i32) {
    %c0_i32 = arith.constant 0 : i32
    %c0_i32_0 = arith.constant 0 : i32
    %c0_i32_1 = arith.constant 0 : i32
    return %c0_i32, %c0_i32_0 : i32, i32
  }
  func.func @transform_14(%arg0: i32) -> (i32, i32) {
    %c0_i32 = arith.constant 0 : i32
    %c0_i32_0 = arith.constant 0 : i32
    %c0_i32_1 = arith.constant 0 : i32
    return %c0_i32, %c0_i32_0 : i32, i32
  }
  func.func @transform_15(%arg0: i32) -> (i32, i32, i32) {
    %c0_i32 = arith.constant 0 : i32
    %c0_i32_0 = arith.constant 0 : i32
    %c0_i32_1 = arith.constant 0 : i32
    return %c0_i32, %arg0, %c0_i32_0 : i32, i32, i32
  }
}

</mosaic_0001>

<bundles_post_ra>
// kernel: forward.1
= control target key start
LH: loop header
LB: loop body
LE: loop exit
PB: predicated region body
PF: predicated region fallthrough
CT: control target
= control target key end

     0   :  { %vm64_vm0 = vcmask 1044480   ;;  %vm60_vm1 = vcmask 39936   ;;  %v4801_v0 = vmov 0.0   ;;  %vm4802_vm2 = vmmov 0   ;;  %s6843_s2 = inlined_call_operand.vmem [shape: f32[5,32], index: 2, kind: input, shape index: {}]   ;;  %s6844_s0 = inlined_call_operand.vmem [shape: f32[8,5], index: 0, kind: input, shape index: {}]   ;;  %s6845_s5 = inlined_call_operand.vmem [shape: f32[32,512], index: 5, kind: input, shape index: {}]   ;;  %s6846_s4 = inlined_call_operand.vmem [shape: bf16[46,512], index: 4, kind: input, shape index: {}]   ;;  %s6847_s7 = inlined_call_operand.vmem [shape: bf16[128,512], index: 7, kind: input, shape index: {}]   ;;  %s6848_s3 = inlined_call_operand.vmem [shape: f32[1,32], index: 3, kind: input, shape index: {}]   ;;  %s6849_s1 = inlined_call_operand.vmem [shape: f32[8,8,46], index: 1, kind: input, shape index: {}]   ;;  %s6850_s6 = inlined_call_operand.vmem [shape: f32[1,512], index: 6, kind: input, shape index: {}]   ;;  %s6851_s9 = inlined_call_operand.vmem [shape: bf16[128,512], index: 9, kind: input, shape index: {}]   ;;  %s6852_s8 = inlined_call_operand.vmem [shape: bf16[128,512], index: 8, kind: input, shape index: {}]   ;;  %s6853_s11 = inlined_call_operand.vmem [shape: bf16[128,512], index: 11, kind: input, shape index: {}]   ;;  %s6854_s10 = inlined_call_operand.vmem [shape: f32[1,512], index: 10, kind: input, shape index: {}]   ;;  %s6855_s13 = inlined_call_operand.vmem [shape: f32[128,2], index: 13, kind: input, shape index: {}]   ;;  %s6856_s12 = inlined_call_operand.vmem [shape: f32[128,2], index: 12, kind: input, shape index: {}]   ;;  %s6857_s14 = inlined_call_operand.vmem [shape: f32[1,2], index: 14, kind: input, shape index: {}]   ;;  %s6858_s15 = inlined_call_operand.vmem [shape: f32[8,8,2], index: 15, kind: output, shape index: {}]  }
   0x1   :  { %4055 = vmatprep.subr.mxu0 %v4801_v0  ;;  %v52_v1 = vld [vmem:[%s6843_s2] sm:$0x1f]  ;;  %4057 = vmatprep.mubr.msk.f32.mxu0 %vm4802_vm2, %v4801_v0  ;;  %v140_v3 = vld [vmem:[%s6845_s5 + $0x8] sm:$0xff]  ;;  %v142_v5 = vld [vmem:[%s6845_s5 + $0x18] sm:$0xff]  ;;  %vm177_vm3 = vcmask 261120   ;;  %vm423_vm4 = vcmask 1046528  }
   0x2   :  { %v51_v2 = vld [vmem:[%s6844_s0] sm:$0xff]  ;;  %4056 = vmatpush3.msk.msra.mxu0 %vm64_vm0, %v52_v1  ;;  %v144_v4 = vld [vmem:[%s6845_s5 + $0x28] sm:$0xff]  ;;  %v146_v6 = vld [vmem:[%s6845_s5 + $0x38] sm:$0xff]  ;;  %245 = vmatprep.mubr.f32.mxu1 %v4801_v0  ;;  %v6863_v44 = vmov 0   ;;  %vm410_vm5 = vcmask 375808   ;;  %vm3767_vm6 = vcmask 15360  }
   0x3   :  { %4058 = vmatmul.mubr.msk.f32.vlgmr.msra.gmra.mrb[0].mxu0 %vm60_vm1, %v51_v2  ;;  %v4148_v7 = vpack.c.bf16 %v144_v4, %v140_v3  ;;  %v4156_v8 = vpack.c.bf16 %v146_v6, %v142_v5  ;;  %v139_v9 = vld [vmem:[%s6845_s5] sm:$0xff]  ;;  %v141_v11 = vld [vmem:[%s6845_s5 + $0x10] sm:$0xff]  ;;  %v148_v15 = vld [vmem:[%s6845_s5 + $0x48] sm:$0xff] }
   0x4   :  { %v143_v10 = vld [vmem:[%s6845_s5 + $0x20] sm:$0xff]  ;;  %v145_v13 = vld [vmem:[%s6845_s5 + $0x30] sm:$0xff]  ;;  %316 = vmatprep.mubr.f32.mxu0 %v4801_v0  ;;  %v152_v16 = vld [vmem:[%s6845_s5 + $0x68] sm:$0xff] }
   0x5   :  { %v4150_v12 = vpack.c.bf16 %v143_v10, %v139_v9  ;;  %4149 = vmatprep.subr.bf16.mxu1 %v4148_v7  ;;  %4157 = vmatprep.subr.bf16.mxu0 %v4156_v8  ;;  %v4158_v14 = vpack.c.bf16 %v145_v13, %v141_v11  ;;  %v150_v17 = vld [vmem:[%s6845_s5 + $0x58] sm:$0xff]  ;;  %v4152_v18 = vpack.c.bf16 %v152_v16, %v148_v15  ;;  %v147_v20 = vld [vmem:[%s6845_s5 + $0x40] sm:$0xff]  ;;  %v149_v24 = vld [vmem:[%s6845_s5 + $0x50] sm:$0xff] }
   0x6   :  { %v154_v19 = vld [vmem:[%s6845_s5 + $0x78] sm:$0xff]  ;;  %v151_v21 = vld [vmem:[%s6845_s5 + $0x60] sm:$0xff]  ;;  %v153_v25 = vld [vmem:[%s6845_s5 + $0x70] sm:$0xff] }
   0x7   :  { %4151 = vmatpush1.bf16.msra.mxu1 %v4150_v12  ;;  %4159 = vmatpush1.bf16.msra.mxu0 %v4158_v14  ;;  %v4160_v22 = vpack.c.bf16 %v154_v19, %v150_v17  ;;  %v4154_v23 = vpack.c.bf16 %v151_v21, %v147_v20  ;;  %v4162_v26 = vpack.c.bf16 %v153_v25, %v149_v24  ;;  %v4273_v27 = vld [vmem:[%s6846_s4 + $0x4] ss:$16 sps:$4 sm:$0xff]   ;;  %v4276_v28 = vld [vmem:[%s6846_s4 + $0xc] ss:$16 sps:$4 sm:$0xff]   ;;  %v3787_v29 = vld [vmem:[%s6848_s3] ss:$0 sm:$0xff] }
   0x8   :  { %4153 = vmatprep.subr.bf16.mxu1 %v4152_v18  ;;  %v4271_v33 = vld [vmem:[%s6846_s4] ss:$16 sps:$4 sm:$0xff]   ;;  %v4274_v34 = vld [vmem:[%s6846_s4 + $0x8] ss:$16 sps:$4 sm:$0xff]   ;;  %v4279_v36 = vld [vmem:[%s6846_s4 + $0x24] ss:$16 sps:$4 sm:$0xff]  }
   0x9   :  { %4161 = vmatprep.subr.bf16.mxu0 %v4160_v22  ;;  %v4282_v37 = vld [vmem:[%s6846_s4 + $0x2c] ss:$16 sps:$4 sm:$0xff]   ;;  %v4277_v38 = vld [vmem:[%s6846_s4 + $0x20] ss:$16 sps:$4 sm:$0xff]   ;;  %v4280_v39 = vld [vmem:[%s6846_s4 + $0x28] ss:$16 sps:$4 sm:$0xff]  }
   0xa   :  { %v4283_v40 = vld [vmem:[%s6846_s4 + $0x44] ss:$16 sps:$4 sm:$0x7f]   ;;  %v4285_v41 = vld [vmem:[%s6846_s4 + $0x4c] ss:$16 sps:$4 sm:$0x7f]  }
   0xb   :  { %4155 = vmatpush1.bf16.msra.mxu1 %v4154_v23  ;;  %4163 = vmatpush1.bf16.msra.mxu0 %v4162_v26  ;;  %v4287_v42 = vld [vmem:[%s6846_s4 + $0x40] ss:$16 sps:$4 sm:$0x7f]   ;;  %v4288_v43 = vld [vmem:[%s6846_s4 + $0x48] ss:$16 sps:$4 sm:$0x7f]  }
   0xc   :  { %436 = vmatprep.subr.bf16.mxu1 %v4273_v27  ;;  %509 = vmatprep.subr.bf16.mxu0 %v4276_v28  ;;  %v323_v45 = vld [vmem:[%s6849_s1] sm:$0xff]  ;;  %v3792_v46 = vld [vmem:[%s6849_s1 + $0x8] sm:$0xff]  ;;  %v425_v47 = vsel %vm423_vm4, %v4287_v42, 0  ;;  %v431_v48 = vsel %vm423_vm4, %v4288_v43, 0  ;;  %v3793_v54 = vld [vmem:[%s6849_s1 + $0x10] sm:$0xff]  ;;  %v157_v27 = vlaneseq }
   0xd   :  { %v4988_v49 = vld [vmem:[%s6847_s7 + $0x4] ss:$16 sps:$4 sm:$0xff]   ;;  %v338_v50 = vpack.c.bf16 %v3792_v46, %v323_v45  ;;  %v4993_v51 = vld [vmem:[%s6847_s7] ss:$16 sps:$4 sm:$0xff]   ;;  %v3794_v55 = vld [vmem:[%s6849_s1 + $0x18] sm:$0xff] }
   0xe   :  { %v4999_v52 = vld [vmem:[%s6847_s7 + $0x24] ss:$16 sps:$4 sm:$0xff]   ;;  %v5008_v53 = vld [vmem:[%s6847_s7 + $0x20] ss:$16 sps:$4 sm:$0xff]   ;;  %v339_v57 = vpack.c.bf16 %v3794_v55, %v3793_v54  ;;  %v3796_v62 = vld [vmem:[%s6849_s1 + $0x28] sm:$0xff]  ;;  %v5249_v28 = vshrl.u32 %v157_v27, 7 }
   0xf   :  { %v5022_v56 = vld [vmem:[%s6847_s7 + $0x44] ss:$16 sps:$4 sm:$0xff]   ;;  %v5030_v58 = vld [vmem:[%s6847_s7 + $0x40] ss:$16 sps:$4 sm:$0xff]   ;;  %v3798_v5 = vld [vmem:[%s6849_s1 + $0x38] sm:$0xff] }
  0x10   :  { %v5036_v59 = vld [vmem:[%s6847_s7 + $0x64] ss:$16 sps:$4 sm:$0xff]   ;;  %v5045_v60 = vld [vmem:[%s6847_s7 + $0x60] ss:$16 sps:$4 sm:$0xff]   ;;  %v5126_v11 = vld [vmem:[%s6847_s7 + $0xc] ss:$16 sps:$4 sm:$0xff]  }
  0x11   :  { %v3795_v61 = vld [vmem:[%s6849_s1 + $0x20] sm:$0xff]  ;;  %v3797_v4 = vld [vmem:[%s6849_s1 + $0x30] sm:$0xff]  ;;  %v5136_v12 = vld [vmem:[%s6847_s7 + $0x8] ss:$16 sps:$4 sm:$0xff]   ;;  %6867 = vst [vmem:[#allocation4_spill] sm:$0xff] %v5249_v28 }
  0x12   :  { %v5059_v63 = vld [vmem:[%s6847_s7 + $0x84] ss:$16 sps:$4 sm:$0xff]   ;;  %v340_v0 = vpack.c.bf16 %v3796_v62, %v3795_v61  ;;  %v5067_v1 = vld [vmem:[%s6847_s7 + $0x80] ss:$16 sps:$4 sm:$0xff]   ;;  %v341_v7 = vpack.c.bf16 %v3798_v5, %v3797_v4  ;;  %v5142_v13 = vld [vmem:[%s6847_s7 + $0x2c] ss:$16 sps:$4 sm:$0xff]  }
  0x13   :  { %v5074_v2 = vld [vmem:[%s6847_s7 + $0xa4] ss:$16 sps:$4 sm:$0xff]   ;;  %v5082_v3 = vld [vmem:[%s6847_s7 + $0xa0] ss:$16 sps:$4 sm:$0xff]   ;;  %v5151_v14 = vld [vmem:[%s6847_s7 + $0x28] ss:$16 sps:$4 sm:$0xff]  }
  0x14   :  { %v5096_v6 = vld [vmem:[%s6847_s7 + $0xc4] ss:$16 sps:$4 sm:$0xff]   ;;  %v5104_v8 = vld [vmem:[%s6847_s7 + $0xc0] ss:$16 sps:$4 sm:$0xff]   ;;  %v5158_v15 = vld [vmem:[%s6847_s7 + $0x4c] ss:$16 sps:$4 sm:$0xff]  }
  0x15   :  { %v5110_v9 = vld [vmem:[%s6847_s7 + $0xe4] ss:$16 sps:$4 sm:$0xff]   ;;  %v5119_v10 = vld [vmem:[%s6847_s7 + $0xe0] ss:$16 sps:$4 sm:$0xff]   ;;  %v5166_v16 = vld [vmem:[%s6847_s7 + $0x48] ss:$16 sps:$4 sm:$0xff]  }
  0x16   :  { %v5172_v17 = vld [vmem:[%s6847_s7 + $0x6c] ss:$16 sps:$4 sm:$0xff]   ;;  %v5178_v18 = vld [vmem:[%s6847_s7 + $0x68] ss:$16 sps:$4 sm:$0xff]  }
  0x17   :  { %v5184_v19 = vld [vmem:[%s6847_s7 + $0x8c] ss:$16 sps:$4 sm:$0xff]   ;;  %v5190_v20 = vld [vmem:[%s6847_s7 + $0x88] ss:$16 sps:$4 sm:$0xff]  }
  0x18   :  { %v5196_v21 = vld [vmem:[%s6847_s7 + $0xac] ss:$16 sps:$4 sm:$0xff]   ;;  %v5202_v22 = vld [vmem:[%s6847_s7 + $0xa8] ss:$16 sps:$4 sm:$0xff]  }
  0x19   :  { %v5208_v23 = vld [vmem:[%s6847_s7 + $0xcc] ss:$16 sps:$4 sm:$0xff]   ;;  %v5214_v24 = vld [vmem:[%s6847_s7 + $0xc8] ss:$16 sps:$4 sm:$0xff]  }
  0x1a   :  { %v5220_v25 = vld [vmem:[%s6847_s7 + $0xec] ss:$16 sps:$4 sm:$0xff]   ;;  %v5226_v26 = vld [vmem:[%s6847_s7 + $0xe8] ss:$16 sps:$4 sm:$0xff]  }
  0xd6   :  { %v134_v30 = vpop.f32.mrb[0].mxu0 }
  0xd7   :  { %v135_v31 = vadd.f32 %v3787_v29, %v134_v30  ;;  %v4059_v32 = vpop.f32.mrb[1].mxu0 }
  0xd9   :  { %v138_v35 = vmax.f32 %v135_v31, 0.0 }
  0xdb   :  { %3790 = vmatmul.mubr.msk.f32.vlgmr.msra.gmra.mrb[0].mxu1 %vm177_vm3, %v138_v35  ;;  %3791 = vmatmul.mubr.msk.f32.vlgmr.msra.gmra.mrb[2].mxu0 %vm177_vm3, %v138_v35  ;;  %v155_v35 = vld [vmem:[%s6850_s6] sm:$0xf] }
  0xdc   :  { %437 = vmatpush1.bf16.msra.mxu1 %v4271_v33  ;;  %510 = vmatpush1.bf16.msra.mxu0 %v4274_v34  ;;  %v6859_v33 = vsub.s32 0, %v5249_v28  ;;  %v6862_v34 = vsub.s32 2, %v5249_v28 }
  0xdd   :  { %438 = vmatprep.subr.bf16.mxu1 %v4279_v36  ;;  %511 = vmatprep.subr.bf16.mxu0 %v4282_v37  ;;  %v6861_v36 = vsub.s32 1, %v5249_v28  ;;  %v6860_v37 = vsub.s32 3, %v5249_v28 }
  0xde   :  { %468 = vmatprep.mubr.bf16.mxu1 %v6863_v44  ;;  %541 = vmatprep.mubr.bf16.mxu0 %v6863_v44 }
  0xe0   :  { %439 = vmatpush1.bf16.msra.mxu1 %v4277_v38  ;;  %512 = vmatpush1.bf16.msra.mxu0 %v4280_v39  ;;  %v160_v38 = vrot.slane %v155_v35, %v6859_v33  ;;  %v168_v39 = vrot.slane %v155_v35, %v6862_v34 }
  0xe1   :  { %3811 = vmatprep.subr.msk.bf16.mxu1 %vm423_vm4, %v4283_v40  ;;  %3816 = vmatprep.subr.msk.bf16.mxu0 %vm423_vm4, %v4285_v41  ;;  %v164_v40 = vrot.slane %v155_v35, %v6861_v36  ;;  %v172_v41 = vrot.slane %v155_v35, %v6860_v37 }
  0xe4   :  { %441 = vmatpush1.bf16.msra.mxu1 %v425_v47  ;;  %514 = vmatpush1.bf16.msra.mxu0 %v431_v48 }
  0xe5   :  { %774 = vmatprep.subr.bf16.mxu0 %v4988_v49  ;;  %886 = vmatprep.subr.bf16.mxu1 %v4988_v49 }
  0xe7   :  { %3812 = vmatmul.mubr.msk.bf16.vlgmr.msra.gmra.mrb[4].mxu1 %vm410_vm5, %v338_v50  ;;  %3817 = vmatmul.mubr.msk.bf16.vlgmr.msra.gmra.mrb[4].mxu0 %vm410_vm5, %v338_v50 }
  0xe8   :  { %775 = vmatpush1.bf16.msra.mxu0 %v4993_v51  ;;  %478 = vmatprep.mubr.bf16.mxu1 %v6863_v44 }
  0xe9   :  { %776 = vmatprep.subr.bf16.mxu0 %v4999_v52  ;;  %551 = vmatprep.mubr.bf16.mxu0 %v6863_v44 }
  0xea   :  { %887 = vmatpush1.bf16.msra.mxu1 %v4993_v51 }
  0xeb   :  { %888 = vmatprep.subr.bf16.mxu1 %v4999_v52 }
  0xec   :  { %777 = vmatpush1.bf16.msra.mxu0 %v5008_v53 }
  0xed   :  { %778 = vmatprep.subr.bf16.mxu0 %v5022_v56 }
  0xee   :  { %889 = vmatpush1.bf16.msra.mxu1 %v5008_v53 }
  0xef   :  { %3813 = vmatmul.mubr.msk.bf16.gmra.mrb[8].mxu1 %vm410_vm5, %v339_v57  ;;  %3818 = vmatmul.mubr.msk.bf16.gmra.mrb[8].mxu0 %vm410_vm5, %v339_v57 }
  0xf0   :  { %779 = vmatpush1.bf16.msra.mxu0 %v5030_v58  ;;  %488 = vmatprep.mubr.bf16.mxu1 %v6863_v44 }
  0xf1   :  { %780 = vmatprep.subr.bf16.mxu0 %v5036_v59  ;;  %561 = vmatprep.mubr.bf16.mxu0 %v6863_v44 }
  0xf2   :  { %890 = vmatprep.subr.bf16.mxu1 %v5022_v56 }
  0xf3   :  { %891 = vmatpush1.bf16.msra.mxu1 %v5030_v58 }
  0xf4   :  { %781 = vmatpush1.bf16.msra.mxu0 %v5045_v60  ;;  %892 = vmatprep.subr.bf16.mxu1 %v5036_v59 }
  0xf5   :  { %782 = vmatprep.subr.bf16.mxu0 %v5059_v63 }
  0xf7   :  { %3814 = vmatmul.mubr.msk.bf16.gmra.mrb[12].mxu1 %vm410_vm5, %v340_v0  ;;  %3819 = vmatmul.mubr.msk.bf16.gmra.mrb[12].mxu0 %vm410_vm5, %v340_v0 }
  0xf8   :  { %783 = vmatpush1.bf16.msra.mxu0 %v5067_v1  ;;  %498 = vmatprep.mubr.bf16.mxu1 %v6863_v44 }
  0xf9   :  { %784 = vmatprep.subr.bf16.mxu0 %v5074_v2  ;;  %571 = vmatprep.mubr.bf16.mxu0 %v6863_v44 }
  0xfa   :  { %893 = vmatpush1.bf16.msra.mxu1 %v5045_v60 }
  0xfb   :  { %894 = vmatprep.subr.bf16.mxu1 %v5059_v63 }
  0xfc   :  { %785 = vmatpush1.bf16.msra.mxu0 %v5082_v3 }
  0xfd   :  { %786 = vmatprep.subr.bf16.mxu0 %v5096_v6 }
  0xfe   :  { %895 = vmatpush1.bf16.msra.mxu1 %v5067_v1 }
  0xff   :  { %3815 = vmatmul.mubr.msk.bf16.gmra.mrb[16].mxu1 %vm410_vm5, %v341_v7  ;;  %3820 = vmatmul.mubr.msk.bf16.gmra.mrb[16].mxu0 %vm410_vm5, %v341_v7 }
 0x100   :  { %787 = vmatpush1.bf16.msra.mxu0 %v5104_v8  ;;  %806 = vmatprep.mubr.bf16.mxu0 %v6863_v44 }
 0x101   :  { %788 = vmatprep.subr.bf16.mxu0 %v5110_v9  ;;  %896 = vmatprep.subr.bf16.mxu1 %v5074_v2 }
 0x102   :  { %897 = vmatpush1.bf16.msra.mxu1 %v5082_v3  ;;  %918 = vmatprep.mubr.bf16.mxu1 %v6863_v44 }
 0x103   :  { %898 = vmatprep.subr.bf16.mxu1 %v5096_v6 }
 0x104   :  { %789 = vmatpush1.bf16.msra.mxu0 %v5119_v10 }
 0x105   :  { %815 = vmatprep.subr.bf16.mxu0 %v5126_v11 }
 0x106   :  { %899 = vmatpush1.bf16.msra.mxu1 %v5104_v8 }
 0x107   :  { %807 = vmatmul.mubr.bf16.vlgmr.msra.gmra.mrb[20].mxu0 %v6863_v44  ;;  %900 = vmatprep.subr.bf16.mxu1 %v5110_v9 }
 0x108   :  { %816 = vmatpush1.bf16.msra.mxu0 %v5136_v12  ;;  %847 = vmatprep.mubr.bf16.mxu0 %v6863_v44 }
 0x109   :  { %817 = vmatprep.subr.bf16.mxu0 %v5142_v13 }
 0x10a   :  { %901 = vmatpush1.bf16.msra.mxu1 %v5119_v10 }
 0x10b   :  { %998 = vmatprep.subr.bf16.mxu1 %v4988_v49 }
 0x10c   :  { %818 = vmatpush1.bf16.msra.mxu0 %v5151_v14 }
 0x10d   :  { %819 = vmatprep.subr.bf16.mxu0 %v5158_v15 }
 0x110   :  { %820 = vmatpush1.bf16.msra.mxu0 %v5166_v16 }
 0x111   :  { %821 = vmatprep.subr.bf16.mxu0 %v5172_v17 }
 0x114   :  { %822 = vmatpush1.bf16.msra.mxu0 %v5178_v18 }
 0x115   :  { %823 = vmatprep.subr.bf16.mxu0 %v5184_v19 }
 0x118   :  { %824 = vmatpush1.bf16.msra.mxu0 %v5190_v20 }
 0x119   :  { %825 = vmatprep.subr.bf16.mxu0 %v5196_v21 }
 0x11c   :  { %826 = vmatpush1.bf16.msra.mxu0 %v5202_v22 }
 0x11d   :  { %827 = vmatprep.subr.bf16.mxu0 %v5208_v23 }
 0x120   :  { %828 = vmatpush1.bf16.msra.mxu0 %v5214_v24 }
 0x121   :  { %829 = vmatprep.subr.bf16.mxu0 %v5220_v25 }
 0x124   :  { %830 = vmatpush1.bf16.msra.mxu0 %v5226_v26 }
 0x125   :  { %927 = vmatprep.subr.bf16.mxu0 %v5126_v11 }
 0x127   :  { %848 = vmatmul.mubr.bf16.vlgmr.msra.gmra.mrb[24].mxu0 %v6863_v44 }
 0x128   :  { %928 = vmatpush1.bf16.msra.mxu0 %v5136_v12  ;;  %959 = vmatprep.mubr.bf16.mxu0 %v6863_v44 }
 0x129   :  { %929 = vmatprep.subr.bf16.mxu0 %v5142_v13 }
 0x12c   :  { %930 = vmatpush1.bf16.msra.mxu0 %v5151_v14 }
 0x12d   :  { %931 = vmatprep.subr.bf16.mxu0 %v5158_v15 }
 0x130   :  { %932 = vmatpush1.bf16.msra.mxu0 %v5166_v16 }
 0x131   :  { %933 = vmatprep.subr.bf16.mxu0 %v5172_v17 }
 0x134   :  { %934 = vmatpush1.bf16.msra.mxu0 %v5178_v18 }
 0x135   :  { %935 = vmatprep.subr.bf16.mxu0 %v5184_v19 }
 0x138   :  { %936 = vmatpush1.bf16.msra.mxu0 %v5190_v20 }
 0x139   :  { %937 = vmatprep.subr.bf16.mxu0 %v5196_v21 }
 0x13c   :  { %938 = vmatpush1.bf16.msra.mxu0 %v5202_v22 }
 0x13d   :  { %939 = vmatprep.subr.bf16.mxu0 %v5208_v23 }
 0x140   :  { %940 = vmatpush1.bf16.msra.mxu0 %v5214_v24 }
 0x141   :  { %941 = vmatprep.subr.bf16.mxu0 %v5220_v25 }
 0x144   :  { %942 = vmatpush1.bf16.msra.mxu0 %v5226_v26 }
 0x145   :  { %1039 = vmatprep.subr.bf16.mxu0 %v5126_v11 }
 0x1ae   :  { %v247_v29 = vpop.f32.mrb[0].mxu1  ;;  %v318_v30 = vpop.f32.mrb[2].mxu0 }
 0x1af   :  { %v249_v31 = vpop.f32.mrb[1].mxu1  ;;  %v320_v32 = vpop.f32.mrb[3].mxu0  ;;  %v248_v42 = vadd.f32 %v247_v29, %v160_v38  ;;  %v319_v43 = vadd.f32 %v318_v30, %v168_v39 }
 0x1b0   :  { %v5266_v45 = vadd.f32 %v249_v31, %v164_v40  ;;  %v5268_v46 = vadd.f32 %v320_v32, %v172_v41 }
 0x1ba   :  { %v470_v47 = vpop.f32.mrb[4].mxu1  ;;  %v543_v48 = vpop.f32.mrb[4].mxu0 }
 0x1bb   :  { %v5270_v50 = vadd.f32 %v470_v47, %v248_v42  ;;  %v5272_v54 = vadd.f32 %v543_v48, %v319_v43  ;;  %v472_v55 = vpop.f32.mrb[5].mxu1  ;;  %v545_v57 = vpop.f32.mrb[5].mxu0 }
 0x1bc   :  { %v473_v61 = vadd.f32 %v472_v55, %v5266_v45  ;;  %v5276_v62 = vadd.f32 %v545_v57, %v5268_v46  ;;  %v474_v0 = vpop.f32.mrb[6].mxu1  ;;  %v547_v4 = vpop.f32.mrb[6].mxu0 }
 0x1bd   :  { %v5278_v5 = vadd.f32 %v474_v0, %v248_v42  ;;  %v5280_v7 = vadd.f32 %v547_v4, %v319_v43  ;;  %v476_v27 = vpop.f32.mrb[7].mxu1  ;;  %v549_v29 = vpop.f32.mrb[7].mxu0 }
 0x1be   :  { %v5283_v30 = vadd.f32 %v476_v27, %v5266_v45  ;;  %v5286_v31 = vadd.f32 %v549_v29, %v5268_v46 }
 0x1c2   :  { %v480_v32 = vpop.f32.mrb[8].mxu1  ;;  %v553_v35 = vpop.f32.mrb[8].mxu0 }
 0x1c3   :  { %v5288_v38 = vadd.f32 %v480_v32, %v248_v42  ;;  %v5290_v39 = vadd.f32 %v553_v35, %v319_v43  ;;  %v482_v40 = vpop.f32.mrb[9].mxu1  ;;  %v555_v41 = vpop.f32.mrb[9].mxu0 }
 0x1c4   :  { %v5293_v47 = vadd.f32 %v482_v40, %v5266_v45  ;;  %v5296_v48 = vadd.f32 %v555_v41, %v5268_v46  ;;  %v484_v55 = vpop.f32.mrb[10].mxu1  ;;  %v557_v57 = vpop.f32.mrb[10].mxu0 }
 0x1c5   :  { %v5298_v0 = vadd.f32 %v484_v55, %v248_v42  ;;  %v5300_v4 = vadd.f32 %v557_v57, %v319_v43  ;;  %v486_v27 = vpop.f32.mrb[11].mxu1  ;;  %v559_v29 = vpop.f32.mrb[11].mxu0 }
 0x1c6   :  { %v5303_v32 = vadd.f32 %v486_v27, %v5266_v45  ;;  %v5306_v35 = vadd.f32 %v559_v29, %v5268_v46 }
 0x1c7   :  { %6868 = vst [vmem:[#allocation5_spill] sm:$0xff] %v5300_v4 }
 0x1c8   :  { %6869 = vst [vmem:[#allocation6_spill] sm:$0xff] %v5303_v32  ;;  %6870 = vst [vmem:[#allocation7_spill] sm:$0xff] %v5306_v35 }
 0x1ca   :  { %v490_v33 = vpop.f32.mrb[12].mxu1  ;;  %v563_v40 = vpop.f32.mrb[12].mxu0 }
 0x1cb   :  { %v5308_v37 = vadd.f32 %v490_v33, %v248_v42  ;;  %v5310_v41 = vadd.f32 %v563_v40, %v319_v43  ;;  %v492_v36 = vpop.f32.mrb[13].mxu1  ;;  %v565_v34 = vpop.f32.mrb[13].mxu0 }
 0x1cc   :  { %v5313_v55 = vadd.f32 %v492_v36, %v5266_v45  ;;  %v5316_v57 = vadd.f32 %v565_v34, %v5268_v46  ;;  %v494_v44 = vpop.f32.mrb[14].mxu1  ;;  %v567_v27 = vpop.f32.mrb[14].mxu0 }
 0x1cd   :  { %6871 = vst [vmem:[#allocation8_spill] sm:$0xff] %v5308_v37  ;;  %6872 = vst [vmem:[#allocation9_spill] sm:$0xff] %v5310_v41  ;;  %v5318_v28 = vadd.f32 %v494_v44, %v248_v42  ;;  %v5320_v29 = vadd.f32 %v567_v27, %v319_v43  ;;  %v496_v35 = vpop.f32.mrb[15].mxu1  ;;  %v569_v32 = vpop.f32.mrb[15].mxu0 }
 0x1ce   :  { %6873 = vst [vmem:[#allocation10_spill] sm:$0xff] %v5313_v55  ;;  %6874 = vst [vmem:[#allocation11_spill] sm:$0xff] %v5316_v57  ;;  %v5323_v33 = vadd.f32 %v496_v35, %v5266_v45  ;;  %v5326_v40 = vadd.f32 %v569_v32, %v5268_v46 }
 0x1cf   :  { %6875 = vst [vmem:[#allocation12_spill] sm:$0xff] %v5318_v28  ;;  %6876 = vst [vmem:[#allocation13_spill] sm:$0xff] %v5320_v29 }
 0x1d0   :  { %6877 = vst [vmem:[#allocation14_spill] sm:$0xff] %v5323_v33  ;;  %6878 = vst [vmem:[#allocation15_spill] sm:$0xff] %v5326_v40 }
 0x1d2   :  { %v500_v41 = vpop.f32.mrb[16].mxu1  ;;  %v573_v36 = vpop.f32.mrb[16].mxu0 }
 0x1d3   :  { %v5328_v55 = vadd.f32 %v500_v41, %v248_v42  ;;  %v5330_v34 = vadd.f32 %v573_v36, %v319_v43  ;;  %v502_v57 = vpop.f32.mrb[17].mxu1  ;;  %v575_v37 = vpop.f32.mrb[17].mxu0 }
 0x1d4   :  { %v5333_v44 = vadd.f32 %v502_v57, %v5266_v45  ;;  %v5336_v27 = vadd.f32 %v575_v37, %v5268_v46  ;;  %v504_v29 = vpop.f32.mrb[18].mxu1  ;;  %v577_v35 = vpop.f32.mrb[18].mxu0 }
 0x1d5   :  { %6879 = vst [vmem:[#allocation16_spill] sm:$0xff] %v5328_v55  ;;  %6880 = vst [vmem:[#allocation17_spill] sm:$0xff] %v5330_v34  ;;  %v5338_v33 = vadd.f32 %v504_v29, %v248_v42  ;;  %v5340_v32 = vadd.f32 %v577_v35, %v319_v43  ;;  %v506_v40 = vpop.f32.mrb[19].mxu1  ;;  %v579_v28 = vpop.f32.mrb[19].mxu0 }
 0x1d6   :  { %6881 = vst [vmem:[#allocation18_spill] sm:$0xff] %v5333_v44  ;;  %6882 = vst [vmem:[#allocation19_spill] sm:$0xff] %v5336_v27  ;;  %v5343_v41 = vadd.f32 %v506_v40, %v5266_v45  ;;  %v5346_v36 = vadd.f32 %v579_v28, %v5268_v46 }
 0x1d7   :  { %6883 = vst [vmem:[#allocation20_spill] sm:$0xff] %v5340_v32 }
 0x1da   :  { %v808_v34 = vpop.f32.mrb[20].mxu0 }
 0x1db   :  { %v856_v57 = vadd.f32 %v808_v34, %v5270_v50  ;;  %v810_v44 = vpop.f32.mrb[21].mxu0 }
 0x1dc   :  { %v857_v37 = vadd.f32 %v810_v44, %v473_v61  ;;  %v812_v27 = vpop.f32.mrb[22].mxu0 }
 0x1dd   :  { %v813_v55 = vpop.f32.mrb[23].mxu0  ;;  %v3853_v42 = vmul.f32 -1.442695, %v856_v57 }
 0x1de   :  { %v3854_v4 = vmul.f32 -1.442695, %v857_v37 }
 0x1e0   :  { %4481 = vpow2.f32 %v3854_v4 }
 0x1e1   :  { %4483 = vpow2.f32 %v3853_v42 }
 0x1ea   :  { %v4482_v43 = vpop.eup %4481 }
 0x1eb   :  { %v4484_v29 = vpop.eup %4483  ;;  %v869_v35 = vadd.f32 1.0, %v4482_v43 }
 0x1ec   :  { %v863_v32 = vadd.f32 1.0, %v4484_v29 }
 0x1ed   :  { %4485 = vrcp.f32 %v869_v35  ;;  %v6884_v35 = vmov 0  }
 0x1ee   :  { %4487 = vrcp.f32 %v863_v32 }
 0x1f7   :  { %v4486_v34 = vpop.eup %4485 }
 0x1f8   :  { %v4488_v4 = vpop.eup %4487  ;;  %v879_v27 = vmul.f32 0.0, %v4486_v34 }
 0x1fa   :  { %v849_v45 = vpop.f32.mrb[24].mxu0 }
 0x1fb   :  { %v858_v28 = vadd.f32 %v849_v45, %v5272_v54  ;;  %v851_v46 = vpop.f32.mrb[25].mxu0 }
 0x1fc   :  { %v859_v50 = vadd.f32 %v851_v46, %v5276_v62  ;;  %v853_v40 = vpop.f32.mrb[26].mxu0 }
 0x1fd   :  { %4489 = vtanh.f32 %v858_v28  ;;  %v854_v61 = vpop.f32.mrb[27].mxu0 }
 0x1fe   :  { %v3855_v55 = vmul.f32 -1.442695, %v859_v50 }
 0x200   :  { %4491 = vpow2.f32 %v3855_v55 }
 0x207   :  { %v4490_v44 = vpop.eup %4489 }
 0x208   :  { %v880_v57 = vmul.f32 %v4490_v44, %v4488_v4 }
 0x20a   :  { %v4492_v37 = vpop.eup %4491  ;;  %v5351_v42 = vadd.f32 %v880_v57, %v879_v27 }
 0x20b   :  { %v876_v43 = vadd.f32 1.0, %v4492_v37 }
 0x20c   :  { %4493 = vtanh.f32 %v5351_v42 }
 0x20d   :  { %4495 = vrcp.f32 %v876_v43 }
 0x216   :  { %v4494_v54 = vpop.eup %4493 }
 0x217   :  { %v4496_v32 = vpop.eup %4495 }
 0x218   :  { %v5354_v62 = vmul.f32 %v4496_v32, %v4494_v54 }
 0x21a   :  { %v885_v29 = vpack.c.bf16 %v5354_v62, %v5354_v62 }
 0x21c   :  { %919 = vmatmul.mubr.bf16.vlgmr.msra.gmra.mrb[20].mxu1 %v885_v29  ;;  %960 = vmatmul.mubr.bf16.vlgmr.msra.gmra.mrb[28].mxu0 %v885_v29 }
 0x21d   :  { %999 = vmatpush1.bf16.msra.mxu1 %v4993_v51  ;;  %1040 = vmatpush1.bf16.msra.mxu0 %v5136_v12 }
 0x21e   :  { %1000 = vmatprep.subr.bf16.mxu1 %v4999_v52  ;;  %1041 = vmatprep.subr.bf16.mxu0 %v5142_v13 }
 0x21f   :  { %1030 = vmatprep.mubr.bf16.mxu1 %v6884_v35  ;;  %1071 = vmatprep.mubr.bf16.mxu0 %v6884_v35 }
 0x221   :  { %1001 = vmatpush1.bf16.msra.mxu1 %v5008_v53  ;;  %1042 = vmatpush1.bf16.msra.mxu0 %v5151_v14 }
 0x222   :  { %1002 = vmatprep.subr.bf16.mxu1 %v5022_v56  ;;  %1043 = vmatprep.subr.bf16.mxu0 %v5158_v15 }
 0x225   :  { %1003 = vmatpush1.bf16.msra.mxu1 %v5030_v58  ;;  %1044 = vmatpush1.bf16.msra.mxu0 %v5166_v16 }
 0x226   :  { %1004 = vmatprep.subr.bf16.mxu1 %v5036_v59  ;;  %1045 = vmatprep.subr.bf16.mxu0 %v5172_v17 }
 0x229   :  { %1005 = vmatpush1.bf16.msra.mxu1 %v5045_v60  ;;  %1046 = vmatpush1.bf16.msra.mxu0 %v5178_v18 }
 0x22a   :  { %1006 = vmatprep.subr.bf16.mxu1 %v5059_v63  ;;  %1047 = vmatprep.subr.bf16.mxu0 %v5184_v19 }
 0x22d   :  { %1007 = vmatpush1.bf16.msra.mxu1 %v5067_v1  ;;  %1048 = vmatpush1.bf16.msra.mxu0 %v5190_v20 }
 0x22e   :  { %1008 = vmatprep.subr.bf16.mxu1 %v5074_v2  ;;  %1049 = vmatprep.subr.bf16.mxu0 %v5196_v21 }
 0x231   :  { %1009 = vmatpush1.bf16.msra.mxu1 %v5082_v3  ;;  %1050 = vmatpush1.bf16.msra.mxu0 %v5202_v22 }
 0x232   :  { %1010 = vmatprep.subr.bf16.mxu1 %v5096_v6  ;;  %1051 = vmatprep.subr.bf16.mxu0 %v5208_v23 }
 0x235   :  { %1011 = vmatpush1.bf16.msra.mxu1 %v5104_v8  ;;  %1052 = vmatpush1.bf16.msra.mxu0 %v5214_v24 }
 0x236   :  { %1012 = vmatprep.subr.bf16.mxu1 %v5110_v9  ;;  %1053 = vmatprep.subr.bf16.mxu0 %v5220_v25 }
 0x239   :  { %1013 = vmatpush1.bf16.msra.mxu1 %v5119_v10  ;;  %1054 = vmatpush1.bf16.msra.mxu0 %v5226_v26 }
 0x23a   :  { %1110 = vmatprep.subr.bf16.mxu1 %v4988_v49  ;;  %1151 = vmatprep.subr.bf16.mxu0 %v5126_v11 }
 0x2ef   :  { %v920_v45 = vpop.f32.mrb[20].mxu1  ;;  %v961_v28 = vpop.f32.mrb[28].mxu0 }
 0x2f0   :  { %v968_v46 = vadd.f32 %v920_v45, %v5278_v5  ;;  %v970_v50 = vadd.f32 %v961_v28, %v5280_v7  ;;  %v922_v40 = vpop.f32.mrb[21].mxu1  ;;  %v963_v61 = vpop.f32.mrb[29].mxu0 }
 0x2f1   :  { %v969_v55 = vadd.f32 %v922_v40, %v5283_v30  ;;  %v971_v34 = vadd.f32 %v963_v61, %v5286_v31  ;;  %v924_v4 = vpop.f32.mrb[22].mxu1  ;;  %v965_v44 = vpop.f32.mrb[30].mxu0 }
 0x2f2   :  { %v3856_v27 = vmul.f32 -1.442695, %v968_v46  ;;  %v925_v57 = vpop.f32.mrb[23].mxu1  ;;  %v966_v37 = vpop.f32.mrb[31].mxu0 }
 0x2f3   :  { %v3857_v43 = vmul.f32 -1.442695, %v969_v55  ;;  %v3858_v54 = vmul.f32 -1.442695, %v971_v34 }
 0x2f4   :  { %4497 = vpow2.f32 %v3856_v27 }
 0x2f5   :  { %4499 = vpow2.f32 %v3857_v43 }
 0x2f6   :  { %4501 = vpow2.f32 %v3858_v54 }
 0x2f7   :  { %4503 = vtanh.f32 %v970_v50 }
 0x2fe   :  { %v4498_v32 = vpop.eup %4497 }
 0x2ff   :  { %v4500_v29 = vpop.eup %4499  ;;  %v975_v5 = vadd.f32 1.0, %v4498_v32 }
 0x300   :  { %v981_v7 = vadd.f32 1.0, %v4500_v29  ;;  %v4502_v30 = vpop.eup %4501 }
 0x301   :  { %4505 = vrcp.f32 %v975_v5  ;;  %v4504_v45 = vpop.eup %4503  ;;  %v988_v46 = vadd.f32 1.0, %v4502_v30 }
 0x302   :  { %4507 = vrcp.f32 %v981_v7 }
 0x303   :  { %4509 = vrcp.f32 %v988_v46 }
 0x30b   :  { %v4506_v31 = vpop.eup %4505 }
 0x30c   :  { %v4508_v28 = vpop.eup %4507  ;;  %v992_v40 = vmul.f32 %v4506_v31, %v4504_v45 }
 0x30d   :  { %v991_v61 = vmul.f32 %v4508_v28, %v5351_v42  ;;  %v4510_v34 = vpop.eup %4509 }
 0x30f   :  { %v5397_v55 = vadd.f32 %v992_v40, %v991_v61 }
 0x311   :  { %4511 = vtanh.f32 %v5397_v55 }
 0x31b   :  { %v4512_v4 = vpop.eup %4511 }
 0x31c   :  { %v5400_v44 = vmul.f32 %v4512_v4, %v4510_v34 }
 0x31e   :  { %v997_v50 = vpack.c.bf16 %v5400_v44, %v5400_v44 }
 0x320   :  { %1031 = vmatmul.mubr.bf16.vlgmr.msra.gmra.mrb[24].mxu1 %v997_v50  ;;  %1072 = vmatmul.mubr.bf16.vlgmr.msra.gmra.mrb[32].mxu0 %v997_v50 }
 0x321   :  { %1111 = vmatpush1.bf16.msra.mxu1 %v4993_v51  ;;  %1152 = vmatpush1.bf16.msra.mxu0 %v5136_v12 }
 0x322   :  { %1112 = vmatprep.subr.bf16.mxu1 %v4999_v52  ;;  %1153 = vmatprep.subr.bf16.mxu0 %v5142_v13 }
 0x323   :  { %1142 = vmatprep.mubr.bf16.mxu1 %v6884_v35  ;;  %1183 = vmatprep.mubr.bf16.mxu0 %v6884_v35 }
 0x325   :  { %1113 = vmatpush1.bf16.msra.mxu1 %v5008_v53  ;;  %1154 = vmatpush1.bf16.msra.mxu0 %v5151_v14 }
 0x326   :  { %1114 = vmatprep.subr.bf16.mxu1 %v5022_v56  ;;  %1155 = vmatprep.subr.bf16.mxu0 %v5158_v15 }
 0x329   :  { %1115 = vmatpush1.bf16.msra.mxu1 %v5030_v58  ;;  %1156 = vmatpush1.bf16.msra.mxu0 %v5166_v16 }
 0x32a   :  { %1116 = vmatprep.subr.bf16.mxu1 %v5036_v59  ;;  %1157 = vmatprep.subr.bf16.mxu0 %v5172_v17 }
 0x32d   :  { %1117 = vmatpush1.bf16.msra.mxu1 %v5045_v60  ;;  %1158 = vmatpush1.bf16.msra.mxu0 %v5178_v18 }
 0x32e   :  { %1118 = vmatprep.subr.bf16.mxu1 %v5059_v63  ;;  %1159 = vmatprep.subr.bf16.mxu0 %v5184_v19 }
 0x331   :  { %1119 = vmatpush1.bf16.msra.mxu1 %v5067_v1  ;;  %1160 = vmatpush1.bf16.msra.mxu0 %v5190_v20 }
 0x332   :  { %1120 = vmatprep.subr.bf16.mxu1 %v5074_v2  ;;  %1161 = vmatprep.subr.bf16.mxu0 %v5196_v21 }
 0x335   :  { %1121 = vmatpush1.bf16.msra.mxu1 %v5082_v3  ;;  %1162 = vmatpush1.bf16.msra.mxu0 %v5202_v22 }
 0x336   :  { %1122 = vmatprep.subr.bf16.mxu1 %v5096_v6  ;;  %1163 = vmatprep.subr.bf16.mxu0 %v5208_v23 }
 0x339   :  { %1123 = vmatpush1.bf16.msra.mxu1 %v5104_v8  ;;  %1164 = vmatpush1.bf16.msra.mxu0 %v5214_v24 }
 0x33a   :  { %1124 = vmatprep.subr.bf16.mxu1 %v5110_v9  ;;  %1165 = vmatprep.subr.bf16.mxu0 %v5220_v25 }
 0x33d   :  { %1125 = vmatpush1.bf16.msra.mxu1 %v5119_v10  ;;  %1166 = vmatpush1.bf16.msra.mxu0 %v5226_v26 }
 0x33e   :  { %1222 = vmatprep.subr.bf16.mxu1 %v4988_v49  ;;  %1263 = vmatprep.subr.bf16.mxu0 %v5126_v11 }
 0x3f3   :  { %v1032_v42 = vpop.f32.mrb[24].mxu1  ;;  %v1073_v27 = vpop.f32.mrb[32].mxu0 }
 0x3f4   :  { %v1080_v57 = vadd.f32 %v1032_v42, %v5288_v38  ;;  %v1082_v37 = vadd.f32 %v1073_v27, %v5290_v39  ;;  %v1034_v43 = vpop.f32.mrb[25].mxu1  ;;  %v1075_v54 = vpop.f32.mrb[33].mxu0 }
 0x3f5   :  { %v1081_v32 = vadd.f32 %v1034_v43, %v5293_v47  ;;  %v1083_v29 = vadd.f32 %v1075_v54, %v5296_v48  ;;  %v1036_v5 = vpop.f32.mrb[26].mxu1  ;;  %v1077_v7 = vpop.f32.mrb[34].mxu0 }
 0x3f6   :  { %v3859_v30 = vmul.f32 -1.442695, %v1080_v57  ;;  %v1037_v45 = vpop.f32.mrb[27].mxu1  ;;  %v1078_v31 = vpop.f32.mrb[35].mxu0  ;;  %v6885_v7 = vld [vmem:[#allocation5_spill] sm:$0xff] }
 0x3f7   :  { %v3860_v28 = vmul.f32 -1.442695, %v1081_v32  ;;  %v3861_v40 = vmul.f32 -1.442695, %v1083_v29 }
 0x3f8   :  { %4513 = vpow2.f32 %v3859_v30 }
 0x3f9   :  { %4515 = vpow2.f32 %v3860_v28  ;;  %v6886_v28 = vld [vmem:[#allocation6_spill] sm:$0xff] }
 0x3fa   :  { %4517 = vpow2.f32 %v3861_v40 }
 0x3fb   :  { %4519 = vtanh.f32 %v1082_v37 }
 0x402   :  { %v4514_v46 = vpop.eup %4513 }
 0x403   :  { %v4516_v61 = vpop.eup %4515  ;;  %v1087_v38 = vadd.f32 1.0, %v4514_v46  ;;  %v6887_v46 = vld [vmem:[#allocation7_spill] sm:$0xff] }
 0x404   :  { %v1093_v39 = vadd.f32 1.0, %v4516_v61  ;;  %v4518_v47 = vpop.eup %4517 }
 0x405   :  { %4521 = vrcp.f32 %v1087_v38  ;;  %v4520_v34 = vpop.eup %4519  ;;  %v1100_v42 = vadd.f32 1.0, %v4518_v47 }
 0x406   :  { %4523 = vrcp.f32 %v1093_v39 }
 0x407   :  { %4525 = vrcp.f32 %v1100_v42 }
 0x40f   :  { %v4522_v48 = vpop.eup %4521 }
 0x410   :  { %v4524_v4 = vpop.eup %4523  ;;  %v1104_v50 = vmul.f32 %v4522_v48, %v4520_v34 }
 0x411   :  { %v1103_v27 = vmul.f32 %v4524_v4, %v5397_v55  ;;  %v4526_v43 = vpop.eup %4525 }
 0x413   :  { %v5443_v57 = vadd.f32 %v1104_v50, %v1103_v27 }
 0x415   :  { %4527 = vtanh.f32 %v5443_v57 }
 0x41f   :  { %v4528_v54 = vpop.eup %4527 }
 0x420   :  { %v5446_v32 = vmul.f32 %v4528_v54, %v4526_v43 }
 0x422   :  { %v1109_v37 = vpack.c.bf16 %v5446_v32, %v5446_v32 }
 0x424   :  { %1143 = vmatmul.mubr.bf16.vlgmr.msra.gmra.mrb[28].mxu1 %v1109_v37  ;;  %1184 = vmatmul.mubr.bf16.vlgmr.msra.gmra.mrb[36].mxu0 %v1109_v37 }
 0x425   :  { %1223 = vmatpush1.bf16.msra.mxu1 %v4993_v51  ;;  %1264 = vmatpush1.bf16.msra.mxu0 %v5136_v12 }
 0x426   :  { %1224 = vmatprep.subr.bf16.mxu1 %v4999_v52  ;;  %1265 = vmatprep.subr.bf16.mxu0 %v5142_v13 }
 0x427   :  { %1254 = vmatprep.mubr.bf16.mxu1 %v6884_v35  ;;  %1295 = vmatprep.mubr.bf16.mxu0 %v6884_v35 }
 0x429   :  { %1225 = vmatpush1.bf16.msra.mxu1 %v5008_v53  ;;  %1266 = vmatpush1.bf16.msra.mxu0 %v5151_v14 }
 0x42a   :  { %1226 = vmatprep.subr.bf16.mxu1 %v5022_v56  ;;  %1267 = vmatprep.subr.bf16.mxu0 %v5158_v15 }
 0x42d   :  { %1227 = vmatpush1.bf16.msra.mxu1 %v5030_v58  ;;  %1268 = vmatpush1.bf16.msra.mxu0 %v5166_v16 }
 0x42e   :  { %1228 = vmatprep.subr.bf16.mxu1 %v5036_v59  ;;  %1269 = vmatprep.subr.bf16.mxu0 %v5172_v17 }
 0x431   :  { %1229 = vmatpush1.bf16.msra.mxu1 %v5045_v60  ;;  %1270 = vmatpush1.bf16.msra.mxu0 %v5178_v18 }
 0x432   :  { %1230 = vmatprep.subr.bf16.mxu1 %v5059_v63  ;;  %1271 = vmatprep.subr.bf16.mxu0 %v5184_v19 }
 0x435   :  { %1231 = vmatpush1.bf16.msra.mxu1 %v5067_v1  ;;  %1272 = vmatpush1.bf16.msra.mxu0 %v5190_v20 }
 0x436   :  { %1232 = vmatprep.subr.bf16.mxu1 %v5074_v2  ;;  %1273 = vmatprep.subr.bf16.mxu0 %v5196_v21 }
 0x439   :  { %1233 = vmatpush1.bf16.msra.mxu1 %v5082_v3  ;;  %1274 = vmatpush1.bf16.msra.mxu0 %v5202_v22 }
 0x43a   :  { %1234 = vmatprep.subr.bf16.mxu1 %v5096_v6  ;;  %1275 = vmatprep.subr.bf16.mxu0 %v5208_v23 }
 0x43d   :  { %1235 = vmatpush1.bf16.msra.mxu1 %v5104_v8  ;;  %1276 = vmatpush1.bf16.msra.mxu0 %v5214_v24 }
 0x43e   :  { %1236 = vmatprep.subr.bf16.mxu1 %v5110_v9  ;;  %1277 = vmatprep.subr.bf16.mxu0 %v5220_v25 }
 0x441   :  { %1237 = vmatpush1.bf16.msra.mxu1 %v5119_v10  ;;  %1278 = vmatpush1.bf16.msra.mxu0 %v5226_v26 }
 0x442   :  { %1334 = vmatprep.subr.bf16.mxu1 %v4988_v49  ;;  %1375 = vmatprep.subr.bf16.mxu0 %v5126_v11 }
 0x4f7   :  { %v1144_v55 = vpop.f32.mrb[28].mxu1  ;;  %v1185_v29 = vpop.f32.mrb[36].mxu0 }
 0x4f8   :  { %v1192_v5 = vadd.f32 %v1144_v55, %v5298_v0  ;;  %v1194_v30 = vadd.f32 %v1185_v29, %v6885_v7  ;;  %v1146_v45 = vpop.f32.mrb[29].mxu1  ;;  %v1187_v31 = vpop.f32.mrb[37].mxu0 }
 0x4f9   :  { %v1193_v40 = vadd.f32 %v1146_v45, %v6886_v28  ;;  %v1195_v61 = vadd.f32 %v1187_v31, %v6887_v46  ;;  %v1148_v38 = vpop.f32.mrb[30].mxu1  ;;  %v1189_v39 = vpop.f32.mrb[38].mxu0 }
 0x4fa   :  { %v3862_v47 = vmul.f32 -1.442695, %v1192_v5  ;;  %v1149_v34 = vpop.f32.mrb[31].mxu1  ;;  %v1190_v48 = vpop.f32.mrb[39].mxu0 }
 0x4fb   :  { %v3863_v49 = vmul.f32 -1.442695, %v1193_v40  ;;  %v3864_v4 = vmul.f32 -1.442695, %v1195_v61 }
 0x4fc   :  { %4529 = vpow2.f32 %v3862_v47 }
 0x4fd   :  { %4531 = vpow2.f32 %v3863_v49 }
 0x4fe   :  { %4533 = vpow2.f32 %v3864_v4 }
 0x4ff   :  { %4535 = vtanh.f32 %v1194_v30 }
 0x506   :  { %v4530_v50 = vpop.eup %4529 }
 0x507   :  { %v4532_v42 = vpop.eup %4531  ;;  %v1199_v0 = vadd.f32 1.0, %v4530_v50 }
 0x508   :  { %v1205_v27 = vadd.f32 1.0, %v4532_v42  ;;  %v4534_v43 = vpop.eup %4533 }
 0x509   :  { %4537 = vrcp.f32 %v1199_v0  ;;  %v4536_v54 = vpop.eup %4535  ;;  %v1212_v5 = vadd.f32 1.0, %v4534_v43 }
 0x50a   :  { %4539 = vrcp.f32 %v1205_v27 }
 0x50b   :  { %4541 = vrcp.f32 %v1212_v5 }
 0x513   :  { %v4538_v37 = vpop.eup %4537 }
 0x514   :  { %v4540_v55 = vpop.eup %4539  ;;  %v1216_v29 = vmul.f32 %v4538_v37, %v4536_v54 }
 0x515   :  { %v1215_v7 = vmul.f32 %v4540_v55, %v5443_v57  ;;  %v4542_v31 = vpop.eup %4541 }
 0x517   :  { %v5489_v45 = vadd.f32 %v1216_v29, %v1215_v7  ;;  %v5550_v7 = vld [vmem:[%s6847_s7] ss:$16 sps:$4 sm:$0xff]  }
 0x519   :  { %4543 = vtanh.f32 %v5489_v45 }
 0x523   :  { %v4544_v28 = vpop.eup %4543 }
 0x524   :  { %v5492_v40 = vmul.f32 %v4544_v28, %v4542_v31  ;;  %v5566_v31 = vld [vmem:[%s6847_s7 + $0x20] ss:$16 sps:$4 sm:$0xff]  }
 0x526   :  { %v1221_v30 = vpack.c.bf16 %v5492_v40, %v5492_v40 }
 0x528   :  { %1255 = vmatmul.mubr.bf16.vlgmr.msra.gmra.mrb[32].mxu1 %v1221_v30  ;;  %1296 = vmatmul.mubr.bf16.vlgmr.msra.gmra.mrb[40].mxu0 %v1221_v30 }
 0x529   :  { %1335 = vmatpush1.bf16.msra.mxu1 %v4993_v51  ;;  %1376 = vmatpush1.bf16.msra.mxu0 %v5136_v12  ;;  %v5531_v51 = vld [vmem:[%s6847_s7 + $0x4] ss:$16 sps:$4 sm:$0xff]  }
 0x52a   :  { %1336 = vmatprep.subr.bf16.mxu1 %v4999_v52  ;;  %1377 = vmatprep.subr.bf16.mxu0 %v5142_v13 }
 0x52b   :  { %1366 = vmatprep.mubr.bf16.mxu1 %v6884_v35  ;;  %1407 = vmatprep.mubr.bf16.mxu0 %v6884_v35 }
 0x52d   :  { %1337 = vmatpush1.bf16.msra.mxu1 %v5008_v53  ;;  %1378 = vmatpush1.bf16.msra.mxu0 %v5151_v14 }
 0x52e   :  { %1338 = vmatprep.subr.bf16.mxu1 %v5022_v56  ;;  %1379 = vmatprep.subr.bf16.mxu0 %v5158_v15  ;;  %v6888_v56 = vld [vmem:[#allocation8_spill] sm:$0xff] }
 0x531   :  { %1339 = vmatpush1.bf16.msra.mxu1 %v5030_v58  ;;  %1380 = vmatpush1.bf16.msra.mxu0 %v5166_v16 }
 0x532   :  { %1340 = vmatprep.subr.bf16.mxu1 %v5036_v59  ;;  %1381 = vmatprep.subr.bf16.mxu0 %v5172_v17  ;;  %v6889_v59 = vld [vmem:[#allocation9_spill] sm:$0xff] }
 0x535   :  { %1341 = vmatpush1.bf16.msra.mxu1 %v5045_v60  ;;  %1382 = vmatpush1.bf16.msra.mxu0 %v5178_v18 }
 0x536   :  { %1342 = vmatprep.subr.bf16.mxu1 %v5059_v63  ;;  %1383 = vmatprep.subr.bf16.mxu0 %v5184_v19 }
 0x539   :  { %1343 = vmatpush1.bf16.msra.mxu1 %v5067_v1  ;;  %1384 = vmatpush1.bf16.msra.mxu0 %v5190_v20 }
 0x53a   :  { %1344 = vmatprep.subr.bf16.mxu1 %v5074_v2  ;;  %1385 = vmatprep.subr.bf16.mxu0 %v5196_v21  ;;  %v6890_v2 = vld [vmem:[#allocation10_spill] sm:$0xff] }
 0x53d   :  { %1345 = vmatpush1.bf16.msra.mxu1 %v5082_v3  ;;  %1386 = vmatpush1.bf16.msra.mxu0 %v5202_v22 }
 0x53e   :  { %1346 = vmatprep.subr.bf16.mxu1 %v5096_v6  ;;  %1387 = vmatprep.subr.bf16.mxu0 %v5208_v23  ;;  %v6891_v6 = vld [vmem:[#allocation11_spill] sm:$0xff] }
 0x541   :  { %1347 = vmatpush1.bf16.msra.mxu1 %v5104_v8  ;;  %1388 = vmatpush1.bf16.msra.mxu0 %v5214_v24 }
 0x542   :  { %1348 = vmatprep.subr.bf16.mxu1 %v5110_v9  ;;  %1389 = vmatprep.subr.bf16.mxu0 %v5220_v25 }
 0x545   :  { %1349 = vmatpush1.bf16.msra.mxu1 %v5119_v10  ;;  %1390 = vmatpush1.bf16.msra.mxu0 %v5226_v26 }
 0x546   :  { %1446 = vmatprep.subr.bf16.mxu1 %v5531_v51  ;;  %1487 = vmatprep.subr.bf16.mxu0 %v5126_v11 }
 0x5fb   :  { %v1256_v52 = vpop.f32.mrb[32].mxu1  ;;  %v1297_v53 = vpop.f32.mrb[40].mxu0 }
 0x5fc   :  { %v1304_v58 = vadd.f32 %v1256_v52, %v6888_v56  ;;  %v1306_v60 = vadd.f32 %v1297_v53, %v6889_v59  ;;  %v1258_v63 = vpop.f32.mrb[33].mxu1  ;;  %v1299_v1 = vpop.f32.mrb[41].mxu0  ;;  %v6892_v52 = vld [vmem:[#allocation12_spill] sm:$0xff]  ;;  %v6893_v53 = vld [vmem:[#allocation13_spill] sm:$0xff] }
 0x5fd   :  { %v1305_v3 = vadd.f32 %v1258_v63, %v6890_v2  ;;  %v1307_v8 = vadd.f32 %v1299_v1, %v6891_v6  ;;  %v1260_v9 = vpop.f32.mrb[34].mxu1  ;;  %v1301_v10 = vpop.f32.mrb[42].mxu0  ;;  %v6895_v1 = vld [vmem:[#allocation15_spill] sm:$0xff] }
 0x5fe   :  { %v3865_v57 = vmul.f32 -1.442695, %v1304_v58  ;;  %v1261_v46 = vpop.f32.mrb[35].mxu1  ;;  %v1302_v61 = vpop.f32.mrb[43].mxu0 }
 0x5ff   :  { %v3866_v38 = vmul.f32 -1.442695, %v1305_v3  ;;  %v3867_v11 = vmul.f32 -1.442695, %v1307_v8 }
 0x600   :  { %4545 = vpow2.f32 %v3865_v57 }
 0x601   :  { %4547 = vpow2.f32 %v3866_v38 }
 0x602   :  { %4549 = vpow2.f32 %v3867_v11 }
 0x603   :  { %4551 = vtanh.f32 %v1306_v60  ;;  %v6894_v60 = vld [vmem:[#allocation14_spill] sm:$0xff] }
 0x60a   :  { %v4546_v39 = vpop.eup %4545 }
 0x60b   :  { %v4548_v47 = vpop.eup %4547  ;;  %v1311_v34 = vadd.f32 1.0, %v4546_v39 }
 0x60c   :  { %v1317_v48 = vadd.f32 1.0, %v4548_v47  ;;  %v4550_v49 = vpop.eup %4549 }
 0x60d   :  { %4553 = vrcp.f32 %v1311_v34  ;;  %v4552_v4 = vpop.eup %4551  ;;  %v1324_v27 = vadd.f32 1.0, %v4550_v49 }
 0x60e   :  { %4555 = vrcp.f32 %v1317_v48 }
 0x60f   :  { %4557 = vrcp.f32 %v1324_v27 }
 0x617   :  { %v4554_v50 = vpop.eup %4553 }
 0x618   :  { %v4556_v42 = vpop.eup %4555  ;;  %v1328_v0 = vmul.f32 %v4554_v50, %v4552_v4 }
 0x619   :  { %v1327_v43 = vmul.f32 %v4556_v42, %v5489_v45  ;;  %v4558_v37 = vpop.eup %4557  ;;  %v5557_v45 = vld [vmem:[%s6847_s7 + $0x24] ss:$16 sps:$4 sm:$0xff]  }
 0x61b   :  { %v5540_v54 = vadd.f32 %v1328_v0, %v1327_v43 }
 0x61d   :  { %4559 = vtanh.f32 %v5540_v54 }
 0x627   :  { %v4560_v55 = vpop.eup %4559 }
 0x628   :  { %v5543_v29 = vmul.f32 %v4560_v55, %v4558_v37  ;;  %v4755_v37 = vld [vmem:[%s6847_s7 + $0x2c] ss:$16 sps:$4 sm:$0xff]   ;;  %v4756_v55 = vld [vmem:[%s6847_s7 + $0x28] ss:$16 sps:$4 sm:$0xff]  }
 0x62a   :  { %v1333_v5 = vpack.c.bf16 %v5543_v29, %v5543_v29 }
 0x62c   :  { %1367 = vmatmul.mubr.bf16.vlgmr.msra.gmra.mrb[36].mxu1 %v1333_v5  ;;  %1408 = vmatmul.mubr.bf16.vlgmr.msra.gmra.mrb[44].mxu0 %v1333_v5  ;;  %v4757_v5 = vld [vmem:[%s6847_s7 + $0x4c] ss:$16 sps:$4 sm:$0xff]  }
 0x62d   :  { %1447 = vmatpush1.bf16.msra.mxu1 %v5550_v7  ;;  %1488 = vmatpush1.bf16.msra.mxu0 %v5136_v12  ;;  %v5573_v12 = vld [vmem:[%s6847_s7 + $0x44] ss:$16 sps:$4 sm:$0xff]  }
 0x62e   :  { %1448 = vmatprep.subr.bf16.mxu1 %v5557_v45  ;;  %1489 = vmatprep.subr.bf16.mxu0 %v5142_v13  ;;  %v5580_v13 = vld [vmem:[%s6847_s7 + $0x40] ss:$16 sps:$4 sm:$0xff]  }
 0x62f   :  { %1478 = vmatprep.mubr.bf16.mxu1 %v6884_v35  ;;  %1519 = vmatprep.mubr.bf16.mxu0 %v6884_v35 }
 0x631   :  { %1449 = vmatpush1.bf16.msra.mxu1 %v5566_v31  ;;  %1490 = vmatpush1.bf16.msra.mxu0 %v5151_v14  ;;  %v5587_v14 = vld [vmem:[%s6847_s7 + $0x64] ss:$16 sps:$4 sm:$0xff]  }
 0x632   :  { %1450 = vmatprep.subr.bf16.mxu1 %v5573_v12  ;;  %1491 = vmatprep.subr.bf16.mxu0 %v5158_v15  ;;  %v5594_v15 = vld [vmem:[%s6847_s7 + $0x60] ss:$16 sps:$4 sm:$0xff]  }
 0x635   :  { %1451 = vmatpush1.bf16.msra.mxu1 %v5580_v13  ;;  %1492 = vmatpush1.bf16.msra.mxu0 %v5166_v16  ;;  %v5601_v16 = vld [vmem:[%s6847_s7 + $0x84] ss:$16 sps:$4 sm:$0xff]  }
 0x636   :  { %1452 = vmatprep.subr.bf16.mxu1 %v5587_v14  ;;  %1493 = vmatprep.subr.bf16.mxu0 %v5172_v17  ;;  %v5608_v17 = vld [vmem:[%s6847_s7 + $0x80] ss:$16 sps:$4 sm:$0xff]  }
 0x639   :  { %1453 = vmatpush1.bf16.msra.mxu1 %v5594_v15  ;;  %1494 = vmatpush1.bf16.msra.mxu0 %v5178_v18  ;;  %v5615_v18 = vld [vmem:[%s6847_s7 + $0xa4] ss:$16 sps:$4 sm:$0xff]  }
 0x63a   :  { %1454 = vmatprep.subr.bf16.mxu1 %v5601_v16  ;;  %1495 = vmatprep.subr.bf16.mxu0 %v5184_v19  ;;  %v5622_v19 = vld [vmem:[%s6847_s7 + $0xa0] ss:$16 sps:$4 sm:$0xff]  }
 0x63d   :  { %1455 = vmatpush1.bf16.msra.mxu1 %v5608_v17  ;;  %1496 = vmatpush1.bf16.msra.mxu0 %v5190_v20  ;;  %v5629_v20 = vld [vmem:[%s6847_s7 + $0xc4] ss:$16 sps:$4 sm:$0xff]  }
 0x63e   :  { %1456 = vmatprep.subr.bf16.mxu1 %v5615_v18  ;;  %1497 = vmatprep.subr.bf16.mxu0 %v5196_v21  ;;  %v5636_v21 = vld [vmem:[%s6847_s7 + $0xc0] ss:$16 sps:$4 sm:$0xff]  }
 0x641   :  { %1457 = vmatpush1.bf16.msra.mxu1 %v5622_v19  ;;  %1498 = vmatpush1.bf16.msra.mxu0 %v5202_v22  ;;  %v5643_v22 = vld [vmem:[%s6847_s7 + $0xe4] ss:$16 sps:$4 sm:$0xff]  }
 0x642   :  { %1458 = vmatprep.subr.bf16.mxu1 %v5629_v20  ;;  %1499 = vmatprep.subr.bf16.mxu0 %v5208_v23  ;;  %v5650_v23 = vld [vmem:[%s6847_s7 + $0xe0] ss:$16 sps:$4 sm:$0xff]  }
 0x645   :  { %1459 = vmatpush1.bf16.msra.mxu1 %v5636_v21  ;;  %1500 = vmatpush1.bf16.msra.mxu0 %v5214_v24  ;;  %v4753_v24 = vld [vmem:[%s6847_s7 + $0xc] ss:$16 sps:$4 sm:$0xff]  }
 0x646   :  { %1460 = vmatprep.subr.bf16.mxu1 %v5643_v22  ;;  %1501 = vmatprep.subr.bf16.mxu0 %v5220_v25 }
 0x649   :  { %1461 = vmatpush1.bf16.msra.mxu1 %v5650_v23  ;;  %1502 = vmatpush1.bf16.msra.mxu0 %v5226_v26 }
 0x64a   :  { %1558 = vmatprep.subr.bf16.mxu1 %v5531_v51  ;;  %1599 = vmatprep.subr.bf16.mxu0 %v4753_v24  ;;  %v6896_v24 = vld [vmem:[#allocation16_spill] sm:$0xff] }
 0x6ff   :  { %v1368_v28 = vpop.f32.mrb[36].mxu1  ;;  %v1409_v30 = vpop.f32.mrb[44].mxu0 }
 0x700   :  { %v1416_v25 = vadd.f32 %v1368_v28, %v6892_v52  ;;  %v1418_v56 = vadd.f32 %v1409_v30, %v6893_v53  ;;  %v1370_v58 = vpop.f32.mrb[37].mxu1  ;;  %v1411_v59 = vpop.f32.mrb[45].mxu0  ;;  %v6897_v30 = vld [vmem:[#allocation17_spill] sm:$0xff]  ;;  %v6898_v53 = vld [vmem:[#allocation18_spill] sm:$0xff] }
 0x701   :  { %v1417_v63 = vadd.f32 %v1370_v58, %v6894_v60  ;;  %v1419_v2 = vadd.f32 %v1411_v59, %v6895_v1  ;;  %v1372_v26 = vpop.f32.mrb[38].mxu1  ;;  %v1413_v3 = vpop.f32.mrb[46].mxu0  ;;  %v6899_v58 = vld [vmem:[#allocation19_spill] sm:$0xff] }
 0x702   :  { %v3868_v51 = vmul.f32 -1.442695, %v1416_v25  ;;  %v1373_v6 = vpop.f32.mrb[39].mxu1  ;;  %v1414_v8 = vpop.f32.mrb[47].mxu0 }
 0x703   :  { %v3869_v9 = vmul.f32 -1.442695, %v1417_v63  ;;  %v3870_v10 = vmul.f32 -1.442695, %v1419_v2 }
 0x704   :  { %4561 = vpow2.f32 %v3868_v51 }
 0x705   :  { %4563 = vpow2.f32 %v3869_v9 }
 0x706   :  { %4565 = vpow2.f32 %v3870_v10 }
 0x707   :  { %4567 = vtanh.f32 %v1418_v56 }
 0x70e   :  { %v4562_v57 = vpop.eup %4561 }
 0x70f   :  { %v4564_v46 = vpop.eup %4563  ;;  %v1423_v61 = vadd.f32 1.0, %v4562_v57 }
 0x710   :  { %v1429_v38 = vadd.f32 1.0, %v4564_v46  ;;  %v4566_v11 = vpop.eup %4565 }
 0x711   :  { %4569 = vrcp.f32 %v1423_v61  ;;  %v4568_v39 = vpop.eup %4567  ;;  %v1436_v49 = vadd.f32 1.0, %v4566_v11 }
 0x712   :  { %4571 = vrcp.f32 %v1429_v38 }
 0x713   :  { %4573 = vrcp.f32 %v1436_v49 }
 0x71b   :  { %v4570_v47 = vpop.eup %4569 }
 0x71c   :  { %v4572_v34 = vpop.eup %4571  ;;  %v1440_v48 = vmul.f32 %v4570_v47, %v4568_v39 }
 0x71d   :  { %v1439_v4 = vmul.f32 %v4572_v34, %v5540_v54  ;;  %v4574_v42 = vpop.eup %4573  ;;  %v4754_v54 = vld [vmem:[%s6847_s7 + $0x8] ss:$16 sps:$4 sm:$0xff]  }
 0x71f   :  { %v5663_v50 = vadd.f32 %v1440_v48, %v1439_v4 }
 0x721   :  { %4575 = vtanh.f32 %v5663_v50 }
 0x72b   :  { %v4576_v0 = vpop.eup %4575 }
 0x72c   :  { %v5666_v27 = vmul.f32 %v4576_v0, %v4574_v42  ;;  %v4337_v42 = vld [vmem:[%s6851_s9] ss:$16 sps:$4 sm:$0xff]   ;;  %v4340_v0 = vld [vmem:[%s6851_s9 + $0x8] ss:$16 sps:$4 sm:$0xff]  }
 0x72e   :  { %v1445_v43 = vpack.c.bf16 %v5666_v27, %v5666_v27 }
 0x730   :  { %1479 = vmatmul.mubr.bf16.vlgmr.msra.gmra.mrb[40].mxu1 %v1445_v43  ;;  %1520 = vmatmul.mubr.bf16.vlgmr.msra.gmra.mrb[48].mxu0 %v1445_v43  ;;  %v4342_v43 = vld [vmem:[%s6851_s9 + $0xc] ss:$16 sps:$4 sm:$0xff]  }
 0x731   :  { %1559 = vmatpush1.bf16.msra.mxu1 %v5550_v7  ;;  %1600 = vmatpush1.bf16.msra.mxu0 %v4754_v54  ;;  %v4758_v7 = vld [vmem:[%s6847_s7 + $0x48] ss:$16 sps:$4 sm:$0xff]   ;;  %v4345_v54 = vld [vmem:[%s6851_s9 + $0x24] ss:$16 sps:$4 sm:$0xff]  }
 0x732   :  { %1560 = vmatprep.subr.bf16.mxu1 %v5557_v45  ;;  %1601 = vmatprep.subr.bf16.mxu0 %v4755_v37  ;;  %v4759_v45 = vld [vmem:[%s6847_s7 + $0x6c] ss:$16 sps:$4 sm:$0xff]  }
 0x733   :  { %1590 = vmatprep.mubr.bf16.mxu1 %v6884_v35  ;;  %1631 = vmatprep.mubr.bf16.mxu0 %v6884_v35  ;;  %v4348_v37 = vld [vmem:[%s6851_s9 + $0x2c] ss:$16 sps:$4 sm:$0xff]  }
 0x735   :  { %1561 = vmatpush1.bf16.msra.mxu1 %v5566_v31  ;;  %1602 = vmatpush1.bf16.msra.mxu0 %v4756_v55  ;;  %v4760_v31 = vld [vmem:[%s6847_s7 + $0x68] ss:$16 sps:$4 sm:$0xff]   ;;  %v4343_v55 = vld [vmem:[%s6851_s9 + $0x20] ss:$16 sps:$4 sm:$0xff]  }
 0x736   :  { %1562 = vmatprep.subr.bf16.mxu1 %v5573_v12  ;;  %1603 = vmatprep.subr.bf16.mxu0 %v4757_v5  ;;  %v4761_v12 = vld [vmem:[%s6847_s7 + $0x8c] ss:$16 sps:$4 sm:$0xff]   ;;  %v4346_v5 = vld [vmem:[%s6851_s9 + $0x28] ss:$16 sps:$4 sm:$0xff]  }
 0x739   :  { %1563 = vmatpush1.bf16.msra.mxu1 %v5580_v13  ;;  %1604 = vmatpush1.bf16.msra.mxu0 %v4758_v7  ;;  %v4762_v13 = vld [vmem:[%s6847_s7 + $0x88] ss:$16 sps:$4 sm:$0xff]   ;;  %v4351_v7 = vld [vmem:[%s6851_s9 + $0x44] ss:$16 sps:$4 sm:$0xff]  }
 0x73a   :  { %1564 = vmatprep.subr.bf16.mxu1 %v5587_v14  ;;  %1605 = vmatprep.subr.bf16.mxu0 %v4759_v45  ;;  %v4763_v14 = vld [vmem:[%s6847_s7 + $0xac] ss:$16 sps:$4 sm:$0xff]  }
 0x73b   :  { %v4354_v45 = vld [vmem:[%s6851_s9 + $0x4c] ss:$16 sps:$4 sm:$0xff]  }
 0x73d   :  { %1565 = vmatpush1.bf16.msra.mxu1 %v5594_v15  ;;  %1606 = vmatpush1.bf16.msra.mxu0 %v4760_v31  ;;  %v4764_v15 = vld [vmem:[%s6847_s7 + $0xa8] ss:$16 sps:$4 sm:$0xff]   ;;  %v4349_v31 = vld [vmem:[%s6851_s9 + $0x40] ss:$16 sps:$4 sm:$0xff]  }
 0x73e   :  { %1566 = vmatprep.subr.bf16.mxu1 %v5601_v16  ;;  %1607 = vmatprep.subr.bf16.mxu0 %v4761_v12  ;;  %v4765_v16 = vld [vmem:[%s6847_s7 + $0xcc] ss:$16 sps:$4 sm:$0xff]   ;;  %v4352_v12 = vld [vmem:[%s6851_s9 + $0x48] ss:$16 sps:$4 sm:$0xff]  }
 0x741   :  { %1567 = vmatpush1.bf16.msra.mxu1 %v5608_v17  ;;  %1608 = vmatpush1.bf16.msra.mxu0 %v4762_v13  ;;  %v4766_v17 = vld [vmem:[%s6847_s7 + $0xc8] ss:$16 sps:$4 sm:$0xff]   ;;  %v4357_v13 = vld [vmem:[%s6851_s9 + $0x64] ss:$16 sps:$4 sm:$0xff]  }
 0x742   :  { %1568 = vmatprep.subr.bf16.mxu1 %v5615_v18  ;;  %1609 = vmatprep.subr.bf16.mxu0 %v4763_v14  ;;  %v4767_v18 = vld [vmem:[%s6847_s7 + $0xec] ss:$16 sps:$4 sm:$0xff]  }
 0x743   :  { %v4360_v14 = vld [vmem:[%s6851_s9 + $0x6c] ss:$16 sps:$4 sm:$0xff]  }
 0x745   :  { %1569 = vmatpush1.bf16.msra.mxu1 %v5622_v19  ;;  %1610 = vmatpush1.bf16.msra.mxu0 %v4764_v15  ;;  %v4768_v19 = vld [vmem:[%s6847_s7 + $0xe8] ss:$16 sps:$4 sm:$0xff]   ;;  %v4355_v15 = vld [vmem:[%s6851_s9 + $0x60] ss:$16 sps:$4 sm:$0xff]  }
 0x746   :  { %1570 = vmatprep.subr.bf16.mxu1 %v5629_v20  ;;  %1611 = vmatprep.subr.bf16.mxu0 %v4765_v16  ;;  %v4358_v16 = vld [vmem:[%s6851_s9 + $0x68] ss:$16 sps:$4 sm:$0xff]  }
 0x749   :  { %1571 = vmatpush1.bf16.msra.mxu1 %v5636_v21  ;;  %1612 = vmatpush1.bf16.msra.mxu0 %v4766_v17  ;;  %v4363_v17 = vld [vmem:[%s6851_s9 + $0x84] ss:$16 sps:$4 sm:$0xff]  }
 0x74a   :  { %1572 = vmatprep.subr.bf16.mxu1 %v5643_v22  ;;  %1613 = vmatprep.subr.bf16.mxu0 %v4767_v18  ;;  %v4366_v18 = vld [vmem:[%s6851_s9 + $0x8c] ss:$16 sps:$4 sm:$0xff]  }
 0x74d   :  { %1573 = vmatpush1.bf16.msra.mxu1 %v5650_v23  ;;  %1614 = vmatpush1.bf16.msra.mxu0 %v4768_v19  ;;  %v4361_v19 = vld [vmem:[%s6851_s9 + $0x80] ss:$16 sps:$4 sm:$0xff]  }
 0x74e   :  { %1982 = vmatprep.subr.bf16.mxu0 %v4342_v43 }
 0x803   :  { %v1480_v20 = vpop.f32.mrb[40].mxu1  ;;  %v1521_v21 = vpop.f32.mrb[48].mxu0 }
 0x804   :  { %v1528_v28 = vadd.f32 %v1480_v20, %v6896_v24  ;;  %v1530_v52 = vadd.f32 %v1521_v21, %v6897_v30  ;;  %v1482_v25 = vpop.f32.mrb[41].mxu1  ;;  %v1523_v22 = vpop.f32.mrb[49].mxu0  ;;  %v4364_v20 = vld [vmem:[%s6851_s9 + $0x88] ss:$16 sps:$4 sm:$0xff]   ;;  %v4369_v21 = vld [vmem:[%s6851_s9 + $0xa4] ss:$16 sps:$4 sm:$0xff]  }
 0x805   :  { %v1529_v56 = vadd.f32 %v1482_v25, %v6898_v53  ;;  %v1531_v59 = vadd.f32 %v1523_v22, %v6899_v58  ;;  %v1484_v60 = vpop.f32.mrb[42].mxu1  ;;  %v1525_v63 = vpop.f32.mrb[50].mxu0  ;;  %v4367_v24 = vld [vmem:[%s6851_s9 + $0xa0] ss:$16 sps:$4 sm:$0xff]   ;;  %v4375_v30 = vld [vmem:[%s6851_s9 + $0xc4] ss:$16 sps:$4 sm:$0xff]  }
 0x806   :  { %v3871_v23 = vmul.f32 -1.442695, %v1528_v28  ;;  %v1485_v1 = vpop.f32.mrb[43].mxu1  ;;  %v1526_v2 = vpop.f32.mrb[51].mxu0  ;;  %v4372_v28 = vld [vmem:[%s6851_s9 + $0xac] ss:$16 sps:$4 sm:$0xff]  }
 0x807   :  { %v3872_v26 = vmul.f32 -1.442695, %v1529_v56  ;;  %v3873_v3 = vmul.f32 -1.442695, %v1531_v59  ;;  %v4373_v25 = vld [vmem:[%s6851_s9 + $0xc0] ss:$16 sps:$4 sm:$0xff]  }
 0x808   :  { %4577 = vpow2.f32 %v3871_v23  ;;  %v4378_v22 = vld [vmem:[%s6851_s9 + $0xcc] ss:$16 sps:$4 sm:$0xff]   ;;  %v4376_v53 = vld [vmem:[%s6851_s9 + $0xc8] ss:$16 sps:$4 sm:$0xff]   ;;  %v4381_v56 = vld [vmem:[%s6851_s9 + $0xe4] ss:$16 sps:$4 sm:$0xff]  }
 0x809   :  { %4579 = vpow2.f32 %v3872_v26  ;;  %v4384_v58 = vld [vmem:[%s6851_s9 + $0xec] ss:$16 sps:$4 sm:$0xff]   ;;  %v4379_v59 = vld [vmem:[%s6851_s9 + $0xe0] ss:$16 sps:$4 sm:$0xff]   ;;  %v4387_v60 = vld [vmem:[%s6852_s8 + $0x4] ss:$16 sps:$4 sm:$0xff]  }
 0x80a   :  { %4581 = vpow2.f32 %v3873_v3  ;;  %v4382_v63 = vld [vmem:[%s6851_s9 + $0xe8] ss:$16 sps:$4 sm:$0xff]   ;;  %v4390_v23 = vld [vmem:[%s6852_s8 + $0xc] ss:$16 sps:$4 sm:$0xff]   ;;  %v6900_v3 = vld [vmem:[#allocation20_spill] sm:$0xff] }
 0x80b   :  { %4583 = vtanh.f32 %v1530_v52  ;;  %v4370_v52 = vld [vmem:[%s6851_s9 + $0xa8] ss:$16 sps:$4 sm:$0xff]  }
 0x812   :  { %v4578_v51 = vpop.eup %4577 }
 0x813   :  { %v4580_v6 = vpop.eup %4579  ;;  %v1535_v8 = vadd.f32 1.0, %v4578_v51 }
 0x814   :  { %v1541_v9 = vadd.f32 1.0, %v4580_v6  ;;  %v4582_v10 = vpop.eup %4581 }
 0x815   :  { %4585 = vrcp.f32 %v1535_v8  ;;  %v4584_v57 = vpop.eup %4583  ;;  %v1548_v11 = vadd.f32 1.0, %v4582_v10 }
 0x816   :  { %4587 = vrcp.f32 %v1541_v9 }
 0x817   :  { %4589 = vrcp.f32 %v1548_v11 }
 0x81f   :  { %v4586_v46 = vpop.eup %4585 }
 0x820   :  { %v4588_v61 = vpop.eup %4587  ;;  %v1552_v38 = vmul.f32 %v4586_v46, %v4584_v57 }
 0x821   :  { %v1551_v39 = vmul.f32 %v4588_v61, %v5663_v50  ;;  %v4590_v34 = vpop.eup %4589  ;;  %v4339_v50 = vld [vmem:[%s6851_s9 + $0x4] ss:$16 sps:$4 sm:$0xff]  }
 0x822   :  { %1909 = vmatprep.subr.bf16.mxu1 %v4339_v50 }
 0x823   :  { %v5737_v47 = vadd.f32 %v1552_v38, %v1551_v39 }
 0x825   :  { %4591 = vtanh.f32 %v5737_v47 }
 0x82f   :  { %v4592_v48 = vpop.eup %4591 }
 0x830   :  { %v5740_v49 = vmul.f32 %v4592_v48, %v4590_v34 }
 0x832   :  { %v1557_v4 = vpack.c.bf16 %v5740_v49, %v5740_v49 }
 0x834   :  { %1591 = vmatmul.mubr.bf16.vlgmr.msra.gmra.mrb[44].mxu1 %v1557_v4  ;;  %1632 = vmatmul.mubr.bf16.vlgmr.msra.gmra.mrb[52].mxu0 %v1557_v4 }
 0x835   :  { %1941 = vmatprep.mubr.bf16.mxu1 %v6884_v35  ;;  %2014 = vmatprep.mubr.bf16.mxu0 %v6884_v35 }
 0x836   :  { %1910 = vmatpush1.bf16.msra.mxu1 %v4337_v42  ;;  %1983 = vmatpush1.bf16.msra.mxu0 %v4340_v0 }
 0x837   :  { %1911 = vmatprep.subr.bf16.mxu1 %v4345_v54  ;;  %1984 = vmatprep.subr.bf16.mxu0 %v4348_v37 }
 0x83a   :  { %1912 = vmatpush1.bf16.msra.mxu1 %v4343_v55  ;;  %1985 = vmatpush1.bf16.msra.mxu0 %v4346_v5 }
 0x83b   :  { %1913 = vmatprep.subr.bf16.mxu1 %v4351_v7  ;;  %1986 = vmatprep.subr.bf16.mxu0 %v4354_v45 }
 0x83e   :  { %1914 = vmatpush1.bf16.msra.mxu1 %v4349_v31  ;;  %1987 = vmatpush1.bf16.msra.mxu0 %v4352_v12  ;;  %v4385_v31 = vld [vmem:[%s6852_s8] ss:$16 sps:$4 sm:$0xff]   ;;  %v4388_v12 = vld [vmem:[%s6852_s8 + $0x8] ss:$16 sps:$4 sm:$0xff]  }
 0x83f   :  { %1915 = vmatprep.subr.bf16.mxu1 %v4357_v13  ;;  %1988 = vmatprep.subr.bf16.mxu0 %v4360_v14  ;;  %v4396_v14 = vld [vmem:[%s6852_s8 + $0x2c] ss:$16 sps:$4 sm:$0xff]  }
 0x842   :  { %1916 = vmatpush1.bf16.msra.mxu1 %v4355_v15  ;;  %1989 = vmatpush1.bf16.msra.mxu0 %v4358_v16  ;;  %v4391_v15 = vld [vmem:[%s6852_s8 + $0x20] ss:$16 sps:$4 sm:$0xff]   ;;  %v4394_v16 = vld [vmem:[%s6852_s8 + $0x28] ss:$16 sps:$4 sm:$0xff]  }
 0x843   :  { %1917 = vmatprep.subr.bf16.mxu1 %v4363_v17  ;;  %1990 = vmatprep.subr.bf16.mxu0 %v4366_v18  ;;  %v4399_v17 = vld [vmem:[%s6852_s8 + $0x44] ss:$16 sps:$4 sm:$0xff]   ;;  %v4402_v18 = vld [vmem:[%s6852_s8 + $0x4c] ss:$16 sps:$4 sm:$0xff]  }
 0x846   :  { %1918 = vmatpush1.bf16.msra.mxu1 %v4361_v19  ;;  %1991 = vmatpush1.bf16.msra.mxu0 %v4364_v20  ;;  %v4397_v19 = vld [vmem:[%s6852_s8 + $0x40] ss:$16 sps:$4 sm:$0xff]   ;;  %v4400_v20 = vld [vmem:[%s6852_s8 + $0x48] ss:$16 sps:$4 sm:$0xff]  }
 0x847   :  { %1919 = vmatprep.subr.bf16.mxu1 %v4369_v21  ;;  %1992 = vmatprep.subr.bf16.mxu0 %v4372_v28  ;;  %v1714_v21 = vpack.c.bf16 %v5543_v29, %v5666_v27  ;;  %v4408_v28 = vld [vmem:[%s6852_s8 + $0x6c] ss:$16 sps:$4 sm:$0xff]  }
 0x84a   :  { %1920 = vmatpush1.bf16.msra.mxu1 %v4367_v24  ;;  %1993 = vmatpush1.bf16.msra.mxu0 %v4370_v52  ;;  %v4405_v24 = vld [vmem:[%s6852_s8 + $0x64] ss:$16 sps:$4 sm:$0xff]   ;;  %v4406_v52 = vld [vmem:[%s6852_s8 + $0x68] ss:$16 sps:$4 sm:$0xff]  }
 0x84b   :  { %1921 = vmatprep.subr.bf16.mxu1 %v4375_v30  ;;  %1994 = vmatprep.subr.bf16.mxu0 %v4378_v22  ;;  %v4403_v30 = vld [vmem:[%s6852_s8 + $0x60] ss:$16 sps:$4 sm:$0xff]   ;;  %v4414_v22 = vld [vmem:[%s6852_s8 + $0x8c] ss:$16 sps:$4 sm:$0xff]  }
 0x84e   :  { %1922 = vmatpush1.bf16.msra.mxu1 %v4373_v25  ;;  %1995 = vmatpush1.bf16.msra.mxu0 %v4376_v53  ;;  %v4411_v25 = vld [vmem:[%s6852_s8 + $0x84] ss:$16 sps:$4 sm:$0xff]   ;;  %v4409_v53 = vld [vmem:[%s6852_s8 + $0x80] ss:$16 sps:$4 sm:$0xff]  }
 0x84f   :  { %1923 = vmatprep.subr.bf16.mxu1 %v4381_v56  ;;  %1996 = vmatprep.subr.bf16.mxu0 %v4384_v58  ;;  %v4412_v56 = vld [vmem:[%s6852_s8 + $0x88] ss:$16 sps:$4 sm:$0xff]   ;;  %v1715_v58 = vpack.c.bf16 %v5446_v32, %v5492_v40 }
 0x852   :  { %1924 = vmatpush1.bf16.msra.mxu1 %v4379_v59  ;;  %1997 = vmatpush1.bf16.msra.mxu0 %v4382_v63  ;;  %v4417_v59 = vld [vmem:[%s6852_s8 + $0xa4] ss:$16 sps:$4 sm:$0xff]   ;;  %v4415_v63 = vld [vmem:[%s6852_s8 + $0xa0] ss:$16 sps:$4 sm:$0xff]  }
 0x853   :  { %2215 = vmatprep.subr.bf16.mxu1 %v4387_v60  ;;  %2288 = vmatprep.subr.bf16.mxu0 %v4390_v23  ;;  %v4420_v60 = vld [vmem:[%s6852_s8 + $0xac] ss:$16 sps:$4 sm:$0xff]   ;;  %v4418_v23 = vld [vmem:[%s6852_s8 + $0xa8] ss:$16 sps:$4 sm:$0xff]  }
 0x907   :  { %v1592_v1 = vpop.f32.mrb[44].mxu1  ;;  %v1633_v2 = vpop.f32.mrb[52].mxu0 }
 0x908   :  { %v1640_v26 = vadd.f32 %v1592_v1, %v5338_v33  ;;  %v1642_v51 = vadd.f32 %v1633_v2, %v6900_v3  ;;  %v1594_v6 = vpop.f32.mrb[45].mxu1  ;;  %v1635_v8 = vpop.f32.mrb[53].mxu0  ;;  %v4423_v1 = vld [vmem:[%s6852_s8 + $0xc4] ss:$16 sps:$4 sm:$0xff]   ;;  %v4426_v2 = vld [vmem:[%s6852_s8 + $0xcc] ss:$16 sps:$4 sm:$0xff]  }
 0x909   :  { %v1641_v9 = vadd.f32 %v1594_v6, %v5343_v41  ;;  %v1643_v10 = vadd.f32 %v1635_v8, %v5346_v36  ;;  %v1596_v57 = vpop.f32.mrb[46].mxu1  ;;  %v1637_v46 = vpop.f32.mrb[54].mxu0  ;;  %v4424_v3 = vld [vmem:[%s6852_s8 + $0xc8] ss:$16 sps:$4 sm:$0xff]   ;;  %v4429_v6 = vld [vmem:[%s6852_s8 + $0xe4] ss:$16 sps:$4 sm:$0xff]  }
 0x90a   :  { %v3874_v61 = vmul.f32 -1.442695, %v1640_v26  ;;  %v1597_v38 = vpop.f32.mrb[47].mxu1  ;;  %v1638_v11 = vpop.f32.mrb[55].mxu0  ;;  %v4421_v26 = vld [vmem:[%s6852_s8 + $0xc0] ss:$16 sps:$4 sm:$0xff]  }
 0x90b   :  { %v3875_v39 = vmul.f32 -1.442695, %v1641_v9  ;;  %v3876_v34 = vmul.f32 -1.442695, %v1643_v10  ;;  %v4432_v8 = vld [vmem:[%s6852_s8 + $0xec] ss:$16 sps:$4 sm:$0xff]   ;;  %v1677_v11 = vpack.c.bf16 %v5400_v44, %v5354_v62 }
 0x90c   :  { %4593 = vpow2.f32 %v3874_v61  ;;  %v4427_v9 = vld [vmem:[%s6852_s8 + $0xe0] ss:$16 sps:$4 sm:$0xff]   ;;  %v4430_v10 = vld [vmem:[%s6852_s8 + $0xe8] ss:$16 sps:$4 sm:$0xff]   ;;  %v5962_v57 = vld [vmem:[%s6853_s11 + $0x4] ss:$16 sps:$4 sm:$0xff]  }
 0x90d   :  { %4595 = vpow2.f32 %v3875_v39  ;;  %v5967_v46 = vld [vmem:[%s6853_s11 + $0xc] ss:$16 sps:$4 sm:$0xff]   ;;  %v5974_v61 = vld [vmem:[%s6853_s11] ss:$16 sps:$4 sm:$0xff]   ;;  %v5979_v38 = vld [vmem:[%s6853_s11 + $0x8] ss:$16 sps:$4 sm:$0xff]  }
 0x90e   :  { %4597 = vpow2.f32 %v3876_v34  ;;  %v5988_v39 = vld [vmem:[%s6853_s11 + $0x24] ss:$16 sps:$4 sm:$0xff]   ;;  %v5993_v34 = vld [vmem:[%s6853_s11 + $0x2c] ss:$16 sps:$4 sm:$0xff]  }
 0x90f   :  { %4599 = vtanh.f32 %v1642_v51  ;;  %v1716_v51 = vpack.c.bf16 %v5354_v62, %v5400_v44  ;;  %v6000_v62 = vld [vmem:[%s6853_s11 + $0x20] ss:$16 sps:$4 sm:$0xff]   ;;  %v6005_v44 = vld [vmem:[%s6853_s11 + $0x28] ss:$16 sps:$4 sm:$0xff]  }
 0x916   :  { %v4594_v48 = vpop.eup %4593 }
 0x917   :  { %v4596_v4 = vpop.eup %4595  ;;  %v1647_v33 = vadd.f32 1.0, %v4594_v48  ;;  %v6012_v48 = vld [vmem:[%s6853_s11 + $0x44] ss:$16 sps:$4 sm:$0xff]  }
 0x918   :  { %v1653_v50 = vadd.f32 1.0, %v4596_v4  ;;  %v4598_v41 = vpop.eup %4597  ;;  %v6017_v4 = vld [vmem:[%s6853_s11 + $0x4c] ss:$16 sps:$4 sm:$0xff]  }
 0x919   :  { %4601 = vrcp.f32 %v1647_v33  ;;  %v4600_v42 = vpop.eup %4599  ;;  %v1660_v54 = vadd.f32 1.0, %v4598_v41  ;;  %v6026_v33 = vld [vmem:[%s6853_s11 + $0x40] ss:$16 sps:$4 sm:$0xff]   ;;  %v1678_v41 = vpack.c.bf16 %v5492_v40, %v5446_v32  ;;  %v6057_v40 = vld [vmem:[%s6853_s11 + $0x68] ss:$16 sps:$4 sm:$0xff]  }
 0x91a   :  { %4603 = vrcp.f32 %v1653_v50  ;;  %v6031_v50 = vld [vmem:[%s6853_s11 + $0x48] ss:$16 sps:$4 sm:$0xff]   ;;  %v6052_v32 = vld [vmem:[%s6853_s11 + $0x60] ss:$16 sps:$4 sm:$0xff]  }
 0x91b   :  { %4605 = vrcp.f32 %v1660_v54  ;;  %v6078_v54 = vld [vmem:[%s6853_s11 + $0x80] ss:$16 sps:$4 sm:$0xff]  }
 0x923   :  { %v4602_v36 = vpop.eup %4601 }
 0x924   :  { %v4604_v0 = vpop.eup %4603  ;;  %v1664_v43 = vmul.f32 %v4602_v36, %v4600_v42  ;;  %v6040_v42 = vld [vmem:[%s6853_s11 + $0x64] ss:$16 sps:$4 sm:$0xff]   ;;  %v6045_v36 = vld [vmem:[%s6853_s11 + $0x6c] ss:$16 sps:$4 sm:$0xff]  }
 0x925   :  { %v1663_v37 = vmul.f32 %v4604_v0, %v5737_v47  ;;  %v4606_v5 = vpop.eup %4605  ;;  %v4393_v47 = vld [vmem:[%s6852_s8 + $0x24] ss:$16 sps:$4 sm:$0xff]  }
 0x926   :  { %v6064_v0 = vld [vmem:[%s6853_s11 + $0x84] ss:$16 sps:$4 sm:$0xff]  }
 0x927   :  { %v1665_v55 = vadd.f32 %v1664_v43, %v1663_v37  ;;  %v6069_v43 = vld [vmem:[%s6853_s11 + $0x8c] ss:$16 sps:$4 sm:$0xff]   ;;  %v6083_v37 = vld [vmem:[%s6853_s11 + $0x88] ss:$16 sps:$4 sm:$0xff]  }
 0x929   :  { %4607 = vtanh.f32 %v1665_v55  ;;  %v1679_v55 = vpack.c.bf16 %v5666_v27, %v5543_v29  ;;  %v6104_v29 = vld [vmem:[%s6853_s11 + $0xa0] ss:$16 sps:$4 sm:$0xff]   ;;  %v6109_v27 = vld [vmem:[%s6853_s11 + $0xa8] ss:$16 sps:$4 sm:$0xff]  }
 0x933   :  { %v4608_v7 = vpop.eup %4607 }
 0x934   :  { %v5853_v45 = vmul.f32 %v4608_v7, %v4606_v5  ;;  %v6092_v5 = vld [vmem:[%s6853_s11 + $0xa4] ss:$16 sps:$4 sm:$0xff]   ;;  %v6097_v7 = vld [vmem:[%s6853_s11 + $0xac] ss:$16 sps:$4 sm:$0xff]  }
 0x936   :  { %v1713_v13 = vpack.c.bf16 %v5740_v49, %v5853_v45 }
 0x938   :  { %1942 = vmatmul.mubr.bf16.vlgmr.msra.gmra.mrb[48].mxu1 %v1713_v13  ;;  %2015 = vmatmul.mubr.bf16.vlgmr.msra.gmra.mrb[56].mxu0 %v1713_v13  ;;  %v6130_v13 = vld [vmem:[%s6853_s11 + $0xc0] ss:$16 sps:$4 sm:$0xff]  }
 0x939   :  { %2216 = vmatpush1.bf16.msra.mxu1 %v4385_v31  ;;  %2289 = vmatpush1.bf16.msra.mxu0 %v4388_v12  ;;  %v6116_v31 = vld [vmem:[%s6853_s11 + $0xc4] ss:$16 sps:$4 sm:$0xff]   ;;  %v6121_v12 = vld [vmem:[%s6853_s11 + $0xcc] ss:$16 sps:$4 sm:$0xff]  }
 0x93a   :  { %2217 = vmatprep.subr.bf16.mxu1 %v4393_v47  ;;  %2290 = vmatprep.subr.bf16.mxu0 %v4396_v14  ;;  %v6135_v47 = vld [vmem:[%s6853_s11 + $0xc8] ss:$16 sps:$4 sm:$0xff]   ;;  %v1680_v14 = vpack.c.bf16 %v5853_v45, %v5740_v49  ;;  %v6156_v49 = vld [vmem:[%s6853_s11 + $0xe0] ss:$16 sps:$4 sm:$0xff]  }
 0x93b   :  { %1951 = vmatprep.mubr.bf16.mxu1 %v6884_v35  ;;  %2024 = vmatprep.mubr.bf16.mxu0 %v6884_v35  ;;  %v6161_v45 = vld [vmem:[%s6853_s11 + $0xe8] ss:$16 sps:$4 sm:$0xff]  }
 0x93d   :  { %2218 = vmatpush1.bf16.msra.mxu1 %v4391_v15  ;;  %2291 = vmatpush1.bf16.msra.mxu0 %v4394_v16  ;;  %v6144_v15 = vld [vmem:[%s6853_s11 + $0xe4] ss:$16 sps:$4 sm:$0xff]   ;;  %v6149_v16 = vld [vmem:[%s6853_s11 + $0xec] ss:$16 sps:$4 sm:$0xff]  }
 0x93e   :  { %2219 = vmatprep.subr.bf16.mxu1 %v4399_v17  ;;  %2292 = vmatprep.subr.bf16.mxu0 %v4402_v18  ;;  %v2361_v17 = vld [vmem:[%s6854_s10] sm:$0xf] }
 0x93f   :  { %v6901_v18 = vld [vmem:[#allocation4_spill] sm:$0xff] }
 0x940   :  { %1952 = vmatmul.mubr.bf16.gmra.mrb[52].mxu1 %v1714_v21  ;;  %2025 = vmatmul.mubr.bf16.gmra.mrb[60].mxu0 %v1714_v21  ;;  %v6903_v21 = vsub.s32 1, %v6901_v18 }
 0x941   :  { %2220 = vmatpush1.bf16.msra.mxu1 %v4397_v19  ;;  %2293 = vmatpush1.bf16.msra.mxu0 %v4400_v20  ;;  %v6902_v19 = vsub.s32 2, %v6901_v18 }
 0x942   :  { %2221 = vmatprep.subr.bf16.mxu1 %v4405_v24  ;;  %2294 = vmatprep.subr.bf16.mxu0 %v4408_v28  ;;  %v6214_v24 = vrot.slane %v2361_v17, %v6903_v21  ;;  %v6904_v28 = vsub.s32 3, %v6901_v18 }
 0x943   :  { %1961 = vmatprep.mubr.bf16.mxu1 %v6884_v35  ;;  %2034 = vmatprep.mubr.bf16.mxu0 %v6884_v35  ;;  %v2374_v20 = vrot.slane %v2361_v17, %v6902_v19 }
 0x945   :  { %2222 = vmatpush1.bf16.msra.mxu1 %v4403_v30  ;;  %2295 = vmatpush1.bf16.msra.mxu0 %v4406_v52  ;;  %v6218_v30 = vrot.slane %v2361_v17, %v6904_v28 }
 0x946   :  { %2223 = vmatprep.subr.bf16.mxu1 %v4411_v25  ;;  %2296 = vmatprep.subr.bf16.mxu0 %v4414_v22  ;;  %v6905_v22 = vsub.s32 0, %v6901_v18 }
 0x948   :  { %1962 = vmatmul.mubr.bf16.gmra.mrb[56].mxu1 %v1715_v58  ;;  %2035 = vmatmul.mubr.bf16.gmra.mrb[64].mxu0 %v1715_v58 }
 0x949   :  { %2224 = vmatpush1.bf16.msra.mxu1 %v4409_v53  ;;  %2297 = vmatpush1.bf16.msra.mxu0 %v4412_v56  ;;  %v2366_v53 = vrot.slane %v2361_v17, %v6905_v22 }
 0x94a   :  { %2225 = vmatprep.subr.bf16.mxu1 %v4417_v59  ;;  %2298 = vmatprep.subr.bf16.mxu0 %v4420_v60 }
 0x94b   :  { %1971 = vmatprep.mubr.bf16.mxu1 %v6884_v35  ;;  %2044 = vmatprep.mubr.bf16.mxu0 %v6884_v35 }
 0x94d   :  { %2226 = vmatpush1.bf16.msra.mxu1 %v4415_v63  ;;  %2299 = vmatpush1.bf16.msra.mxu0 %v4418_v23 }
 0x94e   :  { %2227 = vmatprep.subr.bf16.mxu1 %v4423_v1  ;;  %2300 = vmatprep.subr.bf16.mxu0 %v4426_v2 }
 0x950   :  { %1972 = vmatmul.mubr.bf16.gmra.mrb[60].mxu1 %v1716_v51  ;;  %2045 = vmatmul.mubr.bf16.gmra.mrb[68].mxu0 %v1716_v51 }
 0x951   :  { %2228 = vmatpush1.bf16.msra.mxu1 %v4421_v26  ;;  %2301 = vmatpush1.bf16.msra.mxu0 %v4424_v3 }
 0x952   :  { %2229 = vmatprep.subr.bf16.mxu1 %v4429_v6  ;;  %2302 = vmatprep.subr.bf16.mxu0 %v4432_v8 }
 0x953   :  { %2247 = vmatprep.mubr.bf16.mxu1 %v6884_v35  ;;  %2320 = vmatprep.mubr.bf16.mxu0 %v6884_v35 }
 0x955   :  { %2230 = vmatpush1.bf16.msra.mxu1 %v4427_v9  ;;  %2303 = vmatpush1.bf16.msra.mxu0 %v4430_v10 }
 0x956   :  { %2607 = vmatprep.subr.bf16.mxu1 %v5962_v57  ;;  %2648 = vmatprep.subr.bf16.mxu0 %v5967_v46 }
 0x958   :  { %2248 = vmatmul.mubr.bf16.vlgmr.msra.gmra.mrb[48].mxu1 %v1677_v11  ;;  %2321 = vmatmul.mubr.bf16.vlgmr.msra.gmra.mrb[56].mxu0 %v1677_v11 }
 0x959   :  { %2608 = vmatpush1.bf16.msra.mxu1 %v5974_v61  ;;  %2649 = vmatpush1.bf16.msra.mxu0 %v5979_v38 }
 0x95a   :  { %2609 = vmatprep.subr.bf16.mxu1 %v5988_v39  ;;  %2650 = vmatprep.subr.bf16.mxu0 %v5993_v34 }
 0x95b   :  { %2257 = vmatprep.mubr.bf16.mxu1 %v6884_v35  ;;  %2330 = vmatprep.mubr.bf16.mxu0 %v6884_v35 }
 0x95d   :  { %2610 = vmatpush1.bf16.msra.mxu1 %v6000_v62  ;;  %2651 = vmatpush1.bf16.msra.mxu0 %v6005_v44 }
 0x95e   :  { %2611 = vmatprep.subr.bf16.mxu1 %v6012_v48  ;;  %2652 = vmatprep.subr.bf16.mxu0 %v6017_v4 }
 0x960   :  { %2258 = vmatmul.mubr.bf16.gmra.mrb[52].mxu1 %v1678_v41  ;;  %2331 = vmatmul.mubr.bf16.gmra.mrb[60].mxu0 %v1678_v41 }
 0x961   :  { %2612 = vmatpush1.bf16.msra.mxu1 %v6026_v33  ;;  %2653 = vmatpush1.bf16.msra.mxu0 %v6031_v50 }
 0x962   :  { %2613 = vmatprep.subr.bf16.mxu1 %v6040_v42  ;;  %2654 = vmatprep.subr.bf16.mxu0 %v6045_v36 }
 0x963   :  { %2267 = vmatprep.mubr.bf16.mxu1 %v6884_v35  ;;  %2340 = vmatprep.mubr.bf16.mxu0 %v6884_v35 }
 0x965   :  { %2614 = vmatpush1.bf16.msra.mxu1 %v6052_v32  ;;  %2655 = vmatpush1.bf16.msra.mxu0 %v6057_v40 }
 0x966   :  { %2615 = vmatprep.subr.bf16.mxu1 %v6064_v0  ;;  %2656 = vmatprep.subr.bf16.mxu0 %v6069_v43 }
 0x968   :  { %2268 = vmatmul.mubr.bf16.gmra.mrb[56].mxu1 %v1679_v55  ;;  %2341 = vmatmul.mubr.bf16.gmra.mrb[64].mxu0 %v1679_v55 }
 0x969   :  { %2616 = vmatpush1.bf16.msra.mxu1 %v6078_v54  ;;  %2657 = vmatpush1.bf16.msra.mxu0 %v6083_v37 }
 0x96a   :  { %2617 = vmatprep.subr.bf16.mxu1 %v6092_v5  ;;  %2658 = vmatprep.subr.bf16.mxu0 %v6097_v7 }
 0x96b   :  { %2277 = vmatprep.mubr.bf16.mxu1 %v6884_v35  ;;  %2350 = vmatprep.mubr.bf16.mxu0 %v6884_v35 }
 0x96d   :  { %2618 = vmatpush1.bf16.msra.mxu1 %v6104_v29  ;;  %2659 = vmatpush1.bf16.msra.mxu0 %v6109_v27 }
 0x96e   :  { %2619 = vmatprep.subr.bf16.mxu1 %v6116_v31  ;;  %2660 = vmatprep.subr.bf16.mxu0 %v6121_v12 }
 0x970   :  { %2278 = vmatmul.mubr.bf16.gmra.mrb[60].mxu1 %v1680_v14  ;;  %2351 = vmatmul.mubr.bf16.gmra.mrb[68].mxu0 %v1680_v14 }
 0x971   :  { %2620 = vmatpush1.bf16.msra.mxu1 %v6130_v13  ;;  %2661 = vmatpush1.bf16.msra.mxu0 %v6135_v47 }
 0x972   :  { %2621 = vmatprep.subr.bf16.mxu1 %v6144_v15  ;;  %2662 = vmatprep.subr.bf16.mxu0 %v6149_v16 }
 0x973   :  { %2639 = vmatprep.mubr.bf16.mxu1 %v6884_v35  ;;  %2680 = vmatprep.mubr.bf16.mxu0 %v6884_v35 }
 0x975   :  { %2622 = vmatpush1.bf16.msra.mxu1 %v6156_v49  ;;  %2663 = vmatpush1.bf16.msra.mxu0 %v6161_v45 }
 0x976   :  { %2719 = vmatprep.subr.bf16.mxu1 %v5962_v57  ;;  %2760 = vmatprep.subr.bf16.mxu0 %v5967_v46 }
 0x978   :  { %2640 = vmatmul.mubr.bf16.vlgmr.msra.gmra.mrb[64].mxu1 %v6884_v35  ;;  %2681 = vmatmul.mubr.bf16.vlgmr.msra.gmra.mrb[72].mxu0 %v6884_v35 }
 0x979   :  { %2720 = vmatpush1.bf16.msra.mxu1 %v5974_v61  ;;  %2761 = vmatpush1.bf16.msra.mxu0 %v5979_v38 }
 0x97a   :  { %2721 = vmatprep.subr.bf16.mxu1 %v5988_v39  ;;  %2762 = vmatprep.subr.bf16.mxu0 %v5993_v34 }
 0x97b   :  { %2751 = vmatprep.mubr.bf16.mxu1 %v6884_v35  ;;  %2792 = vmatprep.mubr.bf16.mxu0 %v6884_v35 }
 0x97d   :  { %2722 = vmatpush1.bf16.msra.mxu1 %v6000_v62  ;;  %2763 = vmatpush1.bf16.msra.mxu0 %v6005_v44 }
 0x97e   :  { %2723 = vmatprep.subr.bf16.mxu1 %v6012_v48  ;;  %2764 = vmatprep.subr.bf16.mxu0 %v6017_v4 }
 0x981   :  { %2724 = vmatpush1.bf16.msra.mxu1 %v6026_v33  ;;  %2765 = vmatpush1.bf16.msra.mxu0 %v6031_v50 }
 0x982   :  { %2725 = vmatprep.subr.bf16.mxu1 %v6040_v42  ;;  %2766 = vmatprep.subr.bf16.mxu0 %v6045_v36 }
 0x985   :  { %2726 = vmatpush1.bf16.msra.mxu1 %v6052_v32  ;;  %2767 = vmatpush1.bf16.msra.mxu0 %v6057_v40 }
 0x986   :  { %2727 = vmatprep.subr.bf16.mxu1 %v6064_v0  ;;  %2768 = vmatprep.subr.bf16.mxu0 %v6069_v43 }
 0x989   :  { %2728 = vmatpush1.bf16.msra.mxu1 %v6078_v54  ;;  %2769 = vmatpush1.bf16.msra.mxu0 %v6083_v37 }
 0x98a   :  { %2729 = vmatprep.subr.bf16.mxu1 %v6092_v5  ;;  %2770 = vmatprep.subr.bf16.mxu0 %v6097_v7 }
 0x98d   :  { %2730 = vmatpush1.bf16.msra.mxu1 %v6104_v29  ;;  %2771 = vmatpush1.bf16.msra.mxu0 %v6109_v27 }
 0x98e   :  { %2731 = vmatprep.subr.bf16.mxu1 %v6116_v31  ;;  %2772 = vmatprep.subr.bf16.mxu0 %v6121_v12 }
 0x991   :  { %2732 = vmatpush1.bf16.msra.mxu1 %v6130_v13  ;;  %2773 = vmatpush1.bf16.msra.mxu0 %v6135_v47 }
 0x992   :  { %2733 = vmatprep.subr.bf16.mxu1 %v6144_v15  ;;  %2774 = vmatprep.subr.bf16.mxu0 %v6149_v16 }
 0x995   :  { %2734 = vmatpush1.bf16.msra.mxu1 %v6156_v49  ;;  %2775 = vmatpush1.bf16.msra.mxu0 %v6161_v45 }
 0x996   :  { %2831 = vmatprep.subr.bf16.mxu1 %v5962_v57  ;;  %2872 = vmatprep.subr.bf16.mxu0 %v5967_v46 }
 0xa2b   :  { %v6220_v52 = vpop.f32.mrb[48].mxu1  ;;  %v2322_v25 = vpop.f32.mrb[56].mxu0 }
 0xa2c   :  { %v6224_v56 = vadd.f32 %v2374_v20, %v2322_v25  ;;  %v2251_v58 = vpop.f32.mrb[49].mxu1  ;;  %v2324_v59 = vpop.f32.mrb[57].mxu0 }
 0xa2d   :  { %v6227_v60 = vadd.f32 %v6214_v24, %v2251_v58  ;;  %v6230_v63 = vadd.f32 %v6218_v30, %v2324_v59  ;;  %v2253_v23 = vpop.f32.mrb[50].mxu1  ;;  %v2326_v1 = vpop.f32.mrb[58].mxu0 }
 0xa2e   :  { %v6232_v2 = vadd.f32 %v2366_v53, %v2253_v23  ;;  %v6234_v26 = vadd.f32 %v2374_v20, %v2326_v1  ;;  %v2255_v3 = vpop.f32.mrb[51].mxu1  ;;  %v2328_v51 = vpop.f32.mrb[59].mxu0 }
 0xa2f   :  { %v6237_v6 = vadd.f32 %v6214_v24, %v2255_v3  ;;  %v6240_v8 = vadd.f32 %v6218_v30, %v2328_v51 }
 0xa33   :  { %v2259_v9 = vpop.f32.mrb[52].mxu1  ;;  %v2332_v10 = vpop.f32.mrb[60].mxu0 }
 0xa34   :  { %v6242_v11 = vadd.f32 %v2366_v53, %v2259_v9  ;;  %v6244_v41 = vadd.f32 %v2374_v20, %v2332_v10  ;;  %v2261_v55 = vpop.f32.mrb[53].mxu1  ;;  %v2334_v14 = vpop.f32.mrb[61].mxu0 }
 0xa35   :  { %v6247_v17 = vadd.f32 %v6214_v24, %v2261_v55  ;;  %v6250_v18 = vadd.f32 %v6218_v30, %v2334_v14  ;;  %v2263_v19 = vpop.f32.mrb[54].mxu1  ;;  %v2336_v21 = vpop.f32.mrb[62].mxu0 }
 0xa36   :  { %v6252_v28 = vadd.f32 %v2366_v53, %v2263_v19  ;;  %v6254_v25 = vadd.f32 %v2374_v20, %v2336_v21  ;;  %v2265_v22 = vpop.f32.mrb[55].mxu1  ;;  %v2338_v58 = vpop.f32.mrb[63].mxu0 }
 0xa37   :  { %v6257_v59 = vadd.f32 %v6214_v24, %v2265_v22  ;;  %v6260_v23 = vadd.f32 %v6218_v30, %v2338_v58 }
 0xa38   :  { %6906 = vst [vmem:[#allocation5_spill] sm:$0xff] %v6254_v25 }
 0xa39   :  { %6907 = vst [vmem:[#allocation6_spill] sm:$0xff] %v6257_v59  ;;  %6908 = vst [vmem:[#allocation7_spill] sm:$0xff] %v6260_v23 }
 0xa3b   :  { %v2269_v1 = vpop.f32.mrb[56].mxu1  ;;  %v2342_v3 = vpop.f32.mrb[64].mxu0 }
 0xa3c   :  { %v6262_v51 = vadd.f32 %v2366_v53, %v2269_v1  ;;  %v6264_v9 = vadd.f32 %v2374_v20, %v2342_v3  ;;  %v2271_v10 = vpop.f32.mrb[57].mxu1  ;;  %v2344_v55 = vpop.f32.mrb[65].mxu0 }
 0xa3d   :  { %v6267_v14 = vadd.f32 %v6214_v24, %v2271_v10  ;;  %v6270_v19 = vadd.f32 %v6218_v30, %v2344_v55  ;;  %v2273_v21 = vpop.f32.mrb[58].mxu1  ;;  %v2346_v22 = vpop.f32.mrb[66].mxu0 }
 0xa3e   :  { %6909 = vst [vmem:[#allocation8_spill] sm:$0xff] %v6262_v51  ;;  %6910 = vst [vmem:[#allocation9_spill] sm:$0xff] %v6264_v9  ;;  %v6272_v59 = vadd.f32 %v2366_v53, %v2273_v21  ;;  %v6274_v58 = vadd.f32 %v2374_v20, %v2346_v22  ;;  %v2275_v23 = vpop.f32.mrb[59].mxu1  ;;  %v2348_v25 = vpop.f32.mrb[67].mxu0 }
 0xa3f   :  { %6911 = vst [vmem:[#allocation10_spill] sm:$0xff] %v6267_v14  ;;  %6912 = vst [vmem:[#allocation11_spill] sm:$0xff] %v6270_v19  ;;  %v6277_v1 = vadd.f32 %v6214_v24, %v2275_v23  ;;  %v6280_v3 = vadd.f32 %v6218_v30, %v2348_v25 }
 0xa40   :  { %6913 = vst [vmem:[#allocation12_spill] sm:$0xff] %v6272_v59  ;;  %6914 = vst [vmem:[#allocation13_spill] sm:$0xff] %v6274_v58 }
 0xa41   :  { %6915 = vst [vmem:[#allocation14_spill] sm:$0xff] %v6277_v1  ;;  %6916 = vst [vmem:[#allocation15_spill] sm:$0xff] %v6280_v3 }
 0xa43   :  { %v2279_v9 = vpop.f32.mrb[60].mxu1  ;;  %v2352_v10 = vpop.f32.mrb[68].mxu0 }
 0xa44   :  { %v6282_v14 = vadd.f32 %v2366_v53, %v2279_v9  ;;  %v6284_v55 = vadd.f32 %v2374_v20, %v2352_v10  ;;  %v2281_v19 = vpop.f32.mrb[61].mxu1  ;;  %v2354_v51 = vpop.f32.mrb[69].mxu0 }
 0xa45   :  { %v6287_v21 = vadd.f32 %v6214_v24, %v2281_v19  ;;  %v6290_v22 = vadd.f32 %v6218_v30, %v2354_v51  ;;  %v2283_v58 = vpop.f32.mrb[62].mxu1  ;;  %v2356_v23 = vpop.f32.mrb[70].mxu0  ;;  %v2383_v19 = vadd.f32 %v2366_v53, %v6220_v52 }
 0xa46   :  { %6917 = vst [vmem:[#allocation16_spill] sm:$0xff] %v6282_v14  ;;  %6918 = vst [vmem:[#allocation17_spill] sm:$0xff] %v6284_v55  ;;  %v6292_v1 = vadd.f32 %v2366_v53, %v2283_v58  ;;  %v6294_v25 = vadd.f32 %v2374_v20, %v2356_v23  ;;  %v2285_v3 = vpop.f32.mrb[63].mxu1  ;;  %v2358_v59 = vpop.f32.mrb[71].mxu0 }
 0xa47   :  { %6919 = vst [vmem:[#allocation18_spill] sm:$0xff] %v6287_v21  ;;  %6920 = vst [vmem:[#allocation19_spill] sm:$0xff] %v6290_v22  ;;  %v6297_v9 = vadd.f32 %v6214_v24, %v2285_v3  ;;  %v6300_v10 = vadd.f32 %v6218_v30, %v2358_v59 }
 0xa48   :  { %6921 = vst [vmem:[#allocation20_spill] sm:$0xff] %v6292_v1  ;;  %6922 = vst [vmem:[#allocation4_spill] sm:$0xff] %v6294_v25 }
 0xa49   :  { %6923 = vst [vmem:[#allocation21_spill] sm:$0xff] %v6297_v9 }
 0xa4b   :  { %v2641_v21 = vpop.f32.mrb[64].mxu1  ;;  %v2682_v55 = vpop.f32.mrb[72].mxu0 }
 0xa4c   :  { %v2689_v51 = vadd.f32 %v2641_v21, %v2383_v19  ;;  %v2691_v22 = vadd.f32 %v2682_v55, %v6224_v56  ;;  %v2643_v14 = vpop.f32.mrb[65].mxu1  ;;  %v2684_v58 = vpop.f32.mrb[73].mxu0 }
 0xa4d   :  { %v2690_v20 = vadd.f32 %v2643_v14, %v6227_v60  ;;  %v2692_v23 = vadd.f32 %v2684_v58, %v6230_v63  ;;  %v2645_v25 = vpop.f32.mrb[66].mxu1  ;;  %v2686_v1 = vpop.f32.mrb[74].mxu0 }
 0xa4e   :  { %v3973_v24 = vmul.f32 -1.442695, %v2689_v51  ;;  %v2646_v3 = vpop.f32.mrb[67].mxu1  ;;  %v2687_v9 = vpop.f32.mrb[75].mxu0 }
 0xa4f   :  { %v3974_v30 = vmul.f32 -1.442695, %v2690_v20  ;;  %v3975_v52 = vmul.f32 -1.442695, %v2692_v23 }
 0xa50   :  { %4609 = vpow2.f32 %v3973_v24 }
 0xa51   :  { %4611 = vpow2.f32 %v3974_v30 }
 0xa52   :  { %4613 = vpow2.f32 %v3975_v52 }
 0xa53   :  { %4615 = vtanh.f32 %v2691_v22 }
 0xa5a   :  { %v4610_v53 = vpop.eup %4609 }
 0xa5b   :  { %v4612_v59 = vpop.eup %4611  ;;  %v2696_v21 = vadd.f32 1.0, %v4610_v53 }
 0xa5c   :  { %v2702_v56 = vadd.f32 1.0, %v4612_v59  ;;  %v4614_v60 = vpop.eup %4613 }
 0xa5d   :  { %4617 = vrcp.f32 %v2696_v21  ;;  %v4616_v14 = vpop.eup %4615  ;;  %v2709_v25 = vadd.f32 1.0, %v4614_v60 }
 0xa5e   :  { %4619 = vrcp.f32 %v2702_v56 }
 0xa5f   :  { %4621 = vrcp.f32 %v2709_v25 }
 0xa67   :  { %v4618_v63 = vpop.eup %4617 }
 0xa68   :  { %v4620_v55 = vpop.eup %4619  ;;  %v2713_v1 = vmul.f32 %v4618_v63, %v4616_v14 }
 0xa69   :  { %v2712_v19 = vmul.f32 0.0, %v4620_v55  ;;  %v4622_v51 = vpop.eup %4621 }
 0xa6b   :  { %v6306_v9 = vadd.f32 %v2713_v1, %v2712_v19 }
 0xa6d   :  { %4623 = vtanh.f32 %v6306_v9 }
 0xa77   :  { %v4624_v58 = vpop.eup %4623 }
 0xa78   :  { %v6309_v20 = vmul.f32 %v4624_v58, %v4622_v51 }
 0xa7a   :  { %v2718_v22 = vpack.c.bf16 %v6309_v20, %v6309_v20 }
 0xa7c   :  { %2752 = vmatmul.mubr.bf16.vlgmr.msra.gmra.mrb[68].mxu1 %v2718_v22  ;;  %2793 = vmatmul.mubr.bf16.vlgmr.msra.gmra.mrb[76].mxu0 %v2718_v22 }
 0xa7d   :  { %2832 = vmatpush1.bf16.msra.mxu1 %v5974_v61  ;;  %2873 = vmatpush1.bf16.msra.mxu0 %v5979_v38 }
 0xa7e   :  { %2833 = vmatprep.subr.bf16.mxu1 %v5988_v39  ;;  %2874 = vmatprep.subr.bf16.mxu0 %v5993_v34 }
 0xa7f   :  { %2863 = vmatprep.mubr.bf16.mxu1 %v6884_v35  ;;  %2904 = vmatprep.mubr.bf16.mxu0 %v6884_v35 }
 0xa81   :  { %2834 = vmatpush1.bf16.msra.mxu1 %v6000_v62  ;;  %2875 = vmatpush1.bf16.msra.mxu0 %v6005_v44 }
 0xa82   :  { %2835 = vmatprep.subr.bf16.mxu1 %v6012_v48  ;;  %2876 = vmatprep.subr.bf16.mxu0 %v6017_v4 }
 0xa85   :  { %2836 = vmatpush1.bf16.msra.mxu1 %v6026_v33  ;;  %2877 = vmatpush1.bf16.msra.mxu0 %v6031_v50 }
 0xa86   :  { %2837 = vmatprep.subr.bf16.mxu1 %v6040_v42  ;;  %2878 = vmatprep.subr.bf16.mxu0 %v6045_v36 }
 0xa89   :  { %2838 = vmatpush1.bf16.msra.mxu1 %v6052_v32  ;;  %2879 = vmatpush1.bf16.msra.mxu0 %v6057_v40 }
 0xa8a   :  { %2839 = vmatprep.subr.bf16.mxu1 %v6064_v0  ;;  %2880 = vmatprep.subr.bf16.mxu0 %v6069_v43 }
 0xa8d   :  { %2840 = vmatpush1.bf16.msra.mxu1 %v6078_v54  ;;  %2881 = vmatpush1.bf16.msra.mxu0 %v6083_v37 }
 0xa8e   :  { %2841 = vmatprep.subr.bf16.mxu1 %v6092_v5  ;;  %2882 = vmatprep.subr.bf16.mxu0 %v6097_v7 }
 0xa91   :  { %2842 = vmatpush1.bf16.msra.mxu1 %v6104_v29  ;;  %2883 = vmatpush1.bf16.msra.mxu0 %v6109_v27 }
 0xa92   :  { %2843 = vmatprep.subr.bf16.mxu1 %v6116_v31  ;;  %2884 = vmatprep.subr.bf16.mxu0 %v6121_v12 }
 0xa95   :  { %2844 = vmatpush1.bf16.msra.mxu1 %v6130_v13  ;;  %2885 = vmatpush1.bf16.msra.mxu0 %v6135_v47 }
 0xa96   :  { %2845 = vmatprep.subr.bf16.mxu1 %v6144_v15  ;;  %2886 = vmatprep.subr.bf16.mxu0 %v6149_v16 }
 0xa99   :  { %2846 = vmatpush1.bf16.msra.mxu1 %v6156_v49  ;;  %2887 = vmatpush1.bf16.msra.mxu0 %v6161_v45 }
 0xa9a   :  { %2943 = vmatprep.subr.bf16.mxu1 %v5962_v57  ;;  %2984 = vmatprep.subr.bf16.mxu0 %v5967_v46 }
 0xb4f   :  { %v2753_v23 = vpop.f32.mrb[68].mxu1  ;;  %v2794_v24 = vpop.f32.mrb[76].mxu0 }
 0xb50   :  { %v2801_v3 = vadd.f32 %v2753_v23, %v6232_v2  ;;  %v2803_v30 = vadd.f32 %v2794_v24, %v6234_v26  ;;  %v2755_v52 = vpop.f32.mrb[69].mxu1  ;;  %v2796_v53 = vpop.f32.mrb[77].mxu0 }
 0xb51   :  { %v2802_v59 = vadd.f32 %v2755_v52, %v6237_v6  ;;  %v2804_v21 = vadd.f32 %v2796_v53, %v6240_v8  ;;  %v2757_v56 = vpop.f32.mrb[70].mxu1  ;;  %v2798_v60 = vpop.f32.mrb[78].mxu0 }
 0xb52   :  { %v3976_v14 = vmul.f32 -1.442695, %v2801_v3  ;;  %v2758_v63 = vpop.f32.mrb[71].mxu1  ;;  %v2799_v55 = vpop.f32.mrb[79].mxu0 }
 0xb53   :  { %v3977_v1 = vmul.f32 -1.442695, %v2802_v59  ;;  %v3978_v25 = vmul.f32 -1.442695, %v2804_v21 }
 0xb54   :  { %4625 = vpow2.f32 %v3976_v14 }
 0xb55   :  { %4627 = vpow2.f32 %v3977_v1 }
 0xb56   :  { %4629 = vpow2.f32 %v3978_v25 }
 0xb57   :  { %4631 = vtanh.f32 %v2803_v30 }
 0xb5e   :  { %v4626_v19 = vpop.eup %4625 }
 0xb5f   :  { %v4628_v51 = vpop.eup %4627  ;;  %v2808_v2 = vadd.f32 1.0, %v4626_v19 }
 0xb60   :  { %v2814_v26 = vadd.f32 1.0, %v4628_v51  ;;  %v4630_v6 = vpop.eup %4629 }
 0xb61   :  { %4633 = vrcp.f32 %v2808_v2  ;;  %v4632_v58 = vpop.eup %4631  ;;  %v2821_v24 = vadd.f32 1.0, %v4630_v6 }
 0xb62   :  { %4635 = vrcp.f32 %v2814_v26 }
 0xb63   :  { %4637 = vrcp.f32 %v2821_v24 }
 0xb6b   :  { %v4634_v8 = vpop.eup %4633 }
 0xb6c   :  { %v4636_v22 = vpop.eup %4635  ;;  %v2825_v23 = vmul.f32 %v4634_v8, %v4632_v58 }
 0xb6d   :  { %v2824_v3 = vmul.f32 %v4636_v22, %v6306_v9  ;;  %v4638_v53 = vpop.eup %4637 }
 0xb6f   :  { %v6352_v52 = vadd.f32 %v2825_v23, %v2824_v3 }
 0xb71   :  { %4639 = vtanh.f32 %v6352_v52 }
 0xb7b   :  { %v4640_v59 = vpop.eup %4639 }
 0xb7c   :  { %v6355_v21 = vmul.f32 %v4640_v59, %v4638_v53 }
 0xb7e   :  { %v2830_v30 = vpack.c.bf16 %v6355_v21, %v6355_v21 }
 0xb80   :  { %2864 = vmatmul.mubr.bf16.vlgmr.msra.gmra.mrb[72].mxu1 %v2830_v30  ;;  %2905 = vmatmul.mubr.bf16.vlgmr.msra.gmra.mrb[80].mxu0 %v2830_v30 }
 0xb81   :  { %2944 = vmatpush1.bf16.msra.mxu1 %v5974_v61  ;;  %2985 = vmatpush1.bf16.msra.mxu0 %v5979_v38 }
 0xb82   :  { %2945 = vmatprep.subr.bf16.mxu1 %v5988_v39  ;;  %2986 = vmatprep.subr.bf16.mxu0 %v5993_v34 }
 0xb83   :  { %2975 = vmatprep.mubr.bf16.mxu1 %v6884_v35  ;;  %3016 = vmatprep.mubr.bf16.mxu0 %v6884_v35 }
 0xb85   :  { %2946 = vmatpush1.bf16.msra.mxu1 %v6000_v62  ;;  %2987 = vmatpush1.bf16.msra.mxu0 %v6005_v44 }
 0xb86   :  { %2947 = vmatprep.subr.bf16.mxu1 %v6012_v48  ;;  %2988 = vmatprep.subr.bf16.mxu0 %v6017_v4 }
 0xb89   :  { %2948 = vmatpush1.bf16.msra.mxu1 %v6026_v33  ;;  %2989 = vmatpush1.bf16.msra.mxu0 %v6031_v50 }
 0xb8a   :  { %2949 = vmatprep.subr.bf16.mxu1 %v6040_v42  ;;  %2990 = vmatprep.subr.bf16.mxu0 %v6045_v36 }
 0xb8d   :  { %2950 = vmatpush1.bf16.msra.mxu1 %v6052_v32  ;;  %2991 = vmatpush1.bf16.msra.mxu0 %v6057_v40 }
 0xb8e   :  { %2951 = vmatprep.subr.bf16.mxu1 %v6064_v0  ;;  %2992 = vmatprep.subr.bf16.mxu0 %v6069_v43 }
 0xb91   :  { %2952 = vmatpush1.bf16.msra.mxu1 %v6078_v54  ;;  %2993 = vmatpush1.bf16.msra.mxu0 %v6083_v37 }
 0xb92   :  { %2953 = vmatprep.subr.bf16.mxu1 %v6092_v5  ;;  %2994 = vmatprep.subr.bf16.mxu0 %v6097_v7 }
 0xb95   :  { %2954 = vmatpush1.bf16.msra.mxu1 %v6104_v29  ;;  %2995 = vmatpush1.bf16.msra.mxu0 %v6109_v27 }
 0xb96   :  { %2955 = vmatprep.subr.bf16.mxu1 %v6116_v31  ;;  %2996 = vmatprep.subr.bf16.mxu0 %v6121_v12 }
 0xb99   :  { %2956 = vmatpush1.bf16.msra.mxu1 %v6130_v13  ;;  %2997 = vmatpush1.bf16.msra.mxu0 %v6135_v47 }
 0xb9a   :  { %2957 = vmatprep.subr.bf16.mxu1 %v6144_v15  ;;  %2998 = vmatprep.subr.bf16.mxu0 %v6149_v16 }
 0xb9d   :  { %2958 = vmatpush1.bf16.msra.mxu1 %v6156_v49  ;;  %2999 = vmatpush1.bf16.msra.mxu0 %v6161_v45 }
 0xb9e   :  { %3055 = vmatprep.subr.bf16.mxu1 %v5962_v57  ;;  %3096 = vmatprep.subr.bf16.mxu0 %v5967_v46 }
 0xc53   :  { %v2865_v9 = vpop.f32.mrb[72].mxu1  ;;  %v2906_v56 = vpop.f32.mrb[80].mxu0 }
 0xc54   :  { %v2913_v60 = vadd.f32 %v2865_v9, %v6242_v11  ;;  %v2915_v14 = vadd.f32 %v2906_v56, %v6244_v41  ;;  %v2867_v63 = vpop.f32.mrb[73].mxu1  ;;  %v2908_v55 = vpop.f32.mrb[81].mxu0 }
 0xc55   :  { %v2914_v1 = vadd.f32 %v2867_v63, %v6247_v17  ;;  %v2916_v25 = vadd.f32 %v2908_v55, %v6250_v18  ;;  %v2869_v19 = vpop.f32.mrb[74].mxu1  ;;  %v2910_v51 = vpop.f32.mrb[82].mxu0 }
 0xc56   :  { %v3979_v2 = vmul.f32 -1.442695, %v2913_v60  ;;  %v2870_v26 = vpop.f32.mrb[75].mxu1  ;;  %v2911_v6 = vpop.f32.mrb[83].mxu0 }
 0xc57   :  { %v3980_v58 = vmul.f32 -1.442695, %v2914_v1  ;;  %v3981_v8 = vmul.f32 -1.442695, %v2916_v25  ;;  %v6924_v25 = vld [vmem:[#allocation5_spill] sm:$0xff]  ;;  %v6925_v26 = vld [vmem:[#allocation6_spill] sm:$0xff] }
 0xc58   :  { %4641 = vpow2.f32 %v3979_v2 }
 0xc59   :  { %4643 = vpow2.f32 %v3980_v58  ;;  %v6926_v58 = vld [vmem:[#allocation7_spill] sm:$0xff] }
 0xc5a   :  { %4645 = vpow2.f32 %v3981_v8 }
 0xc5b   :  { %4647 = vtanh.f32 %v2915_v14 }
 0xc62   :  { %v4642_v22 = vpop.eup %4641 }
 0xc63   :  { %v4644_v23 = vpop.eup %4643  ;;  %v2920_v11 = vadd.f32 1.0, %v4642_v22 }
 0xc64   :  { %v2926_v41 = vadd.f32 1.0, %v4644_v23  ;;  %v4646_v17 = vpop.eup %4645 }
 0xc65   :  { %4649 = vrcp.f32 %v2920_v11  ;;  %v4648_v24 = vpop.eup %4647  ;;  %v2933_v59 = vadd.f32 1.0, %v4646_v17 }
 0xc66   :  { %4651 = vrcp.f32 %v2926_v41 }
 0xc67   :  { %4653 = vrcp.f32 %v2933_v59 }
 0xc6f   :  { %v4650_v18 = vpop.eup %4649 }
 0xc70   :  { %v4652_v3 = vpop.eup %4651  ;;  %v2937_v53 = vmul.f32 %v4650_v18, %v4648_v24 }
 0xc71   :  { %v2936_v30 = vmul.f32 %v4652_v3, %v6352_v52  ;;  %v4654_v56 = vpop.eup %4653 }
 0xc73   :  { %v6398_v9 = vadd.f32 %v2937_v53, %v2936_v30 }
 0xc75   :  { %4655 = vtanh.f32 %v6398_v9 }
 0xc7f   :  { %v4656_v60 = vpop.eup %4655 }
 0xc80   :  { %v6401_v63 = vmul.f32 %v4656_v60, %v4654_v56 }
 0xc82   :  { %v2942_v14 = vpack.c.bf16 %v6401_v63, %v6401_v63 }
 0xc84   :  { %2976 = vmatmul.mubr.bf16.vlgmr.msra.gmra.mrb[76].mxu1 %v2942_v14  ;;  %3017 = vmatmul.mubr.bf16.vlgmr.msra.gmra.mrb[84].mxu0 %v2942_v14 }
 0xc85   :  { %3056 = vmatpush1.bf16.msra.mxu1 %v5974_v61  ;;  %3097 = vmatpush1.bf16.msra.mxu0 %v5979_v38 }
 0xc86   :  { %3057 = vmatprep.subr.bf16.mxu1 %v5988_v39  ;;  %3098 = vmatprep.subr.bf16.mxu0 %v5993_v34 }
 0xc87   :  { %3087 = vmatprep.mubr.bf16.mxu1 %v6884_v35  ;;  %3128 = vmatprep.mubr.bf16.mxu0 %v6884_v35 }
 0xc89   :  { %3058 = vmatpush1.bf16.msra.mxu1 %v6000_v62  ;;  %3099 = vmatpush1.bf16.msra.mxu0 %v6005_v44 }
 0xc8a   :  { %3059 = vmatprep.subr.bf16.mxu1 %v6012_v48  ;;  %3100 = vmatprep.subr.bf16.mxu0 %v6017_v4 }
 0xc8d   :  { %3060 = vmatpush1.bf16.msra.mxu1 %v6026_v33  ;;  %3101 = vmatpush1.bf16.msra.mxu0 %v6031_v50 }
 0xc8e   :  { %3061 = vmatprep.subr.bf16.mxu1 %v6040_v42  ;;  %3102 = vmatprep.subr.bf16.mxu0 %v6045_v36 }
 0xc91   :  { %3062 = vmatpush1.bf16.msra.mxu1 %v6052_v32  ;;  %3103 = vmatpush1.bf16.msra.mxu0 %v6057_v40 }
 0xc92   :  { %3063 = vmatprep.subr.bf16.mxu1 %v6064_v0  ;;  %3104 = vmatprep.subr.bf16.mxu0 %v6069_v43 }
 0xc95   :  { %3064 = vmatpush1.bf16.msra.mxu1 %v6078_v54  ;;  %3105 = vmatpush1.bf16.msra.mxu0 %v6083_v37 }
 0xc96   :  { %3065 = vmatprep.subr.bf16.mxu1 %v6092_v5  ;;  %3106 = vmatprep.subr.bf16.mxu0 %v6097_v7 }
 0xc99   :  { %3066 = vmatpush1.bf16.msra.mxu1 %v6104_v29  ;;  %3107 = vmatpush1.bf16.msra.mxu0 %v6109_v27 }
 0xc9a   :  { %3067 = vmatprep.subr.bf16.mxu1 %v6116_v31  ;;  %3108 = vmatprep.subr.bf16.mxu0 %v6121_v12 }
 0xc9d   :  { %3068 = vmatpush1.bf16.msra.mxu1 %v6130_v13  ;;  %3109 = vmatpush1.bf16.msra.mxu0 %v6135_v47 }
 0xc9e   :  { %3069 = vmatprep.subr.bf16.mxu1 %v6144_v15  ;;  %3110 = vmatprep.subr.bf16.mxu0 %v6149_v16 }
 0xca1   :  { %3070 = vmatpush1.bf16.msra.mxu1 %v6156_v49  ;;  %3111 = vmatpush1.bf16.msra.mxu0 %v6161_v45 }
 0xca2   :  { %3167 = vmatprep.subr.bf16.mxu1 %v5962_v57  ;;  %3208 = vmatprep.subr.bf16.mxu0 %v5967_v46 }
 0xd57   :  { %v2977_v52 = vpop.f32.mrb[76].mxu1  ;;  %v3018_v55 = vpop.f32.mrb[84].mxu0 }
 0xd58   :  { %v3025_v1 = vadd.f32 %v2977_v52, %v6252_v28  ;;  %v3027_v19 = vadd.f32 %v3018_v55, %v6924_v25  ;;  %v2979_v51 = vpop.f32.mrb[77].mxu1  ;;  %v3020_v2 = vpop.f32.mrb[85].mxu0 }
 0xd59   :  { %v3026_v6 = vadd.f32 %v2979_v51, %v6925_v26  ;;  %v3028_v8 = vadd.f32 %v3020_v2, %v6926_v58  ;;  %v2981_v22 = vpop.f32.mrb[78].mxu1  ;;  %v3022_v23 = vpop.f32.mrb[86].mxu0 }
 0xd5a   :  { %v3982_v11 = vmul.f32 -1.442695, %v3025_v1  ;;  %v2982_v41 = vpop.f32.mrb[79].mxu1  ;;  %v3023_v17 = vpop.f32.mrb[87].mxu0 }
 0xd5b   :  { %v3983_v24 = vmul.f32 -1.442695, %v3026_v6  ;;  %v3984_v18 = vmul.f32 -1.442695, %v3028_v8 }
 0xd5c   :  { %4657 = vpow2.f32 %v3982_v11 }
 0xd5d   :  { %4659 = vpow2.f32 %v3983_v24 }
 0xd5e   :  { %4661 = vpow2.f32 %v3984_v18 }
 0xd5f   :  { %4663 = vtanh.f32 %v3027_v19 }
 0xd66   :  { %v4658_v3 = vpop.eup %4657 }
 0xd67   :  { %v4660_v53 = vpop.eup %4659  ;;  %v3032_v28 = vadd.f32 1.0, %v4658_v3 }
 0xd68   :  { %v3038_v59 = vadd.f32 1.0, %v4660_v53  ;;  %v4662_v30 = vpop.eup %4661 }
 0xd69   :  { %4665 = vrcp.f32 %v3032_v28  ;;  %v4664_v56 = vpop.eup %4663  ;;  %v3045_v55 = vadd.f32 1.0, %v4662_v30 }
 0xd6a   :  { %4667 = vrcp.f32 %v3038_v59 }
 0xd6b   :  { %4669 = vrcp.f32 %v3045_v55  ;;  %v6506_v55 = vld [vmem:[%s6853_s11 + $0x8] ss:$16 sps:$4 sm:$0xff]  }
 0xd73   :  { %v4666_v60 = vpop.eup %4665 }
 0xd74   :  { %v4668_v14 = vpop.eup %4667  ;;  %v3049_v52 = vmul.f32 %v4666_v60, %v4664_v56 }
 0xd75   :  { %v3048_v1 = vmul.f32 %v4668_v14, %v6398_v9  ;;  %v4670_v51 = vpop.eup %4669 }
 0xd77   :  { %v6444_v25 = vadd.f32 %v3049_v52, %v3048_v1  ;;  %v6500_v52 = vld [vmem:[%s6853_s11] ss:$16 sps:$4 sm:$0xff]   ;;  %v6512_v1 = vld [vmem:[%s6853_s11 + $0x24] ss:$16 sps:$4 sm:$0xff]  }
 0xd79   :  { %4671 = vtanh.f32 %v6444_v25 }
 0xd83   :  { %v4672_v2 = vpop.eup %4671 }
 0xd84   :  { %v6447_v26 = vmul.f32 %v4672_v2, %v4670_v51  ;;  %v6526_v51 = vld [vmem:[%s6853_s11 + $0x20] ss:$16 sps:$4 sm:$0xff]   ;;  %v6532_v2 = vld [vmem:[%s6853_s11 + $0x28] ss:$16 sps:$4 sm:$0xff]  }
 0xd86   :  { %v3054_v19 = vpack.c.bf16 %v6447_v26, %v6447_v26 }
 0xd88   :  { %3088 = vmatmul.mubr.bf16.vlgmr.msra.gmra.mrb[80].mxu1 %v3054_v19  ;;  %3129 = vmatmul.mubr.bf16.vlgmr.msra.gmra.mrb[88].mxu0 %v3054_v19  ;;  %v6538_v19 = vld [vmem:[%s6853_s11 + $0x44] ss:$16 sps:$4 sm:$0xff]  }
 0xd89   :  { %3168 = vmatpush1.bf16.msra.mxu1 %v5974_v61  ;;  %3209 = vmatpush1.bf16.msra.mxu0 %v5979_v38 }
 0xd8a   :  { %3169 = vmatprep.subr.bf16.mxu1 %v5988_v39  ;;  %3210 = vmatprep.subr.bf16.mxu0 %v5993_v34  ;;  %v6927_v39 = vld [vmem:[#allocation8_spill] sm:$0xff] }
 0xd8b   :  { %3199 = vmatprep.mubr.bf16.mxu1 %v6884_v35  ;;  %3240 = vmatprep.mubr.bf16.mxu0 %v6884_v35 }
 0xd8d   :  { %3170 = vmatpush1.bf16.msra.mxu1 %v6000_v62  ;;  %3211 = vmatpush1.bf16.msra.mxu0 %v6005_v44  ;;  %v6928_v62 = vld [vmem:[#allocation9_spill] sm:$0xff] }
 0xd8e   :  { %3171 = vmatprep.subr.bf16.mxu1 %v6012_v48  ;;  %3212 = vmatprep.subr.bf16.mxu0 %v6017_v4 }
 0xd91   :  { %3172 = vmatpush1.bf16.msra.mxu1 %v6026_v33  ;;  %3213 = vmatpush1.bf16.msra.mxu0 %v6031_v50  ;;  %v6929_v33 = vld [vmem:[#allocation10_spill] sm:$0xff] }
 0xd92   :  { %3173 = vmatprep.subr.bf16.mxu1 %v6040_v42  ;;  %3214 = vmatprep.subr.bf16.mxu0 %v6045_v36  ;;  %v6930_v42 = vld [vmem:[#allocation11_spill] sm:$0xff] }
 0xd95   :  { %3174 = vmatpush1.bf16.msra.mxu1 %v6052_v32  ;;  %3215 = vmatpush1.bf16.msra.mxu0 %v6057_v40 }
 0xd96   :  { %3175 = vmatprep.subr.bf16.mxu1 %v6064_v0  ;;  %3216 = vmatprep.subr.bf16.mxu0 %v6069_v43 }
 0xd99   :  { %3176 = vmatpush1.bf16.msra.mxu1 %v6078_v54  ;;  %3217 = vmatpush1.bf16.msra.mxu0 %v6083_v37 }
 0xd9a   :  { %3177 = vmatprep.subr.bf16.mxu1 %v6092_v5  ;;  %3218 = vmatprep.subr.bf16.mxu0 %v6097_v7 }
 0xd9d   :  { %3178 = vmatpush1.bf16.msra.mxu1 %v6104_v29  ;;  %3219 = vmatpush1.bf16.msra.mxu0 %v6109_v27 }
 0xd9e   :  { %3179 = vmatprep.subr.bf16.mxu1 %v6116_v31  ;;  %3220 = vmatprep.subr.bf16.mxu0 %v6121_v12 }
 0xda1   :  { %3180 = vmatpush1.bf16.msra.mxu1 %v6130_v13  ;;  %3221 = vmatpush1.bf16.msra.mxu0 %v6135_v47 }
 0xda2   :  { %3181 = vmatprep.subr.bf16.mxu1 %v6144_v15  ;;  %3222 = vmatprep.subr.bf16.mxu0 %v6149_v16 }
 0xda5   :  { %3182 = vmatpush1.bf16.msra.mxu1 %v6156_v49  ;;  %3223 = vmatpush1.bf16.msra.mxu0 %v6161_v45 }
 0xda6   :  { %3279 = vmatprep.subr.bf16.mxu1 %v5962_v57  ;;  %3320 = vmatprep.subr.bf16.mxu0 %v5967_v46 }
 0xe5b   :  { %v3089_v61 = vpop.f32.mrb[80].mxu1  ;;  %v3130_v38 = vpop.f32.mrb[88].mxu0 }
 0xe5c   :  { %v3137_v34 = vadd.f32 %v3089_v61, %v6927_v39  ;;  %v3139_v44 = vadd.f32 %v3130_v38, %v6928_v62  ;;  %v3091_v48 = vpop.f32.mrb[81].mxu1  ;;  %v3132_v4 = vpop.f32.mrb[89].mxu0  ;;  %v6544_v61 = vld [vmem:[%s6853_s11 + $0x4c] ss:$16 sps:$4 sm:$0xff]   ;;  %v6550_v38 = vld [vmem:[%s6853_s11 + $0x40] ss:$16 sps:$4 sm:$0xff]  }
 0xe5d   :  { %v3138_v50 = vadd.f32 %v3091_v48, %v6929_v33  ;;  %v3140_v36 = vadd.f32 %v3132_v4, %v6930_v42  ;;  %v3093_v32 = vpop.f32.mrb[82].mxu1  ;;  %v3134_v40 = vpop.f32.mrb[90].mxu0  ;;  %v6556_v39 = vld [vmem:[%s6853_s11 + $0x48] ss:$16 sps:$4 sm:$0xff]   ;;  %v6568_v62 = vld [vmem:[%s6853_s11 + $0x6c] ss:$16 sps:$4 sm:$0xff]  }
 0xe5e   :  { %v3985_v9 = vmul.f32 -1.442695, %v3137_v34  ;;  %v3094_v6 = vpop.f32.mrb[83].mxu1  ;;  %v3135_v58 = vpop.f32.mrb[91].mxu0  ;;  %v6562_v34 = vld [vmem:[%s6853_s11 + $0x64] ss:$16 sps:$4 sm:$0xff]  }
 0xe5f   :  { %v3986_v57 = vmul.f32 -1.442695, %v3138_v50  ;;  %v3987_v46 = vmul.f32 -1.442695, %v3140_v36  ;;  %v6580_v48 = vld [vmem:[%s6853_s11 + $0x68] ss:$16 sps:$4 sm:$0xff]  }
 0xe60   :  { %4673 = vpow2.f32 %v3985_v9 }
 0xe61   :  { %4675 = vpow2.f32 %v3986_v57 }
 0xe62   :  { %4677 = vpow2.f32 %v3987_v46 }
 0xe63   :  { %4679 = vtanh.f32 %v3139_v44  ;;  %v6574_v44 = vld [vmem:[%s6853_s11 + $0x60] ss:$16 sps:$4 sm:$0xff]  }
 0xe6a   :  { %v4674_v8 = vpop.eup %4673 }
 0xe6b   :  { %v4676_v22 = vpop.eup %4675  ;;  %v3144_v23 = vadd.f32 1.0, %v4674_v8 }
 0xe6c   :  { %v3150_v11 = vadd.f32 1.0, %v4676_v22  ;;  %v4678_v41 = vpop.eup %4677 }
 0xe6d   :  { %4681 = vrcp.f32 %v3144_v23  ;;  %v4680_v17 = vpop.eup %4679  ;;  %v3157_v53 = vadd.f32 1.0, %v4678_v41 }
 0xe6e   :  { %4683 = vrcp.f32 %v3150_v11 }
 0xe6f   :  { %4685 = vrcp.f32 %v3157_v53  ;;  %v4786_v53 = vld [vmem:[%s6853_s11 + $0x8c] ss:$16 sps:$4 sm:$0xff]  }
 0xe77   :  { %v4682_v24 = vpop.eup %4681 }
 0xe78   :  { %v4684_v18 = vpop.eup %4683  ;;  %v3161_v3 = vmul.f32 %v4682_v24, %v4680_v17 }
 0xe79   :  { %v3160_v28 = vmul.f32 %v4684_v18, %v6444_v25  ;;  %v4686_v30 = vpop.eup %4685  ;;  %v6518_v25 = vld [vmem:[%s6853_s11 + $0x2c] ss:$16 sps:$4 sm:$0xff]  }
 0xe7b   :  { %v6490_v59 = vadd.f32 %v3161_v3, %v3160_v28  ;;  %v4787_v28 = vld [vmem:[%s6853_s11 + $0x80] ss:$16 sps:$4 sm:$0xff]  }
 0xe7d   :  { %4687 = vtanh.f32 %v6490_v59 }
 0xe87   :  { %v4688_v56 = vpop.eup %4687 }
 0xe88   :  { %v6493_v60 = vmul.f32 %v4688_v56, %v4686_v30  ;;  %v4789_v30 = vld [vmem:[%s6853_s11 + $0xa4] ss:$16 sps:$4 sm:$0xff]   ;;  %v4790_v56 = vld [vmem:[%s6853_s11 + $0xac] ss:$16 sps:$4 sm:$0xff]  }
 0xe8a   :  { %v3166_v14 = vpack.c.bf16 %v6493_v60, %v6493_v60 }
 0xe8c   :  { %3200 = vmatmul.mubr.bf16.vlgmr.msra.gmra.mrb[84].mxu1 %v3166_v14  ;;  %3241 = vmatmul.mubr.bf16.vlgmr.msra.gmra.mrb[92].mxu0 %v3166_v14  ;;  %v4791_v14 = vld [vmem:[%s6853_s11 + $0xa0] ss:$16 sps:$4 sm:$0xff]  }
 0xe8d   :  { %3280 = vmatpush1.bf16.msra.mxu1 %v6500_v52  ;;  %3321 = vmatpush1.bf16.msra.mxu0 %v6506_v55 }
 0xe8e   :  { %3281 = vmatprep.subr.bf16.mxu1 %v6512_v1  ;;  %3322 = vmatprep.subr.bf16.mxu0 %v6518_v25 }
 0xe8f   :  { %3311 = vmatprep.mubr.bf16.mxu1 %v6884_v35  ;;  %3352 = vmatprep.mubr.bf16.mxu0 %v6884_v35 }
 0xe91   :  { %3282 = vmatpush1.bf16.msra.mxu1 %v6526_v51  ;;  %3323 = vmatpush1.bf16.msra.mxu0 %v6532_v2 }
 0xe92   :  { %3283 = vmatprep.subr.bf16.mxu1 %v6538_v19  ;;  %3324 = vmatprep.subr.bf16.mxu0 %v6544_v61 }
 0xe95   :  { %3284 = vmatpush1.bf16.msra.mxu1 %v6550_v38  ;;  %3325 = vmatpush1.bf16.msra.mxu0 %v6556_v39 }
 0xe96   :  { %3285 = vmatprep.subr.bf16.mxu1 %v6562_v34  ;;  %3326 = vmatprep.subr.bf16.mxu0 %v6568_v62 }
 0xe99   :  { %3286 = vmatpush1.bf16.msra.mxu1 %v6574_v44  ;;  %3327 = vmatpush1.bf16.msra.mxu0 %v6580_v48 }
 0xe9a   :  { %3287 = vmatprep.subr.bf16.mxu1 %v6064_v0  ;;  %3328 = vmatprep.subr.bf16.mxu0 %v6069_v43  ;;  %v4783_v0 = vld [vmem:[%s6853_s11 + $0x4] ss:$16 sps:$4 sm:$0xff]   ;;  %v4784_v43 = vld [vmem:[%s6853_s11 + $0xc] ss:$16 sps:$4 sm:$0xff]  }
 0xe9d   :  { %3288 = vmatpush1.bf16.msra.mxu1 %v6078_v54  ;;  %3329 = vmatpush1.bf16.msra.mxu0 %v6083_v37 }
 0xe9e   :  { %3289 = vmatprep.subr.bf16.mxu1 %v6092_v5  ;;  %3330 = vmatprep.subr.bf16.mxu0 %v6097_v7  ;;  %v6931_v5 = vld [vmem:[#allocation12_spill] sm:$0xff] }
 0xea1   :  { %3290 = vmatpush1.bf16.msra.mxu1 %v6104_v29  ;;  %3331 = vmatpush1.bf16.msra.mxu0 %v6109_v27  ;;  %v6932_v29 = vld [vmem:[#allocation13_spill] sm:$0xff] }
 0xea2   :  { %3291 = vmatprep.subr.bf16.mxu1 %v6116_v31  ;;  %3332 = vmatprep.subr.bf16.mxu0 %v6121_v12 }
 0xea5   :  { %3292 = vmatpush1.bf16.msra.mxu1 %v6130_v13  ;;  %3333 = vmatpush1.bf16.msra.mxu0 %v6135_v47  ;;  %v6933_v13 = vld [vmem:[#allocation14_spill] sm:$0xff] }
 0xea6   :  { %3293 = vmatprep.subr.bf16.mxu1 %v6144_v15  ;;  %3334 = vmatprep.subr.bf16.mxu0 %v6149_v16  ;;  %v6934_v15 = vld [vmem:[#allocation15_spill] sm:$0xff] }
 0xea9   :  { %3294 = vmatpush1.bf16.msra.mxu1 %v6156_v49  ;;  %3335 = vmatpush1.bf16.msra.mxu0 %v6161_v45 }
 0xeaa   :  { %3391 = vmatprep.subr.bf16.mxu1 %v4783_v0  ;;  %3432 = vmatprep.subr.bf16.mxu0 %v4784_v43 }
 0xf5f   :  { %v3201_v54 = vpop.f32.mrb[84].mxu1  ;;  %v3242_v37 = vpop.f32.mrb[92].mxu0 }
 0xf60   :  { %v3249_v7 = vadd.f32 %v3201_v54, %v6931_v5  ;;  %v3251_v27 = vadd.f32 %v3242_v37, %v6932_v29  ;;  %v3203_v31 = vpop.f32.mrb[85].mxu1  ;;  %v3244_v12 = vpop.f32.mrb[93].mxu0  ;;  %v6937_v37 = vld [vmem:[#allocation18_spill] sm:$0xff] }
 0xf61   :  { %v3250_v47 = vadd.f32 %v3203_v31, %v6933_v13  ;;  %v3252_v16 = vadd.f32 %v3244_v12, %v6934_v15  ;;  %v3205_v49 = vpop.f32.mrb[86].mxu1  ;;  %v3246_v45 = vpop.f32.mrb[94].mxu0 }
 0xf62   :  { %v3988_v4 = vmul.f32 -1.442695, %v3249_v7  ;;  %v3206_v33 = vpop.f32.mrb[87].mxu1  ;;  %v3247_v50 = vpop.f32.mrb[95].mxu0  ;;  %v6938_v7 = vld [vmem:[#allocation19_spill] sm:$0xff] }
 0xf63   :  { %v3989_v42 = vmul.f32 -1.442695, %v3250_v47  ;;  %v3990_v36 = vmul.f32 -1.442695, %v3252_v16 }
 0xf64   :  { %4689 = vpow2.f32 %v3988_v4 }
 0xf65   :  { %4691 = vpow2.f32 %v3989_v42 }
 0xf66   :  { %4693 = vpow2.f32 %v3990_v36 }
 0xf67   :  { %4695 = vtanh.f32 %v3251_v27 }
 0xf6e   :  { %v4690_v32 = vpop.eup %4689 }
 0xf6f   :  { %v4692_v40 = vpop.eup %4691  ;;  %v3256_v9 = vadd.f32 1.0, %v4690_v32 }
 0xf70   :  { %v3262_v6 = vadd.f32 1.0, %v4692_v40  ;;  %v4694_v58 = vpop.eup %4693 }
 0xf71   :  { %4697 = vrcp.f32 %v3256_v9  ;;  %v4696_v57 = vpop.eup %4695  ;;  %v3269_v23 = vadd.f32 1.0, %v4694_v58 }
 0xf72   :  { %4699 = vrcp.f32 %v3262_v6 }
 0xf73   :  { %4701 = vrcp.f32 %v3269_v23  ;;  %v3526_v23 = vld [vmem:[%s6855_s13] sm:$0xff] }
 0xf7b   :  { %v4698_v46 = vpop.eup %4697 }
 0xf7c   :  { %v4700_v8 = vpop.eup %4699  ;;  %v3273_v22 = vmul.f32 %v4698_v46, %v4696_v57 }
 0xf7d   :  { %v3272_v11 = vmul.f32 %v4700_v8, %v6490_v59  ;;  %v4702_v17 = vpop.eup %4701  ;;  %v4788_v59 = vld [vmem:[%s6853_s11 + $0x88] ss:$16 sps:$4 sm:$0xff]  }
 0xf7f   :  { %v6610_v41 = vadd.f32 %v3273_v22, %v3272_v11  ;;  %v3527_v11 = vld [vmem:[%s6855_s13 + $0x8] sm:$0xff] }
 0xf81   :  { %4703 = vtanh.f32 %v6610_v41 }
 0xf8b   :  { %v4704_v24 = vpop.eup %4703 }
 0xf8c   :  { %v6613_v18 = vmul.f32 %v4704_v24, %v4702_v17  ;;  %v3528_v17 = vld [vmem:[%s6855_s13 + $0x10] sm:$0xff]  ;;  %v3529_v24 = vld [vmem:[%s6855_s13 + $0x18] sm:$0xff] }
 0xf8e   :  { %v3278_v3 = vpack.c.bf16 %v6613_v18, %v6613_v18 }
 0xf90   :  { %3312 = vmatmul.mubr.bf16.vlgmr.msra.gmra.mrb[88].mxu1 %v3278_v3  ;;  %3353 = vmatmul.mubr.bf16.vlgmr.msra.gmra.mrb[96].mxu0 %v3278_v3  ;;  %v4168_v3 = vpack.c.bf16 %v3529_v24, %v3528_v17  ;;  %v3513_v17 = vld [vmem:[%s6856_s12 + $0x18] sm:$0xff] }
 0xf91   :  { %3392 = vmatpush1.bf16.msra.mxu1 %v6500_v52  ;;  %3433 = vmatpush1.bf16.msra.mxu0 %v6506_v55  ;;  %v4792_v52 = vld [vmem:[%s6853_s11 + $0xa8] ss:$16 sps:$4 sm:$0xff]   ;;  %v4793_v55 = vld [vmem:[%s6853_s11 + $0xc4] ss:$16 sps:$4 sm:$0xff]  }
 0xf92   :  { %3393 = vmatprep.subr.bf16.mxu1 %v6512_v1  ;;  %3434 = vmatprep.subr.bf16.mxu0 %v6518_v25  ;;  %v4794_v1 = vld [vmem:[%s6853_s11 + $0xcc] ss:$16 sps:$4 sm:$0xff]   ;;  %v4795_v25 = vld [vmem:[%s6853_s11 + $0xc0] ss:$16 sps:$4 sm:$0xff]  }
 0xf93   :  { %3423 = vmatprep.mubr.bf16.mxu1 %v6884_v35  ;;  %3464 = vmatprep.mubr.bf16.mxu0 %v6884_v35  ;;  %v4785_v35 = vld [vmem:[%s6853_s11 + $0x84] ss:$16 sps:$4 sm:$0xff]  }
 0xf95   :  { %3394 = vmatpush1.bf16.msra.mxu1 %v6526_v51  ;;  %3435 = vmatpush1.bf16.msra.mxu0 %v6532_v2  ;;  %v4796_v51 = vld [vmem:[%s6853_s11 + $0xc8] ss:$16 sps:$4 sm:$0xff]   ;;  %v4797_v2 = vld [vmem:[%s6853_s11 + $0xe4] ss:$16 sps:$4 sm:$0xff]  }
 0xf96   :  { %3395 = vmatprep.subr.bf16.mxu1 %v6538_v19  ;;  %3436 = vmatprep.subr.bf16.mxu0 %v6544_v61  ;;  %v4798_v19 = vld [vmem:[%s6853_s11 + $0xec] ss:$16 sps:$4 sm:$0xff]   ;;  %v4799_v61 = vld [vmem:[%s6853_s11 + $0xe0] ss:$16 sps:$4 sm:$0xff]  }
 0xf99   :  { %3396 = vmatpush1.bf16.msra.mxu1 %v6550_v38  ;;  %3437 = vmatpush1.bf16.msra.mxu0 %v6556_v39  ;;  %v4800_v38 = vld [vmem:[%s6853_s11 + $0xe8] ss:$16 sps:$4 sm:$0xff]  }
 0xf9a   :  { %3397 = vmatprep.subr.bf16.mxu1 %v6562_v34  ;;  %3438 = vmatprep.subr.bf16.mxu0 %v6568_v62  ;;  %v6935_v62 = vld [vmem:[#allocation16_spill] sm:$0xff] }
 0xf9d   :  { %3398 = vmatpush1.bf16.msra.mxu1 %v6574_v44  ;;  %3439 = vmatpush1.bf16.msra.mxu0 %v6580_v48  ;;  %v6936_v48 = vld [vmem:[#allocation17_spill] sm:$0xff] }
 0xf9e   :  { %3399 = vmatprep.subr.bf16.mxu1 %v4785_v35  ;;  %3440 = vmatprep.subr.bf16.mxu0 %v4786_v53  ;;  %v3530_v35 = vld [vmem:[%s6855_s13 + $0x20] sm:$0xff]  ;;  %v3531_v53 = vld [vmem:[%s6855_s13 + $0x28] sm:$0xff] }
 0xfa1   :  { %3400 = vmatpush1.bf16.msra.mxu1 %v4787_v28  ;;  %3441 = vmatpush1.bf16.msra.mxu0 %v4788_v59  ;;  %v4172_v28 = vpack.c.bf16 %v3531_v53, %v3530_v35  ;;  %v3532_v59 = vld [vmem:[%s6855_s13 + $0x30] sm:$0xff]  ;;  %v3515_v53 = vld [vmem:[%s6856_s12 + $0x28] sm:$0xff] }
 0xfa2   :  { %3401 = vmatprep.subr.bf16.mxu1 %v4789_v30  ;;  %3442 = vmatprep.subr.bf16.mxu0 %v4790_v56  ;;  %v3533_v30 = vld [vmem:[%s6855_s13 + $0x38] sm:$0xff] }
 0xfa3   :  { %v4176_v56 = vpack.c.bf16 %v3533_v30, %v3532_v59  ;;  %v3516_v59 = vld [vmem:[%s6856_s12 + $0x30] sm:$0xff]  ;;  %v3517_v30 = vld [vmem:[%s6856_s12 + $0x38] sm:$0xff] }
 0xfa5   :  { %3402 = vmatpush1.bf16.msra.mxu1 %v4791_v14  ;;  %3443 = vmatpush1.bf16.msra.mxu0 %v4792_v52  ;;  %v3534_v14 = vld [vmem:[%s6855_s13 + $0x40] sm:$0xff]  ;;  %v3535_v52 = vld [vmem:[%s6855_s13 + $0x48] sm:$0xff] }
 0xfa6   :  { %3403 = vmatprep.subr.bf16.mxu1 %v4793_v55  ;;  %3444 = vmatprep.subr.bf16.mxu0 %v4794_v1  ;;  %v4180_v55 = vpack.c.bf16 %v3535_v52, %v3534_v14  ;;  %v3536_v1 = vld [vmem:[%s6855_s13 + $0x50] sm:$0xff]  ;;  %v3518_v14 = vld [vmem:[%s6856_s12 + $0x40] sm:$0xff]  ;;  %v3519_v52 = vld [vmem:[%s6856_s12 + $0x48] sm:$0xff] }
 0xfa9   :  { %3404 = vmatpush1.bf16.msra.mxu1 %v4795_v25  ;;  %3445 = vmatpush1.bf16.msra.mxu0 %v4796_v51  ;;  %v3537_v25 = vld [vmem:[%s6855_s13 + $0x58] sm:$0xff] }
 0xfaa   :  { %3405 = vmatprep.subr.bf16.mxu1 %v4797_v2  ;;  %3446 = vmatprep.subr.bf16.mxu0 %v4798_v19  ;;  %v4184_v51 = vpack.c.bf16 %v3537_v25, %v3536_v1  ;;  %v3538_v2 = vld [vmem:[%s6855_s13 + $0x60] sm:$0xff]  ;;  %v3539_v19 = vld [vmem:[%s6855_s13 + $0x68] sm:$0xff]  ;;  %v3520_v1 = vld [vmem:[%s6856_s12 + $0x50] sm:$0xff] }
 0xfab   :  { %v3521_v25 = vld [vmem:[%s6856_s12 + $0x58] sm:$0xff] }
 0xfad   :  { %3406 = vmatpush1.bf16.msra.mxu1 %v4799_v61  ;;  %3447 = vmatpush1.bf16.msra.mxu0 %v4800_v38  ;;  %v4188_v61 = vpack.c.bf16 %v3539_v19, %v3538_v2  ;;  %v3540_v38 = vld [vmem:[%s6855_s13 + $0x70] sm:$0xff]  ;;  %v3522_v2 = vld [vmem:[%s6856_s12 + $0x60] sm:$0xff]  ;;  %v3523_v19 = vld [vmem:[%s6856_s12 + $0x68] sm:$0xff] }
0x1063   :  { %v3313_v39 = vpop.f32.mrb[88].mxu1  ;;  %v3354_v34 = vpop.f32.mrb[96].mxu0 }
0x1064   :  { %v3361_v44 = vadd.f32 %v3313_v39, %v6935_v62  ;;  %v3363_v0 = vadd.f32 %v3354_v34, %v6936_v48  ;;  %v3315_v43 = vpop.f32.mrb[89].mxu1  ;;  %v3356_v54 = vpop.f32.mrb[97].mxu0  ;;  %v3541_v39 = vld [vmem:[%s6855_s13 + $0x78] sm:$0xff]  ;;  %v3510_v62 = vld [vmem:[%s6856_s12] sm:$0xff] }
0x1065   :  { %v3362_v5 = vadd.f32 %v3315_v43, %v6937_v37  ;;  %v3364_v29 = vadd.f32 %v3356_v54, %v6938_v7  ;;  %v3317_v27 = vpop.f32.mrb[90].mxu1  ;;  %v3358_v31 = vpop.f32.mrb[98].mxu0  ;;  %v4192_v34 = vpack.c.bf16 %v3541_v39, %v3540_v38  ;;  %v6939_v54 = vld [vmem:[#allocation20_spill] sm:$0xff]  ;;  %v3524_v38 = vld [vmem:[%s6856_s12 + $0x70] sm:$0xff] }
0x1066   :  { %v3991_v12 = vmul.f32 -1.442695, %v3361_v44  ;;  %v3318_v13 = vpop.f32.mrb[91].mxu1  ;;  %v3359_v47 = vpop.f32.mrb[99].mxu0  ;;  %v3511_v44 = vld [vmem:[%s6856_s12 + $0x8] sm:$0xff] }
0x1067   :  { %v3992_v15 = vmul.f32 -1.442695, %v3362_v5  ;;  %v3993_v16 = vmul.f32 -1.442695, %v3364_v29  ;;  %v4196_v48 = vpack.c.bf16 %v3511_v44, %v3510_v62  ;;  %v6940_v5 = vld [vmem:[#allocation4_spill] sm:$0xff]  ;;  %v6941_v31 = vld [vmem:[#allocation21_spill] sm:$0xff] }
0x1068   :  { %4705 = vpow2.f32 %v3991_v12 }
0x1069   :  { %4707 = vpow2.f32 %v3992_v15 }
0x106a   :  { %4709 = vpow2.f32 %v3993_v16 }
0x106b   :  { %4711 = vtanh.f32 %v3363_v0 }
0x1072   :  { %v4706_v49 = vpop.eup %4705 }
0x1073   :  { %v4708_v45 = vpop.eup %4707  ;;  %v3368_v4 = vadd.f32 1.0, %v4706_v49 }
0x1074   :  { %v3374_v33 = vadd.f32 1.0, %v4708_v45  ;;  %v4710_v50 = vpop.eup %4709 }
0x1075   :  { %4713 = vrcp.f32 %v3368_v4  ;;  %v4712_v42 = vpop.eup %4711  ;;  %v3381_v9 = vadd.f32 1.0, %v4710_v50 }
0x1076   :  { %4715 = vrcp.f32 %v3374_v33 }
0x1077   :  { %4717 = vrcp.f32 %v3381_v9 }
0x107f   :  { %v4714_v36 = vpop.eup %4713 }
0x1080   :  { %v4716_v32 = vpop.eup %4715  ;;  %v3385_v40 = vmul.f32 %v4714_v36, %v4712_v42 }
0x1081   :  { %v3384_v6 = vmul.f32 %v4716_v32, %v6610_v41  ;;  %v4718_v57 = vpop.eup %4717  ;;  %v4164_v41 = vpack.c.bf16 %v3527_v11, %v3526_v23 }
0x1083   :  { %v6686_v58 = vadd.f32 %v3385_v40, %v3384_v6  ;;  %4165 = vmatprep.subr.bf16.mxu1 %v4164_v41 }
0x1085   :  { %4719 = vtanh.f32 %v6686_v58 }
0x108f   :  { %v4720_v46 = vpop.eup %4719 }
0x1090   :  { %v6689_v8 = vmul.f32 %v4720_v46, %v4718_v57 }
0x1092   :  { %v3390_v22 = vpack.c.bf16 %v6689_v8, %v6689_v8 }
0x1094   :  { %3424 = vmatmul.mubr.bf16.vlgmr.msra.gmra.mrb[92].mxu1 %v3390_v22  ;;  %3465 = vmatmul.mubr.bf16.vlgmr.msra.gmra.mrb[100].mxu0 %v3390_v22 }
0x1095   :  { %4167 = vmatpush3.bf16.msra.mxu1 %v4164_v41  ;;  %v3512_v41 = vld [vmem:[%s6856_s12 + $0x10] sm:$0xff] }
0x1096   :  { %4169 = vmatprep.subr.bf16.mxu1 %v4168_v3  ;;  %v4200_v35 = vpack.c.bf16 %v3513_v17, %v3512_v41 }
0x1099   :  { %4171 = vmatpush3.bf16.msra.mxu1 %v4168_v3 }
0x109a   :  { %4173 = vmatprep.subr.bf16.mxu1 %v4172_v28 }
0x109d   :  { %4175 = vmatpush3.bf16.msra.mxu1 %v4172_v28 }
0x109e   :  { %4177 = vmatprep.subr.bf16.mxu1 %v4176_v56 }
0x10a1   :  { %4179 = vmatpush3.bf16.msra.mxu1 %v4176_v56  ;;  %v4208_v56 = vpack.c.bf16 %v3517_v30, %v3516_v59 }
0x10a2   :  { %4181 = vmatprep.subr.bf16.mxu1 %v4180_v55 }
0x10a5   :  { %4183 = vmatpush3.bf16.msra.mxu1 %v4180_v55  ;;  %v4212_v55 = vpack.c.bf16 %v3519_v52, %v3518_v14 }
0x10a6   :  { %4185 = vmatprep.subr.bf16.mxu1 %v4184_v51 }
0x10a9   :  { %4187 = vmatpush3.bf16.msra.mxu1 %v4184_v51  ;;  %v4216_v51 = vpack.c.bf16 %v3521_v25, %v3520_v1 }
0x10aa   :  { %4189 = vmatprep.subr.bf16.mxu1 %v4188_v61 }
0x10ad   :  { %4191 = vmatpush3.bf16.msra.mxu1 %v4188_v61  ;;  %v4220_v61 = vpack.c.bf16 %v3523_v19, %v3522_v2 }
0x10ae   :  { %4193 = vmatprep.subr.bf16.mxu1 %v4192_v34 }
0x10b1   :  { %4195 = vmatpush3.bf16.msra.mxu1 %v4192_v34  ;;  %v3997_v34 = vld [vmem:[%s6857_s14] ss:$0 sm:$0xff] }
0x10b2   :  { %4197 = vmatprep.subr.bf16.mxu1 %v4196_v48 }
0x1167   :  { %v3425_v0 = vpop.f32.mrb[92].mxu1  ;;  %v3466_v43 = vpop.f32.mrb[100].mxu0 }
0x1168   :  { %v3473_v37 = vadd.f32 %v3425_v0, %v6939_v54  ;;  %v3475_v7 = vadd.f32 %v3466_v43, %v6940_v5  ;;  %v3427_v29 = vpop.f32.mrb[93].mxu1  ;;  %v3468_v27 = vpop.f32.mrb[101].mxu0 }
0x1169   :  { %v3474_v12 = vadd.f32 %v3427_v29, %v6941_v31  ;;  %v3476_v13 = vadd.f32 %v3468_v27, %v6300_v10  ;;  %v3429_v47 = vpop.f32.mrb[94].mxu1  ;;  %v3470_v15 = vpop.f32.mrb[102].mxu0 }
0x116a   :  { %v3994_v16 = vmul.f32 -1.442695, %v3473_v37  ;;  %v3430_v49 = vpop.f32.mrb[95].mxu1  ;;  %v3471_v45 = vpop.f32.mrb[103].mxu0 }
0x116b   :  { %v3995_v4 = vmul.f32 -1.442695, %v3474_v12  ;;  %v3996_v33 = vmul.f32 -1.442695, %v3476_v13 }
0x116c   :  { %4721 = vpow2.f32 %v3994_v16 }
0x116d   :  { %4723 = vpow2.f32 %v3995_v4 }
0x116e   :  { %4725 = vpow2.f32 %v3996_v33 }
0x116f   :  { %4727 = vtanh.f32 %v3475_v7 }
0x1176   :  { %v4722_v50 = vpop.eup %4721 }
0x1177   :  { %v4724_v42 = vpop.eup %4723  ;;  %v3480_v36 = vadd.f32 1.0, %v4722_v50 }
0x1178   :  { %v3486_v32 = vadd.f32 1.0, %v4724_v42  ;;  %v4726_v40 = vpop.eup %4725 }
0x1179   :  { %4729 = vrcp.f32 %v3480_v36  ;;  %v4728_v9 = vpop.eup %4727  ;;  %v3493_v46 = vadd.f32 1.0, %v4726_v40 }
0x117a   :  { %4731 = vrcp.f32 %v3486_v32 }
0x117b   :  { %4733 = vrcp.f32 %v3493_v46 }
0x1183   :  { %v4730_v10 = vpop.eup %4729 }
0x1184   :  { %v4732_v6 = vpop.eup %4731  ;;  %v3497_v57 = vmul.f32 %v4730_v10, %v4728_v9 }
0x1185   :  { %v3496_v22 = vmul.f32 %v4732_v6, %v6686_v58  ;;  %v4734_v11 = vpop.eup %4733  ;;  %v3514_v58 = vld [vmem:[%s6856_s12 + $0x20] sm:$0xff] }
0x1186   :  { %v4204_v28 = vpack.c.bf16 %v3515_v53, %v3514_v58 }
0x1187   :  { %v3498_v23 = vadd.f32 %v3497_v57, %v3496_v22 }
0x1189   :  { %4735 = vtanh.f32 %v3498_v23 }
0x1193   :  { %v4736_v24 = vpop.eup %4735 }
0x1194   :  { %v3500_v3 = vmul.f32 %v4736_v24, %v4734_v11 }
0x1196   :  { %4092 = vmatprep.mubr.f32.mxu1 %v3500_v3 }
0x1197   :  { %4093 = vmatmul.mubr.f32.vlgmr.msra.gmra.mrb[2].mxu1 %v6689_v8 }
0x1198   :  { %4199 = vmatpush3.bf16.msra.mxu1 %v4196_v48  ;;  %4095 = vmatprep.mubr.f32.mxu1 %v6613_v18 }
0x1199   :  { %4201 = vmatprep.subr.bf16.mxu1 %v4200_v35 }
0x119b   :  { %4096 = vmatmul.mubr.f32.gmra.mrb[96].mxu1 %v6493_v60 }
0x119c   :  { %4203 = vmatpush3.bf16.msra.mxu1 %v4200_v35  ;;  %4098 = vmatprep.mubr.f32.mxu1 %v6447_v26 }
0x119d   :  { %4205 = vmatprep.subr.bf16.mxu1 %v4204_v28 }
0x119f   :  { %4099 = vmatmul.mubr.f32.gmra.mrb[98].mxu1 %v6401_v63 }
0x11a0   :  { %4207 = vmatpush3.bf16.msra.mxu1 %v4204_v28  ;;  %4101 = vmatprep.mubr.f32.mxu1 %v6355_v21 }
0x11a1   :  { %4209 = vmatprep.subr.bf16.mxu1 %v4208_v56 }
0x11a3   :  { %4102 = vmatmul.mubr.f32.gmra.mrb[100].mxu1 %v6309_v20 }
0x11a4   :  { %4211 = vmatpush3.bf16.msra.mxu1 %v4208_v56  ;;  %4136 = vmatprep.mubr.f32.mxu1 %v6309_v20  ;;  %v3525_v20 = vld [vmem:[%s6856_s12 + $0x78] sm:$0xff] }
0x11a5   :  { %4213 = vmatprep.subr.bf16.mxu1 %v4212_v55  ;;  %v4224_v39 = vpack.c.bf16 %v3525_v20, %v3524_v38 }
0x11a8   :  { %4215 = vmatpush3.bf16.msra.mxu1 %v4212_v55 }
0x11a9   :  { %4217 = vmatprep.subr.bf16.mxu1 %v4216_v51 }
0x11ac   :  { %4219 = vmatpush3.bf16.msra.mxu1 %v4216_v51 }
0x11ad   :  { %4221 = vmatprep.subr.bf16.mxu1 %v4220_v61 }
0x11b0   :  { %4223 = vmatpush3.bf16.msra.mxu1 %v4220_v61 }
0x11b1   :  { %4225 = vmatprep.subr.bf16.mxu1 %v4224_v39 }
0x11b4   :  { %4227 = vmatpush3.bf16.msra.mxu1 %v4224_v39 }
0x11b7   :  { %4137 = vmatmul.mubr.f32.vlgmr.msra.gmra.mrb[2].mxu1 %v6355_v21 }
0x11b8   :  { %4139 = vmatprep.mubr.f32.mxu1 %v6401_v63 }
0x11bb   :  { %4140 = vmatmul.mubr.f32.gmra.mrb[96].mxu1 %v6447_v26 }
0x11bc   :  { %4142 = vmatprep.mubr.f32.mxu1 %v6493_v60 }
0x11bf   :  { %4143 = vmatmul.mubr.f32.gmra.mrb[98].mxu1 %v6613_v18 }
0x11c0   :  { %4145 = vmatprep.mubr.f32.mxu1 %v6689_v8 }
0x11c3   :  { %4146 = vmatmul.mubr.f32.gmra.mrb[100].mxu1 %v3500_v3 }
0x128a   :  { %v4138_v62 = vpop.f32.mrb[2].mxu1 }
0x128b   :  { %v3760_v44 = vadd.f32 %v4138_v62, %v3997_v34  ;;  %v3713_v48 = vpop.f32.mrb[3].mxu1 }
0x128c   :  { %v3759_v21 = vadd.f32 %v3997_v34, %v3713_v48 }
0x128d   :  { %3998 = vst.msk [vmem:[%s6858_s15 + $0x8] sm:$0xff] %vm3767_vm6, %v3760_v44 }
0x128e   :  { %3768 = vst.msk [vmem:[%s6858_s15] sm:$0xff] %vm3767_vm6, %v3759_v21  ;;  %v4141_v63 = vpop.f32.mrb[96].mxu1 }
0x128f   :  { %v3762_v26 = vadd.f32 %v4141_v63, %v3997_v34  ;;  %v3723_v60 = vpop.f32.mrb[97].mxu1 }
0x1290   :  { %v3761_v18 = vadd.f32 %v3997_v34, %v3723_v60 }
0x1291   :  { %4000 = vst.msk [vmem:[%s6858_s15 + $0x18] sm:$0xff] %vm3767_vm6, %v3762_v26 }
0x1292   :  { %3999 = vst.msk [vmem:[%s6858_s15 + $0x10] sm:$0xff] %vm3767_vm6, %v3761_v18  ;;  %v4144_v8 = vpop.f32.mrb[98].mxu1 }
0x1293   :  { %v3764_v0 = vadd.f32 %v4144_v8, %v3997_v34  ;;  %v3733_v43 = vpop.f32.mrb[99].mxu1 }
0x1294   :  { %v3763_v54 = vadd.f32 %v3997_v34, %v3733_v43 }
0x1295   :  { %4002 = vst.msk [vmem:[%s6858_s15 + $0x28] sm:$0xff] %vm3767_vm6, %v3764_v0 }
0x1296   :  { %4001 = vst.msk [vmem:[%s6858_s15 + $0x20] sm:$0xff] %vm3767_vm6, %v3763_v54  ;;  %v4147_v37 = vpop.f32.mrb[100].mxu1 }
0x1297   :  { %v3766_v5 = vadd.f32 %v4147_v37, %v3997_v34  ;;  %v3743_v7 = vpop.f32.mrb[101].mxu1 }
0x1298   :  { %v3765_v29 = vadd.f32 %v3997_v34, %v3743_v7 }
0x1299   :  { %4004 = vst.msk [vmem:[%s6858_s15 + $0x38] sm:$0xff] %vm3767_vm6, %v3766_v5 }
0x129a   :  { %4003 = vst.msk [vmem:[%s6858_s15 + $0x30] sm:$0xff] %vm3767_vm6, %v3765_v29 }

</bundles_post_ra>
